<compile_context>
chip_gen: v7x
topology: tpu7x:2x2x1
jax: 0.10.0
libtpu: 0.0.40
codegen_flags: <defaults>
</compile_context>

<pallas_src>
import jax
import jax.numpy as jnp
from jax import lax
from jax.experimental import pallas as pl
from jax.experimental.pallas import tpu as pltpu

IGNORE_INDEX = -100

# ----------------------------------------------------------------------------
# Model config (small, synthetic, lane-dense: D is a multiple of 128)
# ----------------------------------------------------------------------------
VOCAB = 256
D_MODEL = 128
N_HEADS = 4
HEAD_DIM = D_MODEL // N_HEADS
D_FFN = 256
N_LAYERS = 2

MAX_TXT_LEN = 8
MAX_NEW_TOKENS = 4
PAD_ID = 0
BOS_IDS = [1, 2, 3]        # stands in for tokenizer('<s>[INST]')
EOS_IDS = [2]              # stands in for tokenizer('</s>')
EOS_USER_IDS = [4]         # stands in for tokenizer('[/INST]')

# Batch rows folded into the matmul M dimension per grid step.  Keep it at 1
# here so the B=2 demo exercises the parallel batch grid (2 TCs on v7x); at
# real batch sizes raise it (e.g. 8 -> M = 8*S) to fill the MXU M dimension.
BATCH_BLOCK = 1


# ----------------------------------------------------------------------------
# Fused Pallas kernel: full decoder forward + loss partials for one batch block
# ----------------------------------------------------------------------------
def _fused_llm_kernel(x_ref, mask_ref, labels_ref, *refs):
    """refs layout:
       per layer: (attn_norm, wq, wk, wv, wo, mlp_norm, wg, wu, wd)
       then: final_norm, lm_head, and the two (1,1,1) outputs (num, den).
    """
    num_ref, den_ref = refs[-2], refs[-1]
    lm_head_ref = refs[-3]           # (D, V)  bf16
    final_norm_ref = refs[-4]        # (1, D)  f32
    layer_refs = refs[:-4]

    BB, S, D = x_ref.shape
    N = BB * S
    V = lm_head_ref.shape[1]
    scale = jnp.float32(1.0 / float(HEAD_DIM) ** 0.5)
    neg_inf = jnp.float32(-1e30)

    def rms(x, w):
        # f32 statistics; matmul operands are cast to bf16 exactly once later.
        var = jnp.mean(x * x, axis=-1, keepdims=True)
        return x * lax.rsqrt(var + 1e-6) * w

    def mm(x_f32, w_ref):
        return jnp.dot(x_f32.astype(jnp.bfloat16), w_ref[...],
                       preferred_element_type=jnp.float32)

    # ---- hoisted, loop-invariant masks (built once per grid step) ----
    lane = lax.broadcasted_iota(jnp.int32, (1, D), 1)
    head_masks = [
        jnp.logical_and(lane >= h * HEAD_DIM,
                        lane < (h + 1) * HEAD_DIM).astype(jnp.float32)
        for h in range(N_HEADS)
    ]
    row = lax.broadcasted_iota(jnp.int32, (S, S), 0)
    col = lax.broadcasted_iota(jnp.int32, (S, S), 1)
    causal = col <= row
    biases = []
    for b in range(BB):
        key_ok = mask_ref[b] > 0                       # (1, S) int32 -> bool
        biases.append(jnp.where(jnp.logical_and(causal, key_ok),
                                jnp.float32(0.0), neg_inf))

    # flatten the batch block into the matmul M dimension
    x = x_ref[...].reshape(N, D)                       # (BB*S, D) f32

    for l in range(N_LAYERS):
        (an, wq, wk, wv, wo, mn, wg, wu, wd) = layer_refs[9 * l: 9 * l + 9]

        # ------------- attention block -------------
        a_bf = rms(x, an[...]).astype(jnp.bfloat16)    # single cast, reused 3x
        q = jnp.dot(a_bf, wq[...], preferred_element_type=jnp.float32)
        k = jnp.dot(a_bf, wk[...], preferred_element_type=jnp.float32)
        v = jnp.dot(a_bf, wv[...], preferred_element_type=jnp.float32)

        row_outs = []
        for b in range(BB):                            # per-row key-mask only
            r0 = b * S
            qb = q[r0:r0 + S, :]                       # sublane-aligned slice
            kb = k[r0:r0 + S, :].astype(jnp.bfloat16)  # cast once per row
            vb = v[r0:r0 + S, :].astype(jnp.bfloat16)
            acc = jnp.zeros((S, D), jnp.float32)
            for h in range(N_HEADS):
                # Lane-dense head extraction: zero the other heads' lanes and
                # contract over the full D (zeros drop out of the sum), so no
                # 32-lane slices, no post-bf16-pack slicing, no head concat.
                qm = (qb * head_masks[h]).astype(jnp.bfloat16)
                s = lax.dot_general(qm, kb, (((1,), (1,)), ((), ())),
                                    preferred_element_type=jnp.float32) * scale
                s = s + biases[b]
                m = jnp.max(s, axis=-1, keepdims=True)
                p = jnp.exp(s - m)
                p = p / jnp.sum(p, axis=-1, keepdims=True)   # exact softmax
                o = jnp.dot(p.astype(jnp.bfloat16), vb,
                            preferred_element_type=jnp.float32)
                acc = acc + o * head_masks[h]          # scatter head columns
            row_outs.append(acc)
        attn = row_outs[0] if BB == 1 else jnp.concatenate(row_outs, axis=0)
        x = x + mm(attn, wo)

        # ------------- SwiGLU MLP block -------------
        a2_bf = rms(x, mn[...]).astype(jnp.bfloat16)
        g = jnp.dot(a2_bf, wg[...], preferred_element_type=jnp.float32)
        u = jnp.dot(a2_bf, wu[...], preferred_element_type=jnp.float32)
        x = x + mm(g * jax.nn.sigmoid(g) * u, wd)

    # ---- LM head fused with (host-shifted) masked cross-entropy ----
    logits = mm(rms(x, final_norm_ref[...]), lm_head_ref)   # (N, V) f32
    lab = labels_ref[...].reshape(N, 1)                     # pre-shifted int32
    m = jnp.max(logits, axis=-1, keepdims=True)
    lse = m + jnp.log(jnp.sum(jnp.exp(logits - m), axis=-1, keepdims=True))
    ids = lax.broadcasted_iota(jnp.int32, (N, V), 1)
    picked = jnp.sum(jnp.where(ids == lab, logits, jnp.float32(0.0)),
                     axis=-1, keepdims=True)
    valid = (lab != IGNORE_INDEX).astype(jnp.float32)
    num = jnp.sum((lse - picked) * valid, axis=0, keepdims=True)   # (1, 1)
    den = jnp.sum(valid, axis=0, keepdims=True)
    num_ref[...] = num.reshape(1, 1, 1)
    den_ref[...] = den.reshape(1, 1, 1)


def llm_loss(params, inputs_embeds, attention_mask, labels):
    """Full LLaMA-style causal-LM forward + HF-style shifted masked CE loss."""
    B, S, D = inputs_embeds.shape
    assert B % BATCH_BLOCK == 0
    G = B // BATCH_BLOCK

    # HF label shift done host-side: position s predicts token s+1, last
    # position ignored.  Keeps the in-kernel CE shapes (S, V) fully aligned.
    shifted = jnp.concatenate(
        [labels[:, 1:], jnp.full((B, 1), IGNORE_INDEX, labels.dtype)], axis=1)
    labels3 = shifted.astype(jnp.int32).reshape(B, S, 1)
    mask3 = attention_mask.astype(jnp.int32).reshape(B, 1, S)

    flat_weights = []
    for layer in params["layers"]:
        flat_weights += [layer["attn_norm"], layer["wq"], layer["wk"],
                         layer["wv"], layer["wo"], layer["mlp_norm"],
                         layer["wg"], layer["wu"], layer["wd"]]
    flat_weights += [params["final_norm"], params["lm_head"]]

    vmem = pltpu.MemorySpace.VMEM
    in_specs = [
        pl.BlockSpec((BATCH_BLOCK, S, D), lambda g: (g, 0, 0), memory_space=vmem),
        pl.BlockSpec((BATCH_BLOCK, 1, S), lambda g: (g, 0, 0), memory_space=vmem),
        pl.BlockSpec((BATCH_BLOCK, S, 1), lambda g: (g, 0, 0), memory_space=vmem),
    ] + [pl.BlockSpec(w.shape, lambda g: (0, 0), memory_space=vmem)
         for w in flat_weights]
    out_specs = (
        pl.BlockSpec((1, 1, 1), lambda g: (g, 0, 0), memory_space=vmem),
        pl.BlockSpec((1, 1, 1), lambda g: (g, 0, 0), memory_space=vmem),
    )

    num_p, den_p = pl.pallas_call(
        _fused_llm_kernel,
        grid=(G,),
        in_specs=in_specs,
        out_specs=out_specs,
        out_shape=(jax.ShapeDtypeStruct((G, 1, 1), jnp.float32),
                   jax.ShapeDtypeStruct((G, 1, 1), jnp.float32)),
        compiler_params=pltpu.CompilerParams(
            dimension_semantics=("parallel",)),   # v7x: batch blocks on 2 TCs
    )(inputs_embeds.astype(jnp.float32), mask3, labels3, *flat_weights)

    return jnp.sum(num_p) / jnp.maximum(jnp.sum(den_p), 1.0)


# ----------------------------------------------------------------------------
# Parameter init (deterministic).  Matmul weights in bf16 (MXU-native), split
# per projection so no sub-lane slicing is ever needed inside the kernel.
# ----------------------------------------------------------------------------
def init_params(key):
    def nrm(k, shape, scale=0.02, dtype=jnp.bfloat16):
        return (scale * jax.random.normal(k, shape, dtype=jnp.float32)).astype(dtype)

    n_per_layer = 7  # wq, wk, wv, wo, wg, wu, wd
    keys = jax.random.split(key, 2 + n_per_layer * N_LAYERS)
    params = {
        "embedding": nrm(keys[0], (VOCAB, D_MODEL), dtype=jnp.float32),
        "lm_head": nrm(keys[1], (D_MODEL, VOCAB)),
        "final_norm": jnp.ones((1, D_MODEL), jnp.float32),
        "layers": [],
    }
    idx = 2
    for _ in range(N_LAYERS):
        layer = {
            "attn_norm": jnp.ones((1, D_MODEL), jnp.float32),
            "mlp_norm": jnp.ones((1, D_MODEL), jnp.float32),
            "wq": nrm(keys[idx + 0], (D_MODEL, D_MODEL)),
            "wk": nrm(keys[idx + 1], (D_MODEL, D_MODEL)),
            "wv": nrm(keys[idx + 2], (D_MODEL, D_MODEL)),
            "wo": nrm(keys[idx + 3], (D_MODEL, D_MODEL)),
            "wg": nrm(keys[idx + 4], (D_MODEL, D_FFN)),
            "wu": nrm(keys[idx + 5], (D_MODEL, D_FFN)),
            "wd": nrm(keys[idx + 6], (D_FFN, D_MODEL)),
        }
        idx += n_per_layer
        params["layers"].append(layer)
    return params


# ----------------------------------------------------------------------------
# Synthetic "tokenizer" output + batch assembly (mirrors LLM.forward glue)
# ----------------------------------------------------------------------------
def build_batch(embedding):
    # Deterministic synthetic token ids standing in for the tokenizer output.
    paper_tokens = [[10, 11, 12, 13, 14], [40, 41, 42, 43]]
    instruction_tokens = [[20, 21, 22], [50, 51]]
    target_tokens = [[30, 31, 32], [60, 61, 62, 63, 64]]

    bos_embeds = embedding[jnp.asarray(BOS_IDS)]
    pad_embed = embedding[PAD_ID][None, :]

    batch_embeds, batch_mask, batch_labels = [], [], []
    for i in range(len(paper_tokens)):
        target_ids = target_tokens[i][:MAX_NEW_TOKENS] + EOS_IDS
        input_ids = (paper_tokens[i][:MAX_TXT_LEN] + instruction_tokens[i]
                     + EOS_USER_IDS + target_ids)
        emb = embedding[jnp.asarray(input_ids)]
        emb = jnp.concatenate([bos_embeds, emb], axis=0)
        batch_embeds.append(emb)
        batch_mask.append([1] * emb.shape[0])
        labels = ([IGNORE_INDEX] * (emb.shape[0] - len(target_ids)) + target_ids)
        batch_labels.append(labels)

    max_length = max(e.shape[0] for e in batch_embeds)
    for i in range(len(batch_embeds)):
        pad_len = max_length - batch_embeds[i].shape[0]
        batch_embeds[i] = jnp.concatenate(
            [jnp.tile(pad_embed, (pad_len, 1)), batch_embeds[i]], axis=0)
        batch_mask[i] = [0] * pad_len + batch_mask[i]
        batch_labels[i] = [IGNORE_INDEX] * pad_len + batch_labels[i]

    inputs_embeds = jnp.stack(batch_embeds, axis=0)                 # (B, S, D)
    attention_mask = jnp.asarray(batch_mask, dtype=jnp.int32)       # (B, S)
    labels = jnp.asarray(batch_labels, dtype=jnp.int32)             # (B, S)
    return inputs_embeds, attention_mask, labels


# ----------------------------------------------------------------------------
if __name__ == "__main__":
    key = jax.random.PRNGKey(0)
    params = init_params(key)

    inputs_embeds, attention_mask, labels = build_batch(params["embedding"])

    loss = jax.jit(llm_loss)(params, inputs_embeds, attention_mask, labels)
    loss = jax.block_until_ready(loss)
    assert jnp.isfinite(loss), "loss is not finite"
    print("KERNEL_OK")
</pallas_src>

<mosaic_0001>
module attributes {stable_mosaic.version = 11 : i64} {
  func.func @_fused_llm_kernel(%arg0: i32, %arg1: memref<1x16x128xf32, #tpu.memory_space<vmem>>, %arg2: memref<1x1x16xi32, #tpu.memory_space<vmem>>, %arg3: memref<1x16x1xi32, #tpu.memory_space<vmem>>, %arg4: memref<1x128xf32, #tpu.memory_space<vmem>>, %arg5: memref<128x128xbf16, #tpu.memory_space<vmem>>, %arg6: memref<128x128xbf16, #tpu.memory_space<vmem>>, %arg7: memref<128x128xbf16, #tpu.memory_space<vmem>>, %arg8: memref<128x128xbf16, #tpu.memory_space<vmem>>, %arg9: memref<1x128xf32, #tpu.memory_space<vmem>>, %arg10: memref<128x256xbf16, #tpu.memory_space<vmem>>, %arg11: memref<128x256xbf16, #tpu.memory_space<vmem>>, %arg12: memref<256x128xbf16, #tpu.memory_space<vmem>>, %arg13: memref<1x128xf32, #tpu.memory_space<vmem>>, %arg14: memref<128x128xbf16, #tpu.memory_space<vmem>>, %arg15: memref<128x128xbf16, #tpu.memory_space<vmem>>, %arg16: memref<128x128xbf16, #tpu.memory_space<vmem>>, %arg17: memref<128x128xbf16, #tpu.memory_space<vmem>>, %arg18: memref<1x128xf32, #tpu.memory_space<vmem>>, %arg19: memref<128x256xbf16, #tpu.memory_space<vmem>>, %arg20: memref<128x256xbf16, #tpu.memory_space<vmem>>, %arg21: memref<256x128xbf16, #tpu.memory_space<vmem>>, %arg22: memref<1x128xf32, #tpu.memory_space<vmem>>, %arg23: memref<128x256xbf16, #tpu.memory_space<vmem>>, %arg24: memref<1x1x1xf32, #tpu.memory_space<vmem>>, %arg25: memref<1x1x1xf32, #tpu.memory_space<vmem>>) attributes {dimension_semantics = [#tpu.dimension_semantics<parallel>], iteration_bounds = array<i64: 2>, scalar_prefetch = 0 : i64, scratch_operands = 0 : i64, tpu.core_type = #tpu.core_type<tc>, window_params = [{transform_indices = @transform_0, window_bounds = array<i64: 1, 16, 128>}, {transform_indices = @transform_1, window_bounds = array<i64: 1, 1, 16>}, {transform_indices = @transform_2, window_bounds = array<i64: 1, 16, 1>}, {pipeline_mode = #tpu.pipeline_mode<synchronous>, transform_indices = @transform_3, window_bounds = array<i64: 1, 128>}, {pipeline_mode = #tpu.pipeline_mode<synchronous>, transform_indices = @transform_4, window_bounds = array<i64: 128, 128>}, {pipeline_mode = #tpu.pipeline_mode<synchronous>, transform_indices = @transform_5, window_bounds = array<i64: 128, 128>}, {pipeline_mode = #tpu.pipeline_mode<synchronous>, transform_indices = @transform_6, window_bounds = array<i64: 128, 128>}, {pipeline_mode = #tpu.pipeline_mode<synchronous>, transform_indices = @transform_7, window_bounds = array<i64: 128, 128>}, {pipeline_mode = #tpu.pipeline_mode<synchronous>, transform_indices = @transform_8, window_bounds = array<i64: 1, 128>}, {pipeline_mode = #tpu.pipeline_mode<synchronous>, transform_indices = @transform_9, window_bounds = array<i64: 128, 256>}, {pipeline_mode = #tpu.pipeline_mode<synchronous>, transform_indices = @transform_10, window_bounds = array<i64: 128, 256>}, {pipeline_mode = #tpu.pipeline_mode<synchronous>, transform_indices = @transform_11, window_bounds = array<i64: 256, 128>}, {pipeline_mode = #tpu.pipeline_mode<synchronous>, transform_indices = @transform_12, window_bounds = array<i64: 1, 128>}, {pipeline_mode = #tpu.pipeline_mode<synchronous>, transform_indices = @transform_13, window_bounds = array<i64: 128, 128>}, {pipeline_mode = #tpu.pipeline_mode<synchronous>, transform_indices = @transform_14, window_bounds = array<i64: 128, 128>}, {pipeline_mode = #tpu.pipeline_mode<synchronous>, transform_indices = @transform_15, window_bounds = array<i64: 128, 128>}, {pipeline_mode = #tpu.pipeline_mode<synchronous>, transform_indices = @transform_16, window_bounds = array<i64: 128, 128>}, {pipeline_mode = #tpu.pipeline_mode<synchronous>, transform_indices = @transform_17, window_bounds = array<i64: 1, 128>}, {pipeline_mode = #tpu.pipeline_mode<synchronous>, transform_indices = @transform_18, window_bounds = array<i64: 128, 256>}, {pipeline_mode = #tpu.pipeline_mode<synchronous>, transform_indices = @transform_19, window_bounds = array<i64: 128, 256>}, {pipeline_mode = #tpu.pipeline_mode<synchronous>, transform_indices = @transform_20, window_bounds = array<i64: 256, 128>}, {pipeline_mode = #tpu.pipeline_mode<synchronous>, transform_indices = @transform_21, window_bounds = array<i64: 1, 128>}, {pipeline_mode = #tpu.pipeline_mode<synchronous>, transform_indices = @transform_22, window_bounds = array<i64: 128, 256>}, {transform_indices = @transform_23, window_bounds = array<i64: 1, 1, 1>}, {transform_indices = @transform_24, window_bounds = array<i64: 1, 1, 1>}]} {
    %0 = tpu.iota {dimensions = array<i32: 1>} : vector<1x128xi32>
    %c0_i32 = arith.constant 0 : i32
    %1 = vector.broadcast %c0_i32 : i32 to vector<1x128xi32>
    %2 = arith.cmpi sge, %0, %1 : vector<1x128xi32>
    %c32_i32 = arith.constant 32 : i32
    %3 = vector.broadcast %c32_i32 : i32 to vector<1x128xi32>
    %4 = arith.cmpi slt, %0, %3 : vector<1x128xi32>
    %5 = arith.andi %2, %4 : vector<1x128xi1>
    %6 = arith.extui %5 : vector<1x128xi1> to vector<1x128xi32>
    %7 = arith.sitofp %6 : vector<1x128xi32> to vector<1x128xf32>
    %c32_i32_0 = arith.constant 32 : i32
    %8 = vector.broadcast %c32_i32_0 : i32 to vector<1x128xi32>
    %9 = arith.cmpi sge, %0, %8 : vector<1x128xi32>
    %c64_i32 = arith.constant 64 : i32
    %10 = vector.broadcast %c64_i32 : i32 to vector<1x128xi32>
    %11 = arith.cmpi slt, %0, %10 : vector<1x128xi32>
    %12 = arith.andi %9, %11 : vector<1x128xi1>
    %13 = arith.extui %12 : vector<1x128xi1> to vector<1x128xi32>
    %14 = arith.sitofp %13 : vector<1x128xi32> to vector<1x128xf32>
    %c64_i32_1 = arith.constant 64 : i32
    %15 = vector.broadcast %c64_i32_1 : i32 to vector<1x128xi32>
    %16 = arith.cmpi sge, %0, %15 : vector<1x128xi32>
    %c96_i32 = arith.constant 96 : i32
    %17 = vector.broadcast %c96_i32 : i32 to vector<1x128xi32>
    %18 = arith.cmpi slt, %0, %17 : vector<1x128xi32>
    %19 = arith.andi %16, %18 : vector<1x128xi1>
    %20 = arith.extui %19 : vector<1x128xi1> to vector<1x128xi32>
    %21 = arith.sitofp %20 : vector<1x128xi32> to vector<1x128xf32>
    %c96_i32_2 = arith.constant 96 : i32
    %22 = vector.broadcast %c96_i32_2 : i32 to vector<1x128xi32>
    %23 = arith.cmpi sge, %0, %22 : vector<1x128xi32>
    %c128_i32 = arith.constant 128 : i32
    %24 = vector.broadcast %c128_i32 : i32 to vector<1x128xi32>
    %25 = arith.cmpi slt, %0, %24 : vector<1x128xi32>
    %26 = arith.andi %23, %25 : vector<1x128xi1>
    %27 = arith.extui %26 : vector<1x128xi1> to vector<1x128xi32>
    %28 = arith.sitofp %27 : vector<1x128xi32> to vector<1x128xf32>
    %29 = tpu.iota {dimensions = array<i32: 0>} : vector<16x16xi32>
    %30 = tpu.iota {dimensions = array<i32: 1>} : vector<16x16xi32>
    %31 = arith.cmpi sle, %30, %29 : vector<16x16xi32>
    %c0 = arith.constant 0 : index
    %c0_3 = arith.constant 0 : index
    %c0_4 = arith.constant 0 : index
    %32 = vector.load %arg2[%c0, %c0_3, %c0_4] : memref<1x1x16xi32, #tpu.memory_space<vmem>>, vector<1x1x16xi32>
    %33 = vector.shape_cast %32 : vector<1x1x16xi32> to vector<1x16xi32>
    %c0_i32_5 = arith.constant 0 : i32
    %34 = vector.broadcast %c0_i32_5 : i32 to vector<1x16xi32>
    %35 = arith.cmpi sgt, %33, %34 : vector<1x16xi32>
    %36 = vector.broadcast %35 : vector<1x16xi1> to vector<16x16xi1>
    %37 = arith.andi %31, %36 : vector<16x16xi1>
    %cst = arith.constant 0.000000e+00 : f32
    %cst_6 = arith.constant -1.000000e+30 : f32
    %38 = vector.broadcast %cst : f32 to vector<16x16xf32>
    %39 = vector.broadcast %cst_6 : f32 to vector<16x16xf32>
    %40 = arith.select %37, %38, %39 : vector<16x16xi1>, vector<16x16xf32>
    %c0_7 = arith.constant 0 : index
    %c0_8 = arith.constant 0 : index
    %c0_9 = arith.constant 0 : index
    %41 = vector.load %arg1[%c0_7, %c0_8, %c0_9] : memref<1x16x128xf32, #tpu.memory_space<vmem>>, vector<1x16x128xf32>
    %42 = vector.shape_cast %41 : vector<1x16x128xf32> to vector<16x128xf32>
    %c0_10 = arith.constant 0 : index
    %c0_11 = arith.constant 0 : index
    %43 = vector.load %arg4[%c0_10, %c0_11] : memref<1x128xf32, #tpu.memory_space<vmem>>, vector<1x128xf32>
    %44 = arith.mulf %42, %42 : vector<16x128xf32>
    %cst_12 = arith.constant dense<0.000000e+00> : vector<16xf32>
    %45 = vector.multi_reduction <add>, %44, %cst_12 [1] : vector<16x128xf32> to vector<16xf32>
    %46 = vector.shape_cast %45 : vector<16xf32> to vector<16x1xf32>
    %cst_13 = arith.constant 1.280000e+02 : f32
    %47 = vector.broadcast %cst_13 : f32 to vector<16x1xf32>
    %48 = arith.divf %46, %47 : vector<16x1xf32>
    %cst_14 = arith.constant 9.99999997E-7 : f32
    %49 = vector.broadcast %cst_14 : f32 to vector<16x1xf32>
    %50 = arith.addf %48, %49 : vector<16x1xf32>
    %51 = math.rsqrt %50 : vector<16x1xf32>
    %52 = vector.broadcast %51 : vector<16x1xf32> to vector<16x128xf32>
    %53 = arith.mulf %42, %52 : vector<16x128xf32>
    %54 = vector.broadcast %43 : vector<1x128xf32> to vector<16x128xf32>
    %55 = arith.mulf %53, %54 : vector<16x128xf32>
    %56 = arith.truncf %55 : vector<16x128xf32> to vector<16x128xbf16>
    %c0_15 = arith.constant 0 : index
    %c0_16 = arith.constant 0 : index
    %57 = vector.load %arg5[%c0_15, %c0_16] : memref<128x128xbf16, #tpu.memory_space<vmem>>, vector<128x128xbf16>
    %cst_17 = arith.constant dense<0.000000e+00> : vector<16x128xf32>
    %58 = tpu.matmul %56, %57, %cst_17 {dimension_numbers = #tpu.dot_dimension_numbers<[1], [0], [0], [1], [0, 0, 1, 1], [], []>} : vector<16x128xbf16>, vector<128x128xbf16>, vector<16x128xf32> -> vector<16x128xf32>
    %c0_18 = arith.constant 0 : index
    %c0_19 = arith.constant 0 : index
    %59 = vector.load %arg6[%c0_18, %c0_19] : memref<128x128xbf16, #tpu.memory_space<vmem>>, vector<128x128xbf16>
    %cst_20 = arith.constant dense<0.000000e+00> : vector<16x128xf32>
    %60 = tpu.matmul %56, %59, %cst_20 {dimension_numbers = #tpu.dot_dimension_numbers<[1], [0], [0], [1], [0, 0, 1, 1], [], []>} : vector<16x128xbf16>, vector<128x128xbf16>, vector<16x128xf32> -> vector<16x128xf32>
    %c0_21 = arith.constant 0 : index
    %c0_22 = arith.constant 0 : index
    %61 = vector.load %arg7[%c0_21, %c0_22] : memref<128x128xbf16, #tpu.memory_space<vmem>>, vector<128x128xbf16>
    %cst_23 = arith.constant dense<0.000000e+00> : vector<16x128xf32>
    %62 = tpu.matmul %56, %61, %cst_23 {dimension_numbers = #tpu.dot_dimension_numbers<[1], [0], [0], [1], [0, 0, 1, 1], [], []>} : vector<16x128xbf16>, vector<128x128xbf16>, vector<16x128xf32> -> vector<16x128xf32>
    %63 = arith.truncf %60 : vector<16x128xf32> to vector<16x128xbf16>
    %64 = arith.truncf %62 : vector<16x128xf32> to vector<16x128xbf16>
    %cst_24 = arith.constant 0.000000e+00 : f32
    %65 = vector.broadcast %cst_24 : f32 to vector<16x128xf32>
    %66 = vector.broadcast %7 : vector<1x128xf32> to vector<16x128xf32>
    %67 = arith.mulf %58, %66 : vector<16x128xf32>
    %68 = arith.truncf %67 : vector<16x128xf32> to vector<16x128xbf16>
    %cst_25 = arith.constant dense<0.000000e+00> : vector<16x16xf32>
    %69 = tpu.matmul %68, %63, %cst_25 {dimension_numbers = #tpu.dot_dimension_numbers<[1], [1], [0], [0], [0, 0, 1, 0], [], []>} : vector<16x128xbf16>, vector<16x128xbf16>, vector<16x16xf32> -> vector<16x16xf32>
    %cst_26 = arith.constant 0.176776692 : f32
    %70 = vector.broadcast %cst_26 : f32 to vector<16x16xf32>
    %71 = arith.mulf %69, %70 : vector<16x16xf32>
    %72 = arith.addf %71, %40 : vector<16x16xf32>
    %cst_27 = arith.constant dense<0xFF800000> : vector<16xf32>
    %73 = vector.multi_reduction <maximumf>, %72, %cst_27 [1] : vector<16x16xf32> to vector<16xf32>
    %74 = vector.shape_cast %73 : vector<16xf32> to vector<16x1xf32>
    %75 = vector.broadcast %74 : vector<16x1xf32> to vector<16x16xf32>
    %76 = arith.subf %72, %75 : vector<16x16xf32>
    %77 = math.exp %76 : vector<16x16xf32>
    %cst_28 = arith.constant dense<0.000000e+00> : vector<16xf32>
    %78 = vector.multi_reduction <add>, %77, %cst_28 [1] : vector<16x16xf32> to vector<16xf32>
    %79 = vector.shape_cast %78 : vector<16xf32> to vector<16x1xf32>
    %80 = vector.broadcast %79 : vector<16x1xf32> to vector<16x16xf32>
    %81 = arith.divf %77, %80 : vector<16x16xf32>
    %82 = arith.truncf %81 : vector<16x16xf32> to vector<16x16xbf16>
    %cst_29 = arith.constant dense<0.000000e+00> : vector<16x128xf32>
    %83 = tpu.matmul %82, %64, %cst_29 {dimension_numbers = #tpu.dot_dimension_numbers<[1], [0], [0], [1], [0, 0, 1, 1], [], []>} : vector<16x16xbf16>, vector<16x128xbf16>, vector<16x128xf32> -> vector<16x128xf32>
    %84 = vector.broadcast %7 : vector<1x128xf32> to vector<16x128xf32>
    %85 = arith.mulf %83, %84 : vector<16x128xf32>
    %86 = arith.addf %65, %85 : vector<16x128xf32>
    %87 = vector.broadcast %14 : vector<1x128xf32> to vector<16x128xf32>
    %88 = arith.mulf %58, %87 : vector<16x128xf32>
    %89 = arith.truncf %88 : vector<16x128xf32> to vector<16x128xbf16>
    %cst_30 = arith.constant dense<0.000000e+00> : vector<16x16xf32>
    %90 = tpu.matmul %89, %63, %cst_30 {dimension_numbers = #tpu.dot_dimension_numbers<[1], [1], [0], [0], [0, 0, 1, 0], [], []>} : vector<16x128xbf16>, vector<16x128xbf16>, vector<16x16xf32> -> vector<16x16xf32>
    %cst_31 = arith.constant 0.176776692 : f32
    %91 = vector.broadcast %cst_31 : f32 to vector<16x16xf32>
    %92 = arith.mulf %90, %91 : vector<16x16xf32>
    %93 = arith.addf %92, %40 : vector<16x16xf32>
    %cst_32 = arith.constant dense<0xFF800000> : vector<16xf32>
    %94 = vector.multi_reduction <maximumf>, %93, %cst_32 [1] : vector<16x16xf32> to vector<16xf32>
    %95 = vector.shape_cast %94 : vector<16xf32> to vector<16x1xf32>
    %96 = vector.broadcast %95 : vector<16x1xf32> to vector<16x16xf32>
    %97 = arith.subf %93, %96 : vector<16x16xf32>
    %98 = math.exp %97 : vector<16x16xf32>
    %cst_33 = arith.constant dense<0.000000e+00> : vector<16xf32>
    %99 = vector.multi_reduction <add>, %98, %cst_33 [1] : vector<16x16xf32> to vector<16xf32>
    %100 = vector.shape_cast %99 : vector<16xf32> to vector<16x1xf32>
    %101 = vector.broadcast %100 : vector<16x1xf32> to vector<16x16xf32>
    %102 = arith.divf %98, %101 : vector<16x16xf32>
    %103 = arith.truncf %102 : vector<16x16xf32> to vector<16x16xbf16>
    %cst_34 = arith.constant dense<0.000000e+00> : vector<16x128xf32>
    %104 = tpu.matmul %103, %64, %cst_34 {dimension_numbers = #tpu.dot_dimension_numbers<[1], [0], [0], [1], [0, 0, 1, 1], [], []>} : vector<16x16xbf16>, vector<16x128xbf16>, vector<16x128xf32> -> vector<16x128xf32>
    %105 = vector.broadcast %14 : vector<1x128xf32> to vector<16x128xf32>
    %106 = arith.mulf %104, %105 : vector<16x128xf32>
    %107 = arith.addf %86, %106 : vector<16x128xf32>
    %108 = vector.broadcast %21 : vector<1x128xf32> to vector<16x128xf32>
    %109 = arith.mulf %58, %108 : vector<16x128xf32>
    %110 = arith.truncf %109 : vector<16x128xf32> to vector<16x128xbf16>
    %cst_35 = arith.constant dense<0.000000e+00> : vector<16x16xf32>
    %111 = tpu.matmul %110, %63, %cst_35 {dimension_numbers = #tpu.dot_dimension_numbers<[1], [1], [0], [0], [0, 0, 1, 0], [], []>} : vector<16x128xbf16>, vector<16x128xbf16>, vector<16x16xf32> -> vector<16x16xf32>
    %cst_36 = arith.constant 0.176776692 : f32
    %112 = vector.broadcast %cst_36 : f32 to vector<16x16xf32>
    %113 = arith.mulf %111, %112 : vector<16x16xf32>
    %114 = arith.addf %113, %40 : vector<16x16xf32>
    %cst_37 = arith.constant dense<0xFF800000> : vector<16xf32>
    %115 = vector.multi_reduction <maximumf>, %114, %cst_37 [1] : vector<16x16xf32> to vector<16xf32>
    %116 = vector.shape_cast %115 : vector<16xf32> to vector<16x1xf32>
    %117 = vector.broadcast %116 : vector<16x1xf32> to vector<16x16xf32>
    %118 = arith.subf %114, %117 : vector<16x16xf32>
    %119 = math.exp %118 : vector<16x16xf32>
    %cst_38 = arith.constant dense<0.000000e+00> : vector<16xf32>
    %120 = vector.multi_reduction <add>, %119, %cst_38 [1] : vector<16x16xf32> to vector<16xf32>
    %121 = vector.shape_cast %120 : vector<16xf32> to vector<16x1xf32>
    %122 = vector.broadcast %121 : vector<16x1xf32> to vector<16x16xf32>
    %123 = arith.divf %119, %122 : vector<16x16xf32>
    %124 = arith.truncf %123 : vector<16x16xf32> to vector<16x16xbf16>
    %cst_39 = arith.constant dense<0.000000e+00> : vector<16x128xf32>
    %125 = tpu.matmul %124, %64, %cst_39 {dimension_numbers = #tpu.dot_dimension_numbers<[1], [0], [0], [1], [0, 0, 1, 1], [], []>} : vector<16x16xbf16>, vector<16x128xbf16>, vector<16x128xf32> -> vector<16x128xf32>
    %126 = vector.broadcast %21 : vector<1x128xf32> to vector<16x128xf32>
    %127 = arith.mulf %125, %126 : vector<16x128xf32>
    %128 = arith.addf %107, %127 : vector<16x128xf32>
    %129 = vector.broadcast %28 : vector<1x128xf32> to vector<16x128xf32>
    %130 = arith.mulf %58, %129 : vector<16x128xf32>
    %131 = arith.truncf %130 : vector<16x128xf32> to vector<16x128xbf16>
    %cst_40 = arith.constant dense<0.000000e+00> : vector<16x16xf32>
    %132 = tpu.matmul %131, %63, %cst_40 {dimension_numbers = #tpu.dot_dimension_numbers<[1], [1], [0], [0], [0, 0, 1, 0], [], []>} : vector<16x128xbf16>, vector<16x128xbf16>, vector<16x16xf32> -> vector<16x16xf32>
    %cst_41 = arith.constant 0.176776692 : f32
    %133 = vector.broadcast %cst_41 : f32 to vector<16x16xf32>
    %134 = arith.mulf %132, %133 : vector<16x16xf32>
    %135 = arith.addf %134, %40 : vector<16x16xf32>
    %cst_42 = arith.constant dense<0xFF800000> : vector<16xf32>
    %136 = vector.multi_reduction <maximumf>, %135, %cst_42 [1] : vector<16x16xf32> to vector<16xf32>
    %137 = vector.shape_cast %136 : vector<16xf32> to vector<16x1xf32>
    %138 = vector.broadcast %137 : vector<16x1xf32> to vector<16x16xf32>
    %139 = arith.subf %135, %138 : vector<16x16xf32>
    %140 = math.exp %139 : vector<16x16xf32>
    %cst_43 = arith.constant dense<0.000000e+00> : vector<16xf32>
    %141 = vector.multi_reduction <add>, %140, %cst_43 [1] : vector<16x16xf32> to vector<16xf32>
    %142 = vector.shape_cast %141 : vector<16xf32> to vector<16x1xf32>
    %143 = vector.broadcast %142 : vector<16x1xf32> to vector<16x16xf32>
    %144 = arith.divf %140, %143 : vector<16x16xf32>
    %145 = arith.truncf %144 : vector<16x16xf32> to vector<16x16xbf16>
    %cst_44 = arith.constant dense<0.000000e+00> : vector<16x128xf32>
    %146 = tpu.matmul %145, %64, %cst_44 {dimension_numbers = #tpu.dot_dimension_numbers<[1], [0], [0], [1], [0, 0, 1, 1], [], []>} : vector<16x16xbf16>, vector<16x128xbf16>, vector<16x128xf32> -> vector<16x128xf32>
    %147 = vector.broadcast %28 : vector<1x128xf32> to vector<16x128xf32>
    %148 = arith.mulf %146, %147 : vector<16x128xf32>
    %149 = arith.addf %128, %148 : vector<16x128xf32>
    %150 = arith.truncf %149 : vector<16x128xf32> to vector<16x128xbf16>
    %c0_45 = arith.constant 0 : index
    %c0_46 = arith.constant 0 : index
    %151 = vector.load %arg8[%c0_45, %c0_46] : memref<128x128xbf16, #tpu.memory_space<vmem>>, vector<128x128xbf16>
    %cst_47 = arith.constant dense<0.000000e+00> : vector<16x128xf32>
    %152 = tpu.matmul %150, %151, %cst_47 {dimension_numbers = #tpu.dot_dimension_numbers<[1], [0], [0], [1], [0, 0, 1, 1], [], []>} : vector<16x128xbf16>, vector<128x128xbf16>, vector<16x128xf32> -> vector<16x128xf32>
    %153 = arith.addf %42, %152 : vector<16x128xf32>
    %c0_48 = arith.constant 0 : index
    %c0_49 = arith.constant 0 : index
    %154 = vector.load %arg9[%c0_48, %c0_49] : memref<1x128xf32, #tpu.memory_space<vmem>>, vector<1x128xf32>
    %155 = arith.mulf %153, %153 : vector<16x128xf32>
    %cst_50 = arith.constant dense<0.000000e+00> : vector<16xf32>
    %156 = vector.multi_reduction <add>, %155, %cst_50 [1] : vector<16x128xf32> to vector<16xf32>
    %157 = vector.shape_cast %156 : vector<16xf32> to vector<16x1xf32>
    %cst_51 = arith.constant 1.280000e+02 : f32
    %158 = vector.broadcast %cst_51 : f32 to vector<16x1xf32>
    %159 = arith.divf %157, %158 : vector<16x1xf32>
    %cst_52 = arith.constant 9.99999997E-7 : f32
    %160 = vector.broadcast %cst_52 : f32 to vector<16x1xf32>
    %161 = arith.addf %159, %160 : vector<16x1xf32>
    %162 = math.rsqrt %161 : vector<16x1xf32>
    %163 = vector.broadcast %162 : vector<16x1xf32> to vector<16x128xf32>
    %164 = arith.mulf %153, %163 : vector<16x128xf32>
    %165 = vector.broadcast %154 : vector<1x128xf32> to vector<16x128xf32>
    %166 = arith.mulf %164, %165 : vector<16x128xf32>
    %167 = arith.truncf %166 : vector<16x128xf32> to vector<16x128xbf16>
    %c0_53 = arith.constant 0 : index
    %c0_54 = arith.constant 0 : index
    %168 = vector.load %arg10[%c0_53, %c0_54] : memref<128x256xbf16, #tpu.memory_space<vmem>>, vector<128x256xbf16>
    %cst_55 = arith.constant dense<0.000000e+00> : vector<16x256xf32>
    %169 = tpu.matmul %167, %168, %cst_55 {dimension_numbers = #tpu.dot_dimension_numbers<[1], [0], [0], [1], [0, 0, 1, 1], [], []>} : vector<16x128xbf16>, vector<128x256xbf16>, vector<16x256xf32> -> vector<16x256xf32>
    %c0_56 = arith.constant 0 : index
    %c0_57 = arith.constant 0 : index
    %170 = vector.load %arg11[%c0_56, %c0_57] : memref<128x256xbf16, #tpu.memory_space<vmem>>, vector<128x256xbf16>
    %cst_58 = arith.constant dense<0.000000e+00> : vector<16x256xf32>
    %171 = tpu.matmul %167, %170, %cst_58 {dimension_numbers = #tpu.dot_dimension_numbers<[1], [0], [0], [1], [0, 0, 1, 1], [], []>} : vector<16x128xbf16>, vector<128x256xbf16>, vector<16x256xf32> -> vector<16x256xf32>
    %172 = arith.negf %169 : vector<16x256xf32>
    %173 = math.exp %172 : vector<16x256xf32>
    %cst_59 = arith.constant 1.000000e+00 : f32
    %174 = vector.broadcast %cst_59 : f32 to vector<16x256xf32>
    %175 = arith.addf %174, %173 : vector<16x256xf32>
    %176 = arith.divf %174, %175 : vector<16x256xf32>
    %177 = arith.mulf %169, %176 : vector<16x256xf32>
    %178 = arith.mulf %177, %171 : vector<16x256xf32>
    %179 = arith.truncf %178 : vector<16x256xf32> to vector<16x256xbf16>
    %c0_60 = arith.constant 0 : index
    %c0_61 = arith.constant 0 : index
    %180 = vector.load %arg12[%c0_60, %c0_61] : memref<256x128xbf16, #tpu.memory_space<vmem>>, vector<256x128xbf16>
    %cst_62 = arith.constant dense<0.000000e+00> : vector<16x128xf32>
    %181 = tpu.matmul %179, %180, %cst_62 {dimension_numbers = #tpu.dot_dimension_numbers<[1], [0], [0], [1], [0, 0, 1, 1], [], []>} : vector<16x256xbf16>, vector<256x128xbf16>, vector<16x128xf32> -> vector<16x128xf32>
    %182 = arith.addf %153, %181 : vector<16x128xf32>
    %c0_63 = arith.constant 0 : index
    %c0_64 = arith.constant 0 : index
    %183 = vector.load %arg13[%c0_63, %c0_64] : memref<1x128xf32, #tpu.memory_space<vmem>>, vector<1x128xf32>
    %184 = arith.mulf %182, %182 : vector<16x128xf32>
    %cst_65 = arith.constant dense<0.000000e+00> : vector<16xf32>
    %185 = vector.multi_reduction <add>, %184, %cst_65 [1] : vector<16x128xf32> to vector<16xf32>
    %186 = vector.shape_cast %185 : vector<16xf32> to vector<16x1xf32>
    %cst_66 = arith.constant 1.280000e+02 : f32
    %187 = vector.broadcast %cst_66 : f32 to vector<16x1xf32>
    %188 = arith.divf %186, %187 : vector<16x1xf32>
    %cst_67 = arith.constant 9.99999997E-7 : f32
    %189 = vector.broadcast %cst_67 : f32 to vector<16x1xf32>
    %190 = arith.addf %188, %189 : vector<16x1xf32>
    %191 = math.rsqrt %190 : vector<16x1xf32>
    %192 = vector.broadcast %191 : vector<16x1xf32> to vector<16x128xf32>
    %193 = arith.mulf %182, %192 : vector<16x128xf32>
    %194 = vector.broadcast %183 : vector<1x128xf32> to vector<16x128xf32>
    %195 = arith.mulf %193, %194 : vector<16x128xf32>
    %196 = arith.truncf %195 : vector<16x128xf32> to vector<16x128xbf16>
    %c0_68 = arith.constant 0 : index
    %c0_69 = arith.constant 0 : index
    %197 = vector.load %arg14[%c0_68, %c0_69] : memref<128x128xbf16, #tpu.memory_space<vmem>>, vector<128x128xbf16>
    %cst_70 = arith.constant dense<0.000000e+00> : vector<16x128xf32>
    %198 = tpu.matmul %196, %197, %cst_70 {dimension_numbers = #tpu.dot_dimension_numbers<[1], [0], [0], [1], [0, 0, 1, 1], [], []>} : vector<16x128xbf16>, vector<128x128xbf16>, vector<16x128xf32> -> vector<16x128xf32>
    %c0_71 = arith.constant 0 : index
    %c0_72 = arith.constant 0 : index
    %199 = vector.load %arg15[%c0_71, %c0_72] : memref<128x128xbf16, #tpu.memory_space<vmem>>, vector<128x128xbf16>
    %cst_73 = arith.constant dense<0.000000e+00> : vector<16x128xf32>
    %200 = tpu.matmul %196, %199, %cst_73 {dimension_numbers = #tpu.dot_dimension_numbers<[1], [0], [0], [1], [0, 0, 1, 1], [], []>} : vector<16x128xbf16>, vector<128x128xbf16>, vector<16x128xf32> -> vector<16x128xf32>
    %c0_74 = arith.constant 0 : index
    %c0_75 = arith.constant 0 : index
    %201 = vector.load %arg16[%c0_74, %c0_75] : memref<128x128xbf16, #tpu.memory_space<vmem>>, vector<128x128xbf16>
    %cst_76 = arith.constant dense<0.000000e+00> : vector<16x128xf32>
    %202 = tpu.matmul %196, %201, %cst_76 {dimension_numbers = #tpu.dot_dimension_numbers<[1], [0], [0], [1], [0, 0, 1, 1], [], []>} : vector<16x128xbf16>, vector<128x128xbf16>, vector<16x128xf32> -> vector<16x128xf32>
    %203 = arith.truncf %200 : vector<16x128xf32> to vector<16x128xbf16>
    %204 = arith.truncf %202 : vector<16x128xf32> to vector<16x128xbf16>
    %cst_77 = arith.constant 0.000000e+00 : f32
    %205 = vector.broadcast %cst_77 : f32 to vector<16x128xf32>
    %206 = vector.broadcast %7 : vector<1x128xf32> to vector<16x128xf32>
    %207 = arith.mulf %198, %206 : vector<16x128xf32>
    %208 = arith.truncf %207 : vector<16x128xf32> to vector<16x128xbf16>
    %cst_78 = arith.constant dense<0.000000e+00> : vector<16x16xf32>
    %209 = tpu.matmul %208, %203, %cst_78 {dimension_numbers = #tpu.dot_dimension_numbers<[1], [1], [0], [0], [0, 0, 1, 0], [], []>} : vector<16x128xbf16>, vector<16x128xbf16>, vector<16x16xf32> -> vector<16x16xf32>
    %cst_79 = arith.constant 0.176776692 : f32
    %210 = vector.broadcast %cst_79 : f32 to vector<16x16xf32>
    %211 = arith.mulf %209, %210 : vector<16x16xf32>
    %212 = arith.addf %211, %40 : vector<16x16xf32>
    %cst_80 = arith.constant dense<0xFF800000> : vector<16xf32>
    %213 = vector.multi_reduction <maximumf>, %212, %cst_80 [1] : vector<16x16xf32> to vector<16xf32>
    %214 = vector.shape_cast %213 : vector<16xf32> to vector<16x1xf32>
    %215 = vector.broadcast %214 : vector<16x1xf32> to vector<16x16xf32>
    %216 = arith.subf %212, %215 : vector<16x16xf32>
    %217 = math.exp %216 : vector<16x16xf32>
    %cst_81 = arith.constant dense<0.000000e+00> : vector<16xf32>
    %218 = vector.multi_reduction <add>, %217, %cst_81 [1] : vector<16x16xf32> to vector<16xf32>
    %219 = vector.shape_cast %218 : vector<16xf32> to vector<16x1xf32>
    %220 = vector.broadcast %219 : vector<16x1xf32> to vector<16x16xf32>
    %221 = arith.divf %217, %220 : vector<16x16xf32>
    %222 = arith.truncf %221 : vector<16x16xf32> to vector<16x16xbf16>
    %cst_82 = arith.constant dense<0.000000e+00> : vector<16x128xf32>
    %223 = tpu.matmul %222, %204, %cst_82 {dimension_numbers = #tpu.dot_dimension_numbers<[1], [0], [0], [1], [0, 0, 1, 1], [], []>} : vector<16x16xbf16>, vector<16x128xbf16>, vector<16x128xf32> -> vector<16x128xf32>
    %224 = vector.broadcast %7 : vector<1x128xf32> to vector<16x128xf32>
    %225 = arith.mulf %223, %224 : vector<16x128xf32>
    %226 = arith.addf %205, %225 : vector<16x128xf32>
    %227 = vector.broadcast %14 : vector<1x128xf32> to vector<16x128xf32>
    %228 = arith.mulf %198, %227 : vector<16x128xf32>
    %229 = arith.truncf %228 : vector<16x128xf32> to vector<16x128xbf16>
    %cst_83 = arith.constant dense<0.000000e+00> : vector<16x16xf32>
    %230 = tpu.matmul %229, %203, %cst_83 {dimension_numbers = #tpu.dot_dimension_numbers<[1], [1], [0], [0], [0, 0, 1, 0], [], []>} : vector<16x128xbf16>, vector<16x128xbf16>, vector<16x16xf32> -> vector<16x16xf32>
    %cst_84 = arith.constant 0.176776692 : f32
    %231 = vector.broadcast %cst_84 : f32 to vector<16x16xf32>
    %232 = arith.mulf %230, %231 : vector<16x16xf32>
    %233 = arith.addf %232, %40 : vector<16x16xf32>
    %cst_85 = arith.constant dense<0xFF800000> : vector<16xf32>
    %234 = vector.multi_reduction <maximumf>, %233, %cst_85 [1] : vector<16x16xf32> to vector<16xf32>
    %235 = vector.shape_cast %234 : vector<16xf32> to vector<16x1xf32>
    %236 = vector.broadcast %235 : vector<16x1xf32> to vector<16x16xf32>
    %237 = arith.subf %233, %236 : vector<16x16xf32>
    %238 = math.exp %237 : vector<16x16xf32>
    %cst_86 = arith.constant dense<0.000000e+00> : vector<16xf32>
    %239 = vector.multi_reduction <add>, %238, %cst_86 [1] : vector<16x16xf32> to vector<16xf32>
    %240 = vector.shape_cast %239 : vector<16xf32> to vector<16x1xf32>
    %241 = vector.broadcast %240 : vector<16x1xf32> to vector<16x16xf32>
    %242 = arith.divf %238, %241 : vector<16x16xf32>
    %243 = arith.truncf %242 : vector<16x16xf32> to vector<16x16xbf16>
    %cst_87 = arith.constant dense<0.000000e+00> : vector<16x128xf32>
    %244 = tpu.matmul %243, %204, %cst_87 {dimension_numbers = #tpu.dot_dimension_numbers<[1], [0], [0], [1], [0, 0, 1, 1], [], []>} : vector<16x16xbf16>, vector<16x128xbf16>, vector<16x128xf32> -> vector<16x128xf32>
    %245 = vector.broadcast %14 : vector<1x128xf32> to vector<16x128xf32>
    %246 = arith.mulf %244, %245 : vector<16x128xf32>
    %247 = arith.addf %226, %246 : vector<16x128xf32>
    %248 = vector.broadcast %21 : vector<1x128xf32> to vector<16x128xf32>
    %249 = arith.mulf %198, %248 : vector<16x128xf32>
    %250 = arith.truncf %249 : vector<16x128xf32> to vector<16x128xbf16>
    %cst_88 = arith.constant dense<0.000000e+00> : vector<16x16xf32>
    %251 = tpu.matmul %250, %203, %cst_88 {dimension_numbers = #tpu.dot_dimension_numbers<[1], [1], [0], [0], [0, 0, 1, 0], [], []>} : vector<16x128xbf16>, vector<16x128xbf16>, vector<16x16xf32> -> vector<16x16xf32>
    %cst_89 = arith.constant 0.176776692 : f32
    %252 = vector.broadcast %cst_89 : f32 to vector<16x16xf32>
    %253 = arith.mulf %251, %252 : vector<16x16xf32>
    %254 = arith.addf %253, %40 : vector<16x16xf32>
    %cst_90 = arith.constant dense<0xFF800000> : vector<16xf32>
    %255 = vector.multi_reduction <maximumf>, %254, %cst_90 [1] : vector<16x16xf32> to vector<16xf32>
    %256 = vector.shape_cast %255 : vector<16xf32> to vector<16x1xf32>
    %257 = vector.broadcast %256 : vector<16x1xf32> to vector<16x16xf32>
    %258 = arith.subf %254, %257 : vector<16x16xf32>
    %259 = math.exp %258 : vector<16x16xf32>
    %cst_91 = arith.constant dense<0.000000e+00> : vector<16xf32>
    %260 = vector.multi_reduction <add>, %259, %cst_91 [1] : vector<16x16xf32> to vector<16xf32>
    %261 = vector.shape_cast %260 : vector<16xf32> to vector<16x1xf32>
    %262 = vector.broadcast %261 : vector<16x1xf32> to vector<16x16xf32>
    %263 = arith.divf %259, %262 : vector<16x16xf32>
    %264 = arith.truncf %263 : vector<16x16xf32> to vector<16x16xbf16>
    %cst_92 = arith.constant dense<0.000000e+00> : vector<16x128xf32>
    %265 = tpu.matmul %264, %204, %cst_92 {dimension_numbers = #tpu.dot_dimension_numbers<[1], [0], [0], [1], [0, 0, 1, 1], [], []>} : vector<16x16xbf16>, vector<16x128xbf16>, vector<16x128xf32> -> vector<16x128xf32>
    %266 = vector.broadcast %21 : vector<1x128xf32> to vector<16x128xf32>
    %267 = arith.mulf %265, %266 : vector<16x128xf32>
    %268 = arith.addf %247, %267 : vector<16x128xf32>
    %269 = vector.broadcast %28 : vector<1x128xf32> to vector<16x128xf32>
    %270 = arith.mulf %198, %269 : vector<16x128xf32>
    %271 = arith.truncf %270 : vector<16x128xf32> to vector<16x128xbf16>
    %cst_93 = arith.constant dense<0.000000e+00> : vector<16x16xf32>
    %272 = tpu.matmul %271, %203, %cst_93 {dimension_numbers = #tpu.dot_dimension_numbers<[1], [1], [0], [0], [0, 0, 1, 0], [], []>} : vector<16x128xbf16>, vector<16x128xbf16>, vector<16x16xf32> -> vector<16x16xf32>
    %cst_94 = arith.constant 0.176776692 : f32
    %273 = vector.broadcast %cst_94 : f32 to vector<16x16xf32>
    %274 = arith.mulf %272, %273 : vector<16x16xf32>
    %275 = arith.addf %274, %40 : vector<16x16xf32>
    %cst_95 = arith.constant dense<0xFF800000> : vector<16xf32>
    %276 = vector.multi_reduction <maximumf>, %275, %cst_95 [1] : vector<16x16xf32> to vector<16xf32>
    %277 = vector.shape_cast %276 : vector<16xf32> to vector<16x1xf32>
    %278 = vector.broadcast %277 : vector<16x1xf32> to vector<16x16xf32>
    %279 = arith.subf %275, %278 : vector<16x16xf32>
    %280 = math.exp %279 : vector<16x16xf32>
    %cst_96 = arith.constant dense<0.000000e+00> : vector<16xf32>
    %281 = vector.multi_reduction <add>, %280, %cst_96 [1] : vector<16x16xf32> to vector<16xf32>
    %282 = vector.shape_cast %281 : vector<16xf32> to vector<16x1xf32>
    %283 = vector.broadcast %282 : vector<16x1xf32> to vector<16x16xf32>
    %284 = arith.divf %280, %283 : vector<16x16xf32>
    %285 = arith.truncf %284 : vector<16x16xf32> to vector<16x16xbf16>
    %cst_97 = arith.constant dense<0.000000e+00> : vector<16x128xf32>
    %286 = tpu.matmul %285, %204, %cst_97 {dimension_numbers = #tpu.dot_dimension_numbers<[1], [0], [0], [1], [0, 0, 1, 1], [], []>} : vector<16x16xbf16>, vector<16x128xbf16>, vector<16x128xf32> -> vector<16x128xf32>
    %287 = vector.broadcast %28 : vector<1x128xf32> to vector<16x128xf32>
    %288 = arith.mulf %286, %287 : vector<16x128xf32>
    %289 = arith.addf %268, %288 : vector<16x128xf32>
    %290 = arith.truncf %289 : vector<16x128xf32> to vector<16x128xbf16>
    %c0_98 = arith.constant 0 : index
    %c0_99 = arith.constant 0 : index
    %291 = vector.load %arg17[%c0_98, %c0_99] : memref<128x128xbf16, #tpu.memory_space<vmem>>, vector<128x128xbf16>
    %cst_100 = arith.constant dense<0.000000e+00> : vector<16x128xf32>
    %292 = tpu.matmul %290, %291, %cst_100 {dimension_numbers = #tpu.dot_dimension_numbers<[1], [0], [0], [1], [0, 0, 1, 1], [], []>} : vector<16x128xbf16>, vector<128x128xbf16>, vector<16x128xf32> -> vector<16x128xf32>
    %293 = arith.addf %182, %292 : vector<16x128xf32>
    %c0_101 = arith.constant 0 : index
    %c0_102 = arith.constant 0 : index
    %294 = vector.load %arg18[%c0_101, %c0_102] : memref<1x128xf32, #tpu.memory_space<vmem>>, vector<1x128xf32>
    %295 = arith.mulf %293, %293 : vector<16x128xf32>
    %cst_103 = arith.constant dense<0.000000e+00> : vector<16xf32>
    %296 = vector.multi_reduction <add>, %295, %cst_103 [1] : vector<16x128xf32> to vector<16xf32>
    %297 = vector.shape_cast %296 : vector<16xf32> to vector<16x1xf32>
    %cst_104 = arith.constant 1.280000e+02 : f32
    %298 = vector.broadcast %cst_104 : f32 to vector<16x1xf32>
    %299 = arith.divf %297, %298 : vector<16x1xf32>
    %cst_105 = arith.constant 9.99999997E-7 : f32
    %300 = vector.broadcast %cst_105 : f32 to vector<16x1xf32>
    %301 = arith.addf %299, %300 : vector<16x1xf32>
    %302 = math.rsqrt %301 : vector<16x1xf32>
    %303 = vector.broadcast %302 : vector<16x1xf32> to vector<16x128xf32>
    %304 = arith.mulf %293, %303 : vector<16x128xf32>
    %305 = vector.broadcast %294 : vector<1x128xf32> to vector<16x128xf32>
    %306 = arith.mulf %304, %305 : vector<16x128xf32>
    %307 = arith.truncf %306 : vector<16x128xf32> to vector<16x128xbf16>
    %c0_106 = arith.constant 0 : index
    %c0_107 = arith.constant 0 : index
    %308 = vector.load %arg19[%c0_106, %c0_107] : memref<128x256xbf16, #tpu.memory_space<vmem>>, vector<128x256xbf16>
    %cst_108 = arith.constant dense<0.000000e+00> : vector<16x256xf32>
    %309 = tpu.matmul %307, %308, %cst_108 {dimension_numbers = #tpu.dot_dimension_numbers<[1], [0], [0], [1], [0, 0, 1, 1], [], []>} : vector<16x128xbf16>, vector<128x256xbf16>, vector<16x256xf32> -> vector<16x256xf32>
    %c0_109 = arith.constant 0 : index
    %c0_110 = arith.constant 0 : index
    %310 = vector.load %arg20[%c0_109, %c0_110] : memref<128x256xbf16, #tpu.memory_space<vmem>>, vector<128x256xbf16>
    %cst_111 = arith.constant dense<0.000000e+00> : vector<16x256xf32>
    %311 = tpu.matmul %307, %310, %cst_111 {dimension_numbers = #tpu.dot_dimension_numbers<[1], [0], [0], [1], [0, 0, 1, 1], [], []>} : vector<16x128xbf16>, vector<128x256xbf16>, vector<16x256xf32> -> vector<16x256xf32>
    %312 = arith.negf %309 : vector<16x256xf32>
    %313 = math.exp %312 : vector<16x256xf32>
    %cst_112 = arith.constant 1.000000e+00 : f32
    %314 = vector.broadcast %cst_112 : f32 to vector<16x256xf32>
    %315 = arith.addf %314, %313 : vector<16x256xf32>
    %316 = arith.divf %314, %315 : vector<16x256xf32>
    %317 = arith.mulf %309, %316 : vector<16x256xf32>
    %318 = arith.mulf %317, %311 : vector<16x256xf32>
    %319 = arith.truncf %318 : vector<16x256xf32> to vector<16x256xbf16>
    %c0_113 = arith.constant 0 : index
    %c0_114 = arith.constant 0 : index
    %320 = vector.load %arg21[%c0_113, %c0_114] : memref<256x128xbf16, #tpu.memory_space<vmem>>, vector<256x128xbf16>
    %cst_115 = arith.constant dense<0.000000e+00> : vector<16x128xf32>
    %321 = tpu.matmul %319, %320, %cst_115 {dimension_numbers = #tpu.dot_dimension_numbers<[1], [0], [0], [1], [0, 0, 1, 1], [], []>} : vector<16x256xbf16>, vector<256x128xbf16>, vector<16x128xf32> -> vector<16x128xf32>
    %322 = arith.addf %293, %321 : vector<16x128xf32>
    %c0_116 = arith.constant 0 : index
    %c0_117 = arith.constant 0 : index
    %323 = vector.load %arg22[%c0_116, %c0_117] : memref<1x128xf32, #tpu.memory_space<vmem>>, vector<1x128xf32>
    %324 = arith.mulf %322, %322 : vector<16x128xf32>
    %cst_118 = arith.constant dense<0.000000e+00> : vector<16xf32>
    %325 = vector.multi_reduction <add>, %324, %cst_118 [1] : vector<16x128xf32> to vector<16xf32>
    %326 = vector.shape_cast %325 : vector<16xf32> to vector<16x1xf32>
    %cst_119 = arith.constant 1.280000e+02 : f32
    %327 = vector.broadcast %cst_119 : f32 to vector<16x1xf32>
    %328 = arith.divf %326, %327 : vector<16x1xf32>
    %cst_120 = arith.constant 9.99999997E-7 : f32
    %329 = vector.broadcast %cst_120 : f32 to vector<16x1xf32>
    %330 = arith.addf %328, %329 : vector<16x1xf32>
    %331 = math.rsqrt %330 : vector<16x1xf32>
    %332 = vector.broadcast %331 : vector<16x1xf32> to vector<16x128xf32>
    %333 = arith.mulf %322, %332 : vector<16x128xf32>
    %334 = vector.broadcast %323 : vector<1x128xf32> to vector<16x128xf32>
    %335 = arith.mulf %333, %334 : vector<16x128xf32>
    %336 = arith.truncf %335 : vector<16x128xf32> to vector<16x128xbf16>
    %c0_121 = arith.constant 0 : index
    %c0_122 = arith.constant 0 : index
    %337 = vector.load %arg23[%c0_121, %c0_122] : memref<128x256xbf16, #tpu.memory_space<vmem>>, vector<128x256xbf16>
    %cst_123 = arith.constant dense<0.000000e+00> : vector<16x256xf32>
    %338 = tpu.matmul %336, %337, %cst_123 {dimension_numbers = #tpu.dot_dimension_numbers<[1], [0], [0], [1], [0, 0, 1, 1], [], []>} : vector<16x128xbf16>, vector<128x256xbf16>, vector<16x256xf32> -> vector<16x256xf32>
    %c0_124 = arith.constant 0 : index
    %c0_125 = arith.constant 0 : index
    %c0_126 = arith.constant 0 : index
    %339 = vector.load %arg3[%c0_124, %c0_125, %c0_126] : memref<1x16x1xi32, #tpu.memory_space<vmem>>, vector<1x16x1xi32>
    %340 = vector.shape_cast %339 : vector<1x16x1xi32> to vector<16x1xi32>
    %cst_127 = arith.constant dense<0xFF800000> : vector<16xf32>
    %341 = vector.multi_reduction <maximumf>, %338, %cst_127 [1] : vector<16x256xf32> to vector<16xf32>
    %342 = vector.shape_cast %341 : vector<16xf32> to vector<16x1xf32>
    %343 = vector.broadcast %342 : vector<16x1xf32> to vector<16x256xf32>
    %344 = arith.subf %338, %343 : vector<16x256xf32>
    %345 = math.exp %344 : vector<16x256xf32>
    %cst_128 = arith.constant dense<0.000000e+00> : vector<16xf32>
    %346 = vector.multi_reduction <add>, %345, %cst_128 [1] : vector<16x256xf32> to vector<16xf32>
    %347 = vector.shape_cast %346 : vector<16xf32> to vector<16x1xf32>
    %348 = math.log %347 : vector<16x1xf32>
    %349 = arith.addf %342, %348 : vector<16x1xf32>
    %350 = tpu.iota {dimensions = array<i32: 1>} : vector<16x256xi32>
    %351 = vector.broadcast %340 : vector<16x1xi32> to vector<16x256xi32>
    %352 = arith.cmpi eq, %350, %351 : vector<16x256xi32>
    %cst_129 = arith.constant 0.000000e+00 : f32
    %353 = vector.broadcast %cst_129 : f32 to vector<16x256xf32>
    %354 = arith.select %352, %338, %353 : vector<16x256xi1>, vector<16x256xf32>
    %cst_130 = arith.constant dense<0.000000e+00> : vector<16xf32>
    %355 = vector.multi_reduction <add>, %354, %cst_130 [1] : vector<16x256xf32> to vector<16xf32>
    %356 = vector.shape_cast %355 : vector<16xf32> to vector<16x1xf32>
    %c-100_i32 = arith.constant -100 : i32
    %357 = vector.broadcast %c-100_i32 : i32 to vector<16x1xi32>
    %358 = arith.cmpi ne, %340, %357 : vector<16x1xi32>
    %359 = arith.extui %358 : vector<16x1xi1> to vector<16x1xi32>
    %360 = arith.sitofp %359 : vector<16x1xi32> to vector<16x1xf32>
    %361 = arith.subf %349, %356 : vector<16x1xf32>
    %362 = arith.mulf %361, %360 : vector<16x1xf32>
    %cst_131 = arith.constant dense<0.000000e+00> : vector<1xf32>
    %363 = vector.multi_reduction <add>, %362, %cst_131 [0] : vector<16x1xf32> to vector<1xf32>
    %364 = vector.shape_cast %363 : vector<1xf32> to vector<1x1xf32>
    %cst_132 = arith.constant dense<0.000000e+00> : vector<1xf32>
    %365 = vector.multi_reduction <add>, %360, %cst_132 [0] : vector<16x1xf32> to vector<1xf32>
    %366 = vector.shape_cast %365 : vector<1xf32> to vector<1x1xf32>
    %367 = vector.shape_cast %364 : vector<1x1xf32> to vector<1x1x1xf32>
    %c0_133 = arith.constant 0 : index
    %c0_134 = arith.constant 0 : index
    %c0_135 = arith.constant 0 : index
    %368 = vector.load %arg24[%c0_133, %c0_134, %c0_135] : memref<1x1x1xf32, #tpu.memory_space<vmem>>, vector<1x1x1xf32>
    tpu.vector_store %arg24[%c0_133, %c0_134, %c0_135], %367 {strides = array<i32>} : memref<1x1x1xf32, #tpu.memory_space<vmem>>, vector<1x1x1xf32>,
    %369 = vector.shape_cast %366 : vector<1x1xf32> to vector<1x1x1xf32>
    %c0_136 = arith.constant 0 : index
    %c0_137 = arith.constant 0 : index
    %c0_138 = arith.constant 0 : index
    %370 = vector.load %arg25[%c0_136, %c0_137, %c0_138] : memref<1x1x1xf32, #tpu.memory_space<vmem>>, vector<1x1x1xf32>
    tpu.vector_store %arg25[%c0_136, %c0_137, %c0_138], %369 {strides = array<i32>} : memref<1x1x1xf32, #tpu.memory_space<vmem>>, vector<1x1x1xf32>,
    return
  }
  func.func @transform_0(%arg0: i32) -> (i32, i32, i32) {
    %c0_i32 = arith.constant 0 : i32
    %c0_i32_0 = arith.constant 0 : i32
    %c0_i32_1 = arith.constant 0 : i32
    return %arg0, %c0_i32, %c0_i32_0 : i32, i32, i32
  }
  func.func @transform_1(%arg0: i32) -> (i32, i32, i32) {
    %c0_i32 = arith.constant 0 : i32
    %c0_i32_0 = arith.constant 0 : i32
    %c0_i32_1 = arith.constant 0 : i32
    return %arg0, %c0_i32, %c0_i32_0 : i32, i32, i32
  }
  func.func @transform_2(%arg0: i32) -> (i32, i32, i32) {
    %c0_i32 = arith.constant 0 : i32
    %c0_i32_0 = arith.constant 0 : i32
    %c0_i32_1 = arith.constant 0 : i32
    return %arg0, %c0_i32, %c0_i32_0 : i32, i32, i32
  }
  func.func @transform_3(%arg0: i32) -> (i32, i32) {
    %c0_i32 = arith.constant 0 : i32
    %c0_i32_0 = arith.constant 0 : i32
    %c0_i32_1 = arith.constant 0 : i32
    return %c0_i32, %c0_i32_0 : i32, i32
  }
  func.func @transform_4(%arg0: i32) -> (i32, i32) {
    %c0_i32 = arith.constant 0 : i32
    %c0_i32_0 = arith.constant 0 : i32
    %c0_i32_1 = arith.constant 0 : i32
    return %c0_i32, %c0_i32_0 : i32, i32
  }
  func.func @transform_5(%arg0: i32) -> (i32, i32) {
    %c0_i32 = arith.constant 0 : i32
    %c0_i32_0 = arith.constant 0 : i32
    %c0_i32_1 = arith.constant 0 : i32
    return %c0_i32, %c0_i32_0 : i32, i32
  }
  func.func @transform_6(%arg0: i32) -> (i32, i32) {
    %c0_i32 = arith.constant 0 : i32
    %c0_i32_0 = arith.constant 0 : i32
    %c0_i32_1 = arith.constant 0 : i32
    return %c0_i32, %c0_i32_0 : i32, i32
  }
  func.func @transform_7(%arg0: i32) -> (i32, i32) {
    %c0_i32 = arith.constant 0 : i32
    %c0_i32_0 = arith.constant 0 : i32
    %c0_i32_1 = arith.constant 0 : i32
    return %c0_i32, %c0_i32_0 : i32, i32
  }
  func.func @transform_8(%arg0: i32) -> (i32, i32) {
    %c0_i32 = arith.constant 0 : i32
    %c0_i32_0 = arith.constant 0 : i32
    %c0_i32_1 = arith.constant 0 : i32
    return %c0_i32, %c0_i32_0 : i32, i32
  }
  func.func @transform_9(%arg0: i32) -> (i32, i32) {
    %c0_i32 = arith.constant 0 : i32
    %c0_i32_0 = arith.constant 0 : i32
    %c0_i32_1 = arith.constant 0 : i32
    return %c0_i32, %c0_i32_0 : i32, i32
  }
  func.func @transform_10(%arg0: i32) -> (i32, i32) {
    %c0_i32 = arith.constant 0 : i32
    %c0_i32_0 = arith.constant 0 : i32
    %c0_i32_1 = arith.constant 0 : i32
    return %c0_i32, %c0_i32_0 : i32, i32
  }
  func.func @transform_11(%arg0: i32) -> (i32, i32) {
    %c0_i32 = arith.constant 0 : i32
    %c0_i32_0 = arith.constant 0 : i32
    %c0_i32_1 = arith.constant 0 : i32
    return %c0_i32, %c0_i32_0 : i32, i32
  }
  func.func @transform_12(%arg0: i32) -> (i32, i32) {
    %c0_i32 = arith.constant 0 : i32
    %c0_i32_0 = arith.constant 0 : i32
    %c0_i32_1 = arith.constant 0 : i32
    return %c0_i32, %c0_i32_0 : i32, i32
  }
  func.func @transform_13(%arg0: i32) -> (i32, i32) {
    %c0_i32 = arith.constant 0 : i32
    %c0_i32_0 = arith.constant 0 : i32
    %c0_i32_1 = arith.constant 0 : i32
    return %c0_i32, %c0_i32_0 : i32, i32
  }
  func.func @transform_14(%arg0: i32) -> (i32, i32) {
    %c0_i32 = arith.constant 0 : i32
    %c0_i32_0 = arith.constant 0 : i32
    %c0_i32_1 = arith.constant 0 : i32
    return %c0_i32, %c0_i32_0 : i32, i32
  }
  func.func @transform_15(%arg0: i32) -> (i32, i32) {
    %c0_i32 = arith.constant 0 : i32
    %c0_i32_0 = arith.constant 0 : i32
    %c0_i32_1 = arith.constant 0 : i32
    return %c0_i32, %c0_i32_0 : i32, i32
  }
  func.func @transform_16(%arg0: i32) -> (i32, i32) {
    %c0_i32 = arith.constant 0 : i32
    %c0_i32_0 = arith.constant 0 : i32
    %c0_i32_1 = arith.constant 0 : i32
    return %c0_i32, %c0_i32_0 : i32, i32
  }
  func.func @transform_17(%arg0: i32) -> (i32, i32) {
    %c0_i32 = arith.constant 0 : i32
    %c0_i32_0 = arith.constant 0 : i32
    %c0_i32_1 = arith.constant 0 : i32
    return %c0_i32, %c0_i32_0 : i32, i32
  }
  func.func @transform_18(%arg0: i32) -> (i32, i32) {
    %c0_i32 = arith.constant 0 : i32
    %c0_i32_0 = arith.constant 0 : i32
    %c0_i32_1 = arith.constant 0 : i32
    return %c0_i32, %c0_i32_0 : i32, i32
  }
  func.func @transform_19(%arg0: i32) -> (i32, i32) {
    %c0_i32 = arith.constant 0 : i32
    %c0_i32_0 = arith.constant 0 : i32
    %c0_i32_1 = arith.constant 0 : i32
    return %c0_i32, %c0_i32_0 : i32, i32
  }
  func.func @transform_20(%arg0: i32) -> (i32, i32) {
    %c0_i32 = arith.constant 0 : i32
    %c0_i32_0 = arith.constant 0 : i32
    %c0_i32_1 = arith.constant 0 : i32
    return %c0_i32, %c0_i32_0 : i32, i32
  }
  func.func @transform_21(%arg0: i32) -> (i32, i32) {
    %c0_i32 = arith.constant 0 : i32
    %c0_i32_0 = arith.constant 0 : i32
    %c0_i32_1 = arith.constant 0 : i32
    return %c0_i32, %c0_i32_0 : i32, i32
  }
  func.func @transform_22(%arg0: i32) -> (i32, i32) {
    %c0_i32 = arith.constant 0 : i32
    %c0_i32_0 = arith.constant 0 : i32
    %c0_i32_1 = arith.constant 0 : i32
    return %c0_i32, %c0_i32_0 : i32, i32
  }
  func.func @transform_23(%arg0: i32) -> (i32, i32, i32) {
    %c0_i32 = arith.constant 0 : i32
    %c0_i32_0 = arith.constant 0 : i32
    %c0_i32_1 = arith.constant 0 : i32
    return %arg0, %c0_i32, %c0_i32_0 : i32, i32, i32
  }
  func.func @transform_24(%arg0: i32) -> (i32, i32, i32) {
    %c0_i32 = arith.constant 0 : i32
    %c0_i32_0 = arith.constant 0 : i32
    %c0_i32_1 = arith.constant 0 : i32
    return %arg0, %c0_i32, %c0_i32_0 : i32, i32, i32
  }
}

</mosaic_0001>

<bundles_post_ra>
// kernel: llm_loss.1
= control target key start
LH: loop header
LB: loop body
LE: loop exit
PB: predicated region body
PF: predicated region fallthrough
CT: control target
= control target key end

     0   :  { %s7398_s0 = inlined_call_operand.vmem [shape: f32[2,16,128], index: 0, kind: input, shape index: {}]   ;;  %s7399_s1 = inlined_call_operand.vmem [shape: s32[2,1,16], index: 1, kind: input, shape index: {}]   ;;  %s7400_s2 = inlined_call_operand.vmem [shape: s32[2,16,1], index: 2, kind: input, shape index: {}]   ;;  %s7401_s3 = inlined_call_operand.hbm [shape: f32[1,128], index: 3, kind: input, shape index: {}]   ;;  %s7402_s4 = inlined_call_operand.vmem [shape: bf16[128,128], index: 4, kind: input, shape index: {}]   ;;  %s7403_s5 = inlined_call_operand.hbm [shape: bf16[128,128], index: 5, kind: input, shape index: {}]   ;;  %s7404_s6 = inlined_call_operand.hbm [shape: bf16[128,128], index: 6, kind: input, shape index: {}]   ;;  %s7405_s7 = inlined_call_operand.hbm [shape: bf16[128,128], index: 7, kind: input, shape index: {}]   ;;  %s7406_s8 = inlined_call_operand.hbm [shape: f32[1,128], index: 8, kind: input, shape index: {}]   ;;  %s7407_s9 = inlined_call_operand.hbm [shape: bf16[128,256], index: 9, kind: input, shape index: {}]   ;;  %s7408_s10 = inlined_call_operand.hbm [shape: bf16[128,256], index: 10, kind: input, shape index: {}]   ;;  %s7409_s11 = inlined_call_operand.hbm [shape: bf16[256,128], index: 11, kind: input, shape index: {}]   ;;  %s7410_s12 = inlined_call_operand.hbm [shape: f32[1,128], index: 12, kind: input, shape index: {}]   ;;  %s7411_s13 = inlined_call_operand.hbm [shape: bf16[128,128], index: 13, kind: input, shape index: {}]   ;;  %s7412_s14 = inlined_call_operand.hbm [shape: bf16[128,128], index: 14, kind: input, shape index: {}]   ;;  %s7413_s15 = inlined_call_operand.hbm [shape: bf16[128,128], index: 15, kind: input, shape index: {}]   ;;  %s7414_s16 = inlined_call_operand.hbm [shape: bf16[128,128], index: 16, kind: input, shape index: {}]   ;;  %s7415_s17 = inlined_call_operand.hbm [shape: f32[1,128], index: 17, kind: input, shape index: {}]   ;;  %s7416_s18 = inlined_call_operand.hbm [shape: bf16[128,256], index: 18, kind: input, shape index: {}]   ;;  %s7417_s19 = inlined_call_operand.hbm [shape: bf16[128,256], index: 19, kind: input, shape index: {}]   ;;  %s7418_s20 = inlined_call_operand.hbm [shape: bf16[256,128], index: 20, kind: input, shape index: {}]   ;;  %s7419_s21 = inlined_call_operand.hbm [shape: f32[1,128], index: 21, kind: input, shape index: {}]   ;;  %s7420_s22 = inlined_call_operand.hbm [shape: bf16[128,256], index: 22, kind: input, shape index: {}]   ;;  %s7421_s23 = inlined_call_operand.vmem [shape: f32[2,1,1], index: 23, kind: output, shape index: {0}]   ;;  %s7422_s24 = inlined_call_operand.vmem [shape: f32[2,1,1], index: 24, kind: output, shape index: {1}]  }
   0x1   :  { %7445 = sst [smem:[#allocation44_spill]] %s7398_s0 }
   0x2   :  { %7446 = sst [smem:[#allocation45_spill]] %s7399_s1 }
   0x3   :  { %7447 = sst [smem:[#allocation46_spill]] %s7400_s2 }
   0x4   :  { %7448 = sst [smem:[#allocation47_spill]] %s7401_s3 }
   0x5   :  { %7449 = sst [smem:[#allocation48_spill]] %s7402_s4 }
   0x6   :  { %7450 = sst [smem:[#allocation49_spill]] %s7403_s5 }
   0x7   :  { %7451 = sst [smem:[#allocation50_spill]] %s7404_s6 }
   0x8   :  { %7452 = sst [smem:[#allocation51_spill]] %s7405_s7 }
   0x9   :  { %7453 = sst [smem:[#allocation52_spill]] %s7406_s8 }
   0xa   :  { %7454 = sst [smem:[#allocation53_spill]] %s7407_s9 }
   0xb   :  { %7455 = sst [smem:[#allocation54_spill]] %s7409_s11 }
   0xc   :  { %7456 = sst [smem:[#allocation55_spill]] %s7411_s13 }
   0xd   :  { %7457 = sst [smem:[#allocation56_spill]] %s7413_s15 }
   0xe   :  { %7458 = sst [smem:[#allocation57_spill]] %s7420_s22 }
   0xf   :  { %7459 = sst [smem:[#allocation58_spill]] %s7421_s23 }
  0x10   :  { %7460 = sst [smem:[#allocation59_spill]] %s7422_s24 }
  0x11   :  { %30 = vsyncpa [#allocation3], 0 }
  0x12   :  { %31 = vsyncpa [#allocation5], 0 }
  0x13   :  { %32 = vsyncpa [#allocation8], 0 }
  0x14   :  { %33 = vsyncpa [#allocation11], 0 }
  0x15   :  { %34 = vsyncpa [#allocation14], 0 }
  0x16   :  { %35 = vsyncpa [#allocation17], 0 }
  0x17   :  { %36 = vsyncpa [#allocation20], 0 }
  0x18   :  { %37 = vsyncpa [#allocation23], 0 }
  0x19   :  { %38 = vsyncpa [#allocation26], 0 }
  0x1a   :  { %39 = vsyncpa [#allocation29], 0  ;;  %s6420_s5 = smov 0  }
  0x1b LB: > { %7461 = sst [smem:[#allocation41_spill]] %s6266_s5  ;;  %s6268_s26 = smov [#allocation4]   ;;  %s6266_s5 = sphi %s6420_s5, %s45_s5  }
  0x1c   : > { %s626_s27 = sshll.u32 %s6268_s26, 4  ;;  %s6426_s28 = sadd.s32 4294967295, %s6266_s5   ;;  %s6431_s27 = int_to_ptr.vmem [resolvable:$true] %s626_s27 }
  0x1d   : > { %7462 = sst [smem:[#allocation42_spill]] %s6426_s28  ;;  %p4477_p0 = scmp.ge.s32.totalorder %s6266_s5, 1 }
  0x1e   : > { %p600_p1 = scmp.lt.s32.totalorder %s6266_s5, 3  ;;  %p7438_p2 = scmp.eq.s32.totalorder %s6426_s28, 0 }
  0x1f   : > { %s6269_s2 = smov [#allocation7]   ;;  %s6270_s7 = smov [#allocation10]  }
  0x20   : > { %p6433_p3 = pnand %p4477_p0, %p600_p1  ;;  %s652_s29 = sshll.u32 %s6269_s2, 4  ;;  %s6439_s29 = int_to_ptr.vmem [resolvable:$true] %s652_s29 }
  0x21   : > { %s676_s30 = sshll.u32 %s6270_s7, 4  ;;  %s7466_s8 = sld [smem:[#allocation49_spill]]  ;;  %s6447_s30 = int_to_ptr.vmem [resolvable:$true] %s676_s30 }
  0x22   : > { %s7463_s6 = scalar_select %p6433_p3, 1, 0 }
  0x23   : > { %p5209_p4 = pneg %p6433_p3 }
  0x24   : > { %7464 = sst [smem:[#allocation43_spill]] %s7463_s6 }
  0x25   : > { %p6443_p5 = pnand %p7438_p2, %p5209_p4 }
  0x27   : > { %s5688_s4 = scalar_lea.hbm %s7466_s8, 1024  ;;  %p6457_p7 = pneg %p6443_p5 }
  0x28   : > { %p5689_p6 = scmp.ne.s32.totalorder %s7466_s8, %s5688_s4  ;;  %p5695_p10 = scmp.lt.u32.totalorder %s5688_s4, %s7466_s8 }
  0x2a   : > { %p5691_p8 = pnand %p6457_p7, %p5689_p6 }
  0x2c   : > { %p5692_p9 = pneg %p5691_p8 }
  0x2e   : > { %p5697_p11 = pnand %p5695_p10, %p5692_p9 }
  0x30   : > { %5700 = shalt.err (!%p5697_p11)
}
  0x31   : > { %s5701_s3 = scalar_lea.vmem %s6431_s27, 1024  ;;  %p5709_p1 = scmp.lt.s32.totalorder %s6431_s27, %s6431_s27 }
  0x32   : > { %p5702_p12 = scmp.ne.s32.totalorder %s6431_s27, %s5701_s3  ;;  %p5710_p4 = scmp.lt.s32.totalorder %s5701_s3, %s5701_s3 }
  0x34   : > { %p5704_p13 = pnand %p5702_p12, %p6457_p7  ;;  %p5711_p6 = por %p5710_p4, %p5709_p1 }
  0x36   : > { %p5705_p0 = pneg %p5704_p13 }
  0x38   : > { %p5712_p8 = pnand %p5711_p6, %p5705_p0 }
  0x3a   : > { %5715 = shalt.err (!%p5712_p8)
}
  0x3b   : > { %s7434_s25 = smov 64   ;;  %s7436_s5 = smov 4  }
  0x3c   : > { %5215 = dma.hbm_to_vmem [thread:$0]  (!%p6443_p5), %s7466_s8, 1024, %s6431_s27, [#allocation5], %s7434_s25, %s7434_s25, %s7436_s5  }
  0x3d   : > { %s7468_s23 = sld [smem:[#allocation51_spill]] }
  0x43   : > { %s5716_s3 = scalar_lea.hbm %s7468_s23, 1024 }
  0x44   : > { %p5717_p9 = scmp.ne.s32.totalorder %s7468_s23, %s5716_s3  ;;  %p5723_p12 = scmp.lt.u32.totalorder %s5716_s3, %s7468_s23 }
  0x46   : > { %p5719_p10 = pnand %p5717_p9, %p6457_p7 }
  0x48   : > { %p5720_p11 = pneg %p5719_p10 }
  0x4a   : > { %p5725_p13 = pnand %p5723_p12, %p5720_p11 }
  0x4c   : > { %5728 = shalt.err (!%p5725_p13)
}
  0x4d   : > { %s5729_s27 = scalar_lea.vmem %s6439_s29, 1024  ;;  %p5737_p6 = scmp.lt.s32.totalorder %s6439_s29, %s6439_s29 }
  0x4e   : > { %p5730_p0 = scmp.ne.s32.totalorder %s6439_s29, %s5729_s27  ;;  %p5738_p8 = scmp.lt.s32.totalorder %s5729_s27, %s5729_s27 }
  0x50   : > { %p5732_p1 = pnand %p5730_p0, %p6457_p7  ;;  %p5739_p9 = por %p5738_p8, %p5737_p6 }
  0x52   : > { %p5733_p4 = pneg %p5732_p1 }
  0x54   : > { %p5740_p10 = pnand %p5739_p9, %p5733_p4 }
  0x56   : > { %5743 = shalt.err (!%p5740_p10)
}
  0x57   : > { %5221 = dma.hbm_to_vmem [thread:$0]  (!%p6443_p5), %s7468_s23, 1024, %s6439_s29, [#allocation8], %s7434_s25, %s7434_s25, %s7436_s5  }
  0x58   : > { %s7469_s9 = sld [smem:[#allocation53_spill]] }
  0x5e   : > { %s5744_s4 = scalar_lea.hbm %s7469_s9, 2048 }
  0x5f   : > { %p5745_p11 = scmp.ne.s32.totalorder %s7469_s9, %s5744_s4  ;;  %p5751_p0 = scmp.lt.u32.totalorder %s5744_s4, %s7469_s9 }
  0x61   : > { %p5747_p12 = pnand %p5745_p11, %p6457_p7 }
  0x63   : > { %p5748_p13 = pneg %p5747_p12 }
  0x65   : > { %p5753_p1 = pnand %p5751_p0, %p5748_p13 }
  0x67   : > { %5756 = shalt.err (!%p5753_p1)
}
  0x68   : > { %s5757_s29 = scalar_lea.vmem %s6447_s30, 2048  ;;  %p5765_p9 = scmp.lt.s32.totalorder %s6447_s30, %s6447_s30 }
  0x69   : > { %p5758_p4 = scmp.ne.s32.totalorder %s6447_s30, %s5757_s29  ;;  %p5766_p10 = scmp.lt.s32.totalorder %s5757_s29, %s5757_s29 }
  0x6b   : > { %p5760_p6 = pnand %p5758_p4, %p6457_p7  ;;  %p5767_p11 = por %p5766_p10, %p5765_p9 }
  0x6d   : > { %p5761_p8 = pneg %p5760_p6 }
  0x6f   : > { %p5768_p12 = pnand %p5767_p11, %p5761_p8 }
  0x71   : > { %5771 = shalt.err (!%p5768_p12)
}
  0x72   : > { %s7440_s27 = smov 128   ;;  %s7442_s22 = smov 8  }
  0x73   : > { %5227 = dma.hbm_to_vmem [thread:$0]  (!%p6443_p5), %s7469_s9, 2048, %s6447_s30, [#allocation11], %s7440_s27, %s7440_s27, %s7442_s22  }
  0x74   : > { %s6275_s6 = smov [#allocation13]   ;;  %s6276_s1 = smov [#allocation16]  }
  0x75   : > { %s702_s4 = sshll.u32 %s6275_s6, 4  ;;  %s726_s26 = sshll.u32 %s6276_s1, 4  ;;  %s703_s4 = int_to_ptr.vmem [resolvable:$true] %s702_s4  ;;  %s6533_s26 = int_to_ptr.vmem [resolvable:$true] %s726_s26 }
  0x76   : > { %s7470_s11 = sld [smem:[#allocation54_spill]] }
  0x7c   : > { %s5772_s29 = scalar_lea.hbm %s7470_s11, 2048 }
  0x7d   : > { %p5773_p13 = scmp.ne.s32.totalorder %s7470_s11, %s5772_s29  ;;  %p5779_p4 = scmp.lt.u32.totalorder %s5772_s29, %s7470_s11 }
  0x7f   : > { %p5775_p0 = pnand %p5773_p13, %p6457_p7 }
  0x81   : > { %p5776_p1 = pneg %p5775_p0 }
  0x83   : > { %p5781_p6 = pnand %p5779_p4, %p5776_p1 }
  0x85   : > { %5784 = shalt.err (!%p5781_p6)
}
  0x86   : > { %s5785_s28 = scalar_lea.vmem %s703_s4, 2048  ;;  %p5793_p11 = scmp.lt.s32.totalorder %s703_s4, %s703_s4 }
  0x87   : > { %p5786_p8 = scmp.ne.s32.totalorder %s703_s4, %s5785_s28  ;;  %p5794_p12 = scmp.lt.s32.totalorder %s5785_s28, %s5785_s28 }
  0x89   : > { %p5788_p9 = pnand %p5786_p8, %p6457_p7  ;;  %p5795_p2 = por %p5794_p12, %p5793_p11 }
  0x8b   : > { %p5789_p10 = pneg %p5788_p9 }
  0x8d   : > { %p5796_p3 = pnand %p5795_p2, %p5789_p10 }
  0x8f   : > { %5799 = shalt.err (!%p5796_p3)
}
  0x90   : > { %s7471_s25 = smov 4   ;;  %s7472_s5 = smov 64  }
  0x91   : > { %5233 = dma.hbm_to_vmem [thread:$0]  (!%p6443_p5), %s7470_s11, 2048, %s703_s4, [#allocation14], %s7472_s5, %s7472_s5, %s7471_s25  }
  0x92   : > { %s7473_s13 = sld [smem:[#allocation55_spill]] }
  0x98   : > { %s5800_s29 = scalar_lea.hbm %s7473_s13, 1024 }
  0x99   : > { %p5801_p13 = scmp.ne.s32.totalorder %s7473_s13, %s5800_s29  ;;  %p5807_p0 = scmp.lt.u32.totalorder %s5800_s29, %s7473_s13 }
  0x9b   : > { %p5803_p2 = pnand %p5801_p13, %p6457_p7 }
  0x9d   : > { %p5804_p3 = pneg %p5803_p2 }
  0x9f   : > { %p5809_p1 = pnand %p5807_p0, %p5804_p3 }
  0xa1   : > { %5812 = shalt.err (!%p5809_p1)
}
  0xa2   : > { %s5813_s4 = scalar_lea.vmem %s6533_s26, 1024  ;;  %p5821_p9 = scmp.lt.s32.totalorder %s6533_s26, %s6533_s26 }
  0xa3   : > { %p5814_p4 = scmp.ne.s32.totalorder %s6533_s26, %s5813_s4  ;;  %p5822_p10 = scmp.lt.s32.totalorder %s5813_s4, %s5813_s4 }
  0xa5   : > { %p5816_p6 = pnand %p5814_p4, %p6457_p7  ;;  %p5823_p11 = por %p5822_p10, %p5821_p9 }
  0xa7   : > { %p5817_p8 = pneg %p5816_p6 }
  0xa9   : > { %p5824_p12 = pnand %p5823_p11, %p5817_p8 }
  0xab   : > { %5827 = shalt.err (!%p5824_p12)
}
  0xac   : > { %5239 = dma.hbm_to_vmem [thread:$0]  (!%p6443_p5), %s7473_s13, 1024, %s6533_s26, [#allocation17], %s7472_s5, %s7472_s5, %s7471_s25  }
  0xad   : > { %s6277_s1 = smov [#allocation19]   ;;  %s6278_s3 = smov [#allocation22]  }
  0xae   : > { %s752_s7 = sshll.u32 %s6277_s1, 4  ;;  %s779_s29 = sshll.u32 %s6278_s3, 4  ;;  %s753_s7 = int_to_ptr.vmem [resolvable:$true] %s752_s7  ;;  %s6582_s29 = int_to_ptr.vmem [resolvable:$true] %s779_s29 }
  0xaf   : > { %s7474_s15 = sld [smem:[#allocation56_spill]] }
  0xb5   : > { %s5828_s28 = scalar_lea.hbm %s7474_s15, 1024 }
  0xb6   : > { %p5829_p13 = scmp.ne.s32.totalorder %s7474_s15, %s5828_s28  ;;  %p5835_p0 = scmp.lt.u32.totalorder %s5828_s28, %s7474_s15 }
  0xb8   : > { %p5831_p2 = pnand %p5829_p13, %p6457_p7 }
  0xba   : > { %p5832_p3 = pneg %p5831_p2 }
  0xbc   : > { %p5837_p1 = pnand %p5835_p0, %p5832_p3 }
  0xbe   : > { %5840 = shalt.err (!%p5837_p1)
}
  0xbf   : > { %s5841_s6 = scalar_lea.vmem %s753_s7, 1024  ;;  %p5849_p9 = scmp.lt.s32.totalorder %s753_s7, %s753_s7 }
  0xc0   : > { %p5842_p4 = scmp.ne.s32.totalorder %s753_s7, %s5841_s6  ;;  %p5850_p10 = scmp.lt.s32.totalorder %s5841_s6, %s5841_s6 }
  0xc2   : > { %p5844_p6 = pnand %p5842_p4, %p6457_p7  ;;  %p5851_p11 = por %p5850_p10, %p5849_p9 }
  0xc4   : > { %p5845_p8 = pneg %p5844_p6 }
  0xc6   : > { %p5852_p12 = pnand %p5851_p11, %p5845_p8 }
  0xc8   : > { %5855 = shalt.err (!%p5852_p12)
}
  0xc9   : > { %5245 = dma.hbm_to_vmem [thread:$0]  (!%p6443_p5), %s7474_s15, 1024, %s753_s7, [#allocation20], %s7472_s5, %s7472_s5, %s7471_s25  }
  0xca   : > { %s5856_s30 = scalar_lea.hbm %s7415_s17, 16 }
  0xcb   : > { %p5857_p13 = scmp.ne.s32.totalorder %s7415_s17, %s5856_s30  ;;  %p5863_p0 = scmp.lt.u32.totalorder %s5856_s30, %s7415_s17 }
  0xcd   : > { %p5859_p2 = pnand %p5857_p13, %p6457_p7 }
  0xcf   : > { %p5860_p3 = pneg %p5859_p2 }
  0xd1   : > { %p5865_p1 = pnand %p5863_p0, %p5860_p3 }
  0xd3   : > { %5868 = shalt.err (!%p5865_p1)
}
  0xd4   : > { %s5869_s7 = scalar_lea.vmem %s6582_s29, 16  ;;  %s5876_s6 = scalar_lea.vmem %s6582_s29, 32 }
  0xd5   : > { %p5870_p4 = scmp.ne.s32.totalorder %s6582_s29, %s5869_s7  ;;  %p5877_p9 = scmp.lt.s32.totalorder %s6582_s29, %s6582_s29 }
  0xd6   : > { %p5878_p10 = scmp.lt.s32.totalorder %s5876_s6, %s5869_s7 }
  0xd7   : > { %p5872_p6 = pnand %p5870_p4, %p6457_p7 }
  0xd8   : > { %p5879_p11 = por %p5878_p10, %p5877_p9 }
  0xd9   : > { %p5873_p8 = pneg %p5872_p6 }
  0xdb   : > { %p5880_p12 = pnand %p5879_p11, %p5873_p8 }
  0xdd   : > { %5883 = shalt.err (!%p5880_p12)
}
  0xde   : > { %5251 = dma.hbm_to_vmem [thread:$0]  (!%p6443_p5), %s7415_s17, 16, %s6582_s29, [#allocation23]  }
  0xdf   : > { %s6279_s3 = smov [#allocation25]   ;;  %s6280_s30 = smov [#allocation28]  }
  0xe0   : > { %s802_s24 = sshll.u32 %s6279_s3, 4  ;;  %s829_s28 = sshll.u32 %s6280_s30, 4  ;;  %s803_s24 = int_to_ptr.vmem [resolvable:$true] %s802_s24  ;;  %s6629_s28 = int_to_ptr.vmem [resolvable:$true] %s829_s28 }
  0xe1   : > { %s5884_s26 = scalar_lea.hbm %s7417_s19, 2048 }
  0xe2   : > { %p5885_p13 = scmp.ne.s32.totalorder %s7417_s19, %s5884_s26  ;;  %p5891_p0 = scmp.lt.u32.totalorder %s5884_s26, %s7417_s19 }
  0xe4   : > { %p5887_p2 = pnand %p5885_p13, %p6457_p7 }
  0xe6   : > { %p5888_p3 = pneg %p5887_p2 }
  0xe8   : > { %p5893_p1 = pnand %p5891_p0, %p5888_p3 }
  0xea   : > { %5896 = shalt.err (!%p5893_p1)
}
  0xeb   : > { %s5897_s1 = scalar_lea.vmem %s803_s24, 2048  ;;  %p5905_p9 = scmp.lt.s32.totalorder %s803_s24, %s803_s24 }
  0xec   : > { %p5898_p4 = scmp.ne.s32.totalorder %s803_s24, %s5897_s1  ;;  %p5906_p10 = scmp.lt.s32.totalorder %s5897_s1, %s5897_s1 }
  0xee   : > { %p5900_p6 = pnand %p5898_p4, %p6457_p7  ;;  %p5907_p11 = por %p5906_p10, %p5905_p9 }
  0xf0   : > { %p5901_p8 = pneg %p5900_p6 }
  0xf2   : > { %p5908_p12 = pnand %p5907_p11, %p5901_p8 }
  0xf4   : > { %5911 = shalt.err (!%p5908_p12)
}
  0xf5   : > { %s7475_s3 = smov 8   ;;  %s7476_s30 = smov 128  }
  0xf6   : > { %5257 = dma.hbm_to_vmem [thread:$0]  (!%p6443_p5), %s7417_s19, 2048, %s803_s24, [#allocation26], %s7476_s30, %s7476_s30, %s7475_s3  }
  0xf7   : > { %s5912_s6 = scalar_lea.hbm %s7419_s21, 16 }
  0xf8   : > { %p5913_p13 = scmp.ne.s32.totalorder %s7419_s21, %s5912_s6  ;;  %p5919_p0 = scmp.lt.u32.totalorder %s5912_s6, %s7419_s21 }
  0xfa   : > { %p5915_p2 = pnand %p5913_p13, %p6457_p7 }
  0xfc   : > { %p5916_p3 = pneg %p5915_p2 }
  0xfe   : > { %p5921_p1 = pnand %p5919_p0, %p5916_p3 }
 0x100   : > { %5924 = shalt.err (!%p5921_p1)
}
 0x101   : > { %s5925_s24 = scalar_lea.vmem %s6629_s28, 16  ;;  %s5932_s4 = scalar_lea.vmem %s6629_s28, 32 }
 0x102   : > { %p5926_p4 = scmp.ne.s32.totalorder %s6629_s28, %s5925_s24  ;;  %p5933_p9 = scmp.lt.s32.totalorder %s6629_s28, %s6629_s28 }
 0x103   : > { %p5934_p10 = scmp.lt.s32.totalorder %s5932_s4, %s5925_s24 }
 0x104   : > { %p5928_p6 = pnand %p5926_p4, %p6457_p7 }
 0x105   : > { %p5935_p11 = por %p5934_p10, %p5933_p9 }
 0x106   : > { %p5929_p8 = pneg %p5928_p6 }
 0x108   : > { %p5936_p12 = pnand %p5935_p11, %p5929_p8 }
 0x10a   : > { %5939 = shalt.err (!%p5936_p12)
}
 0x10b   : > { %5263 = dma.hbm_to_vmem [thread:$0]  (!%p6443_p5), %s7419_s21, 16, %s6629_s28, [#allocation29]  }
 0x10c   : > { %s6281_s26 = smov [#allocation2]   ;;  %s6282_s6 = smov [#allocation6]  }
 0x10d   : > { %s613_s7 = sshll.u32 %s6281_s26, 4  ;;  %s639_s22 = sshll.u32 %s6282_s6, 4  ;;  %s614_s7 = int_to_ptr.vmem [resolvable:$true] %s613_s7  ;;  %s6676_s22 = int_to_ptr.vmem [resolvable:$true] %s639_s22 }
 0x10e   : > { %s7477_s24 = sld [smem:[#allocation47_spill]] }
 0x114   : > { %s5940_s4 = scalar_lea.hbm %s7477_s24, 16 }
 0x115   : > { %p5941_p13 = scmp.ne.s32.totalorder %s7477_s24, %s5940_s4  ;;  %p5947_p0 = scmp.lt.u32.totalorder %s5940_s4, %s7477_s24 }
 0x117   : > { %p5943_p2 = pnand %p5941_p13, %p6457_p7 }
 0x119   : > { %p5944_p3 = pneg %p5943_p2 }
 0x11b   : > { %p5949_p1 = pnand %p5947_p0, %p5944_p3 }
 0x11d   : > { %5952 = shalt.err (!%p5949_p1)
}
 0x11e   : > { %s5953_s27 = scalar_lea.vmem %s614_s7, 16  ;;  %s5960_s26 = scalar_lea.vmem %s614_s7, 32 }
 0x11f   : > { %p5954_p4 = scmp.ne.s32.totalorder %s614_s7, %s5953_s27  ;;  %p5961_p9 = scmp.lt.s32.totalorder %s614_s7, %s614_s7 }
 0x120   : > { %p5962_p10 = scmp.lt.s32.totalorder %s5960_s26, %s5953_s27 }
 0x121   : > { %p5956_p6 = pnand %p5954_p4, %p6457_p7 }
 0x122   : > { %p5963_p11 = por %p5962_p10, %p5961_p9 }
 0x123   : > { %p5957_p8 = pneg %p5956_p6 }
 0x125   : > { %p5964_p12 = pnand %p5963_p11, %p5957_p8 }
 0x127   : > { %5967 = shalt.err (!%p5964_p12)
}
 0x128   : > { %5212 = dma.hbm_to_vmem [thread:$0]  (!%p6443_p5), %s7477_s24, 16, %s614_s7, [#allocation3]  }
 0x129   : > { %s7478_s1 = sld [smem:[#allocation50_spill]] }
 0x12f   : > { %s5968_s4 = scalar_lea.hbm %s7478_s1, 1024 }
 0x130   : > { %p5969_p13 = scmp.ne.s32.totalorder %s7478_s1, %s5968_s4  ;;  %p5975_p0 = scmp.lt.u32.totalorder %s5968_s4, %s7478_s1 }
 0x132   : > { %p5971_p2 = pnand %p5969_p13, %p6457_p7 }
 0x134   : > { %p5972_p3 = pneg %p5971_p2 }
 0x136   : > { %p5977_p1 = pnand %p5975_p0, %p5972_p3 }
 0x138   : > { %5980 = shalt.err (!%p5977_p1)
}
 0x139   : > { %s5981_s7 = scalar_lea.vmem %s6676_s22, 1024  ;;  %p5989_p9 = scmp.lt.s32.totalorder %s6676_s22, %s6676_s22 }
 0x13a   : > { %p5982_p4 = scmp.ne.s32.totalorder %s6676_s22, %s5981_s7  ;;  %p5990_p10 = scmp.lt.s32.totalorder %s5981_s7, %s5981_s7 }
 0x13c   : > { %p5984_p6 = pnand %p5982_p4, %p6457_p7  ;;  %p5991_p11 = por %p5990_p10, %p5989_p9 }
 0x13e   : > { %p5985_p8 = pneg %p5984_p6 }
 0x140   : > { %p5992_p12 = pnand %p5991_p11, %p5985_p8 }
 0x142   : > { %5995 = shalt.err (!%p5992_p12)
}
 0x143   : > { %5218 = dma.hbm_to_vmem [thread:$0]  (!%p6443_p5), %s7478_s1, 1024, %s6676_s22, [#allocation5], %s7472_s5, %s7472_s5, %s7471_s25  }
 0x144   : > { %s6283_s6 = smov [#allocation9]   ;;  %s6284_s4 = smov [#allocation12]  }
 0x145   : > { %s666_s29 = sshll.u32 %s6283_s6, 4  ;;  %s689_s8 = sshll.u32 %s6284_s4, 4  ;;  %s667_s29 = int_to_ptr.vmem [resolvable:$true] %s666_s29  ;;  %s6722_s8 = int_to_ptr.vmem [resolvable:$true] %s689_s8 }
 0x146   : > { %s7479_s26 = sld [smem:[#allocation52_spill]] }
 0x14c   : > { %s5996_s7 = scalar_lea.hbm %s7479_s26, 16 }
 0x14d   : > { %p5997_p13 = scmp.ne.s32.totalorder %s7479_s26, %s5996_s7  ;;  %p6003_p0 = scmp.lt.u32.totalorder %s5996_s7, %s7479_s26 }
 0x14f   : > { %p5999_p2 = pnand %p5997_p13, %p6457_p7 }
 0x151   : > { %p6000_p3 = pneg %p5999_p2 }
 0x153   : > { %p6005_p1 = pnand %p6003_p0, %p6000_p3 }
 0x155   : > { %6008 = shalt.err (!%p6005_p1)
}
 0x156   : > { %s6009_s11 = scalar_lea.vmem %s667_s29, 16  ;;  %s6016_s6 = scalar_lea.vmem %s667_s29, 32 }
 0x157   : > { %p6010_p4 = scmp.ne.s32.totalorder %s667_s29, %s6009_s11  ;;  %p6017_p9 = scmp.lt.s32.totalorder %s667_s29, %s667_s29 }
 0x158   : > { %p6018_p10 = scmp.lt.s32.totalorder %s6016_s6, %s6009_s11 }
 0x159   : > { %p6012_p6 = pnand %p6010_p4, %p6457_p7 }
 0x15a   : > { %p6019_p11 = por %p6018_p10, %p6017_p9 }
 0x15b   : > { %p6013_p8 = pneg %p6012_p6 }
 0x15d   : > { %p6020_p12 = pnand %p6019_p11, %p6013_p8 }
 0x15f   : > { %6023 = shalt.err (!%p6020_p12)
}
 0x160   : > { %5224 = dma.hbm_to_vmem [thread:$0]  (!%p6443_p5), %s7479_s26, 16, %s667_s29, [#allocation8]  }
 0x161   : > { %s6024_s27 = scalar_lea.hbm %s7408_s10, 2048 }
 0x162   : > { %p6025_p13 = scmp.ne.s32.totalorder %s7408_s10, %s6024_s27  ;;  %p6031_p0 = scmp.lt.u32.totalorder %s6024_s27, %s7408_s10 }
 0x164   : > { %p6027_p2 = pnand %p6025_p13, %p6457_p7 }
 0x166   : > { %p6028_p3 = pneg %p6027_p2 }
 0x168   : > { %p6033_p1 = pnand %p6031_p0, %p6028_p3 }
 0x16a   : > { %6036 = shalt.err (!%p6033_p1)
}
 0x16b   : > { %s6037_s29 = scalar_lea.vmem %s6722_s8, 2048  ;;  %p6045_p9 = scmp.lt.s32.totalorder %s6722_s8, %s6722_s8 }
 0x16c   : > { %p6038_p4 = scmp.ne.s32.totalorder %s6722_s8, %s6037_s29  ;;  %p6046_p10 = scmp.lt.s32.totalorder %s6037_s29, %s6037_s29 }
 0x16e   : > { %p6040_p6 = pnand %p6038_p4, %p6457_p7  ;;  %p6047_p11 = por %p6046_p10, %p6045_p9 }
 0x170   : > { %p6041_p8 = pneg %p6040_p6 }
 0x172   : > { %p6048_p12 = pnand %p6047_p11, %p6041_p8 }
 0x174   : > { %6051 = shalt.err (!%p6048_p12)
}
 0x175   : > { %5230 = dma.hbm_to_vmem [thread:$0]  (!%p6443_p5), %s7408_s10, 2048, %s6722_s8, [#allocation11], %s7476_s30, %s7476_s30, %s7475_s3  }
 0x176   : > { %s6285_s15 = smov [#allocation15]   ;;  %s6286_s28 = smov [#allocation18]  }
 0x177   : > { %s716_s4 = sshll.u32 %s6285_s15, 4  ;;  %s739_s27 = sshll.u32 %s6286_s28, 4  ;;  %s717_s4 = int_to_ptr.vmem [resolvable:$true] %s716_s4  ;;  %s6768_s27 = int_to_ptr.vmem [resolvable:$true] %s739_s27 }
 0x178   : > { %s6052_s22 = scalar_lea.hbm %s7410_s12, 16 }
 0x179   : > { %p6053_p13 = scmp.ne.s32.totalorder %s7410_s12, %s6052_s22  ;;  %p6059_p0 = scmp.lt.u32.totalorder %s6052_s22, %s7410_s12 }
 0x17b   : > { %p6055_p2 = pnand %p6053_p13, %p6457_p7 }
 0x17d   : > { %p6056_p3 = pneg %p6055_p2 }
 0x17f   : > { %p6061_p1 = pnand %p6059_p0, %p6056_p3 }
 0x181   : > { %6064 = shalt.err (!%p6061_p1)
}
 0x182   : > { %s6065_s13 = scalar_lea.vmem %s717_s4, 16  ;;  %s6072_s15 = scalar_lea.vmem %s717_s4, 32 }
 0x183   : > { %p6066_p4 = scmp.ne.s32.totalorder %s717_s4, %s6065_s13  ;;  %p6073_p9 = scmp.lt.s32.totalorder %s717_s4, %s717_s4 }
 0x184   : > { %p6074_p10 = scmp.lt.s32.totalorder %s6072_s15, %s6065_s13 }
 0x185   : > { %p6068_p6 = pnand %p6066_p4, %p6457_p7 }
 0x186   : > { %p6075_p11 = por %p6074_p10, %p6073_p9 }
 0x187   : > { %p6069_p8 = pneg %p6068_p6 }
 0x189   : > { %p6076_p12 = pnand %p6075_p11, %p6069_p8 }
 0x18b   : > { %6079 = shalt.err (!%p6076_p12)
}
 0x18c   : > { %5236 = dma.hbm_to_vmem [thread:$0]  (!%p6443_p5), %s7410_s12, 16, %s717_s4, [#allocation14]  }
 0x18d   : > { %s6080_s11 = scalar_lea.hbm %s7412_s14, 1024 }
 0x18e   : > { %p6081_p13 = scmp.ne.s32.totalorder %s7412_s14, %s6080_s11  ;;  %p6087_p0 = scmp.lt.u32.totalorder %s6080_s11, %s7412_s14 }
 0x190   : > { %p6083_p2 = pnand %p6081_p13, %p6457_p7 }
 0x192   : > { %p6084_p3 = pneg %p6083_p2 }
 0x194   : > { %p6089_p1 = pnand %p6087_p0, %p6084_p3 }
 0x196   : > { %6092 = shalt.err (!%p6089_p1)
}
 0x197   : > { %s6093_s4 = scalar_lea.vmem %s6768_s27, 1024  ;;  %p6101_p9 = scmp.lt.s32.totalorder %s6768_s27, %s6768_s27 }
 0x198   : > { %p6094_p4 = scmp.ne.s32.totalorder %s6768_s27, %s6093_s4  ;;  %p6102_p10 = scmp.lt.s32.totalorder %s6093_s4, %s6093_s4 }
 0x19a   : > { %p6096_p6 = pnand %p6094_p4, %p6457_p7  ;;  %p6103_p11 = por %p6102_p10, %p6101_p9 }
 0x19c   : > { %p6097_p8 = pneg %p6096_p6 }
 0x19e   : > { %p6104_p12 = pnand %p6103_p11, %p6097_p8 }
 0x1a0   : > { %6107 = shalt.err (!%p6104_p12)
}
 0x1a1   : > { %5242 = dma.hbm_to_vmem [thread:$0]  (!%p6443_p5), %s7412_s14, 1024, %s6768_s27, [#allocation17], %s7472_s5, %s7472_s5, %s7471_s25  }
 0x1a2   : > { %s6287_s7 = smov [#allocation21]   ;;  %s6288_s22 = smov [#allocation24]  }
 0x1a3   : > { %s765_s9 = sshll.u32 %s6287_s7, 4  ;;  %s789_s11 = sshll.u32 %s6288_s22, 4  ;;  %s766_s9 = int_to_ptr.vmem [resolvable:$true] %s765_s9  ;;  %s6814_s11 = int_to_ptr.vmem [resolvable:$true] %s789_s11 }
 0x1a4   : > { %s6108_s8 = scalar_lea.hbm %s7414_s16, 1024 }
 0x1a5   : > { %p6109_p13 = scmp.ne.s32.totalorder %s7414_s16, %s6108_s8  ;;  %p6115_p0 = scmp.lt.u32.totalorder %s6108_s8, %s7414_s16 }
 0x1a7   : > { %p6111_p2 = pnand %p6109_p13, %p6457_p7 }
 0x1a9   : > { %p6112_p3 = pneg %p6111_p2 }
 0x1ab   : > { %p6117_p1 = pnand %p6115_p0, %p6112_p3 }
 0x1ad   : > { %6120 = shalt.err (!%p6117_p1)
}
 0x1ae   : > { %s6121_s28 = scalar_lea.vmem %s766_s9, 1024  ;;  %p6129_p9 = scmp.lt.s32.totalorder %s766_s9, %s766_s9 }
 0x1af   : > { %p6122_p4 = scmp.ne.s32.totalorder %s766_s9, %s6121_s28  ;;  %p6130_p10 = scmp.lt.s32.totalorder %s6121_s28, %s6121_s28 }
 0x1b1   : > { %p6124_p6 = pnand %p6122_p4, %p6457_p7  ;;  %p6131_p11 = por %p6130_p10, %p6129_p9 }
 0x1b3   : > { %p6125_p8 = pneg %p6124_p6 }
 0x1b5   : > { %p6132_p12 = pnand %p6131_p11, %p6125_p8 }
 0x1b7   : > { %6135 = shalt.err (!%p6132_p12)
}
 0x1b8   : > { %5248 = dma.hbm_to_vmem [thread:$0]  (!%p6443_p5), %s7414_s16, 1024, %s766_s9, [#allocation20], %s7472_s5, %s7472_s5, %s7471_s25  }
 0x1b9   : > { %s6136_s8 = scalar_lea.hbm %s7416_s18, 2048 }
 0x1ba   : > { %p6137_p13 = scmp.ne.s32.totalorder %s7416_s18, %s6136_s8  ;;  %p6143_p0 = scmp.lt.u32.totalorder %s6136_s8, %s7416_s18 }
 0x1bc   : > { %p6139_p2 = pnand %p6137_p13, %p6457_p7 }
 0x1be   : > { %p6140_p3 = pneg %p6139_p2 }
 0x1c0   : > { %p6145_p1 = pnand %p6143_p0, %p6140_p3 }
 0x1c2   : > { %6148 = shalt.err (!%p6145_p1)
}
 0x1c3   : > { %s6149_s9 = scalar_lea.vmem %s6814_s11, 2048  ;;  %p6157_p9 = scmp.lt.s32.totalorder %s6814_s11, %s6814_s11 }
 0x1c4   : > { %p6150_p4 = scmp.ne.s32.totalorder %s6814_s11, %s6149_s9  ;;  %p6158_p10 = scmp.lt.s32.totalorder %s6149_s9, %s6149_s9 }
 0x1c6   : > { %p6152_p6 = pnand %p6150_p4, %p6457_p7  ;;  %p6159_p11 = por %p6158_p10, %p6157_p9 }
 0x1c8   : > { %p6153_p8 = pneg %p6152_p6 }
 0x1ca   : > { %p6160_p12 = pnand %p6159_p11, %p6153_p8 }
 0x1cc   : > { %6163 = shalt.err (!%p6160_p12)
}
 0x1cd   : > { %5254 = dma.hbm_to_vmem [thread:$0]  (!%p6443_p5), %s7416_s18, 2048, %s6814_s11, [#allocation23], %s7476_s30, %s7476_s30, %s7475_s3  }
 0x1ce   : > { %s6289_s22 = smov [#allocation27]   ;;  %s6290_s6 = smov [#allocation30]  }
 0x1cf   : > { %s815_s29 = sshll.u32 %s6289_s22, 4  ;;  %s839_s8 = sshll.u32 %s6290_s6, 4  ;;  %s816_s29 = int_to_ptr.vmem [resolvable:$true] %s815_s29  ;;  %s6863_s8 = int_to_ptr.vmem [resolvable:$true] %s839_s8 }
 0x1d0   : > { %s6164_s15 = scalar_lea.hbm %s7418_s20, 2048 }
 0x1d1   : > { %p6165_p13 = scmp.ne.s32.totalorder %s7418_s20, %s6164_s15  ;;  %p6171_p0 = scmp.lt.u32.totalorder %s6164_s15, %s7418_s20 }
 0x1d3   : > { %p6167_p2 = pnand %p6165_p13, %p6457_p7 }
 0x1d5   : > { %p6168_p3 = pneg %p6167_p2 }
 0x1d7   : > { %p6173_p1 = pnand %p6171_p0, %p6168_p3 }
 0x1d9   : > { %6176 = shalt.err (!%p6173_p1)
}
 0x1da   : > { %s6177_s7 = scalar_lea.vmem %s816_s29, 2048  ;;  %p6185_p9 = scmp.lt.s32.totalorder %s816_s29, %s816_s29 }
 0x1db   : > { %p6178_p4 = scmp.ne.s32.totalorder %s816_s29, %s6177_s7  ;;  %p6186_p10 = scmp.lt.s32.totalorder %s6177_s7, %s6177_s7 }
 0x1dd   : > { %p6180_p6 = pnand %p6178_p4, %p6457_p7  ;;  %p6187_p11 = por %p6186_p10, %p6185_p9 }
 0x1df   : > { %p6181_p8 = pneg %p6180_p6 }
 0x1e1   : > { %p6188_p12 = pnand %p6187_p11, %p6181_p8 }
 0x1e3   : > { %6191 = shalt.err (!%p6188_p12)
}
 0x1e4   : > { %5260 = dma.hbm_to_vmem [thread:$0]  (!%p6443_p5), %s7418_s20, 2048, %s816_s29, [#allocation26], %s7472_s5, %s7472_s5, %s7471_s25  }
 0x1e5   : > { %s7480_s15 = sld [smem:[#allocation57_spill]] }
 0x1eb   : > { %s6192_s27 = scalar_lea.hbm %s7480_s15, 2048 }
 0x1ec   : > { %p6193_p13 = scmp.ne.s32.totalorder %s7480_s15, %s6192_s27  ;;  %p6199_p0 = scmp.lt.u32.totalorder %s6192_s27, %s7480_s15 }
 0x1ee   : > { %p6195_p2 = pnand %p6193_p13, %p6457_p7 }
 0x1f0   : > { %p6196_p3 = pneg %p6195_p2 }
 0x1f2   : > { %p6201_p1 = pnand %p6199_p0, %p6196_p3 }
 0x1f4   : > { %6204 = shalt.err (!%p6201_p1)
}
 0x1f5   : > { %s6205_s25 = scalar_lea.vmem %s6863_s8, 2048  ;;  %p6213_p9 = scmp.lt.s32.totalorder %s6863_s8, %s6863_s8 }
 0x1f6   : > { %p6206_p4 = scmp.ne.s32.totalorder %s6863_s8, %s6205_s25  ;;  %p6214_p10 = scmp.lt.s32.totalorder %s6205_s25, %s6205_s25 }
 0x1f8   : > { %p6208_p6 = pnand %p6206_p4, %p6457_p7  ;;  %p6215_p11 = por %p6214_p10, %p6213_p9 }
 0x1fa   : > { %p6209_p8 = pneg %p6208_p6 }
 0x1fc   : > { %p6216_p12 = pnand %p6215_p11, %p6209_p8 }
 0x1fe   : > { %6219 = shalt.err (!%p6216_p12)
}
 0x1ff   : > { %5266 = dma.hbm_to_vmem [thread:$0]  (!%p6443_p5), %s7480_s15, 2048, %s6863_s8, [#allocation29], %s7476_s30, %s7476_s30, %s7475_s3  }
 0x200   : > { %s7481_s22 = sld [smem:[#allocation43_spill]] }
 0x206   : > { %p7482_p13 = scmp.ne.s32.totalorder %s7481_s22, 0 }
 0x207   : > { %s7483_s2 = sld [smem:[#allocation42_spill]] (!%p7482_p13) }
 0x208   : > { %877 = sbr.rel (%p7482_p13) target bundleno = 7455 (0x1d1f), region = 112 }
 0x20d   : > { %p7484_p7 = scmp.eq.s32.totalorder (!%p7482_p13), %s7483_s2, 0 }
 0x20f   : > { %6225 = dma.done.wait (%p7484_p7), [#allocation3], 16   ;;  %p7485_p2 = pmov %p7484_p7 }
 0x211   : > { %6227 = vsyncadd (%p7485_p2), [#allocation3], 4294967280  ;;  %p7486_p3 = pmov %p7485_p2 }
 0x212   : > { %p7487_p0 = pmov %p7485_p2 }
 0x213   : > { %6229 = dma.done.wait (%p7486_p3), [#allocation5], 2048  }
 0x214   : > { %6231 = vsyncadd (%p7487_p0), [#allocation5], 4294965248  ;;  %p7488_p1 = pmov %p7487_p0 }
 0x215   : > { %p7489_p5 = pmov %p7487_p0 }
 0x216   : > { %6233 = dma.done.wait (%p7488_p1), [#allocation8], 1040  }
 0x217   : > { %6235 = vsyncadd (%p7489_p5), [#allocation8], 4294966256  ;;  %p7490_p4 = pmov %p7487_p0 }
 0x218   : > { %p7491_p6 = pmov %p7487_p0 }
 0x219   : > { %6237 = dma.done.wait (%p7490_p4), [#allocation11], 4096  }
 0x21a   : > { %6239 = vsyncadd (%p7491_p6), [#allocation11], 4294963200  ;;  %p7492_p8 = pmov %p7487_p0 }
 0x21b   : > { %p7493_p9 = pmov %p7487_p0 }
 0x21c   : > { %6241 = dma.done.wait (%p7492_p8), [#allocation14], 2064  }
 0x21d   : > { %6243 = vsyncadd (%p7493_p9), [#allocation14], 4294965232  ;;  %p7494_p10 = pmov %p7487_p0 }
 0x21e   : > { %p7495_p11 = pmov %p7487_p0 }
 0x21f   : > { %6245 = dma.done.wait (%p7494_p10), [#allocation17], 2048  }
 0x220   : > { %6247 = vsyncadd (%p7495_p11), [#allocation17], 4294965248  ;;  %p7496_p12 = pmov %p7487_p0 }
 0x221   : > { %p7497_p13 = pmov %p7487_p0 }
 0x222   : > { %6249 = dma.done.wait (%p7496_p12), [#allocation20], 2048  }
 0x223   : > { %6251 = vsyncadd (%p7497_p13), [#allocation20], 4294965248  ;;  %p7498_p7 = pmov %p7487_p0 }
 0x224   : > { %p7499_p2 = pmov %p7487_p0 }
 0x225   : > { %6253 = dma.done.wait (%p7498_p7), [#allocation23], 2064  }
 0x226   : > { %6255 = vsyncadd (%p7499_p2), [#allocation23], 4294965232  ;;  %p7500_p3 = pmov %p7487_p0 }
 0x228   : > { %6257 = dma.done.wait (%p7500_p3), [#allocation26], 4096  }
 0x229   : > { %6259 = vsyncadd (%p7487_p0), [#allocation26], 4294963200  ;;  %p7501_p1 = pmov %p7487_p0 }
 0x22a   : > { %p7502_p5 = pmov %p7487_p0 }
 0x22b   : > { %6261 = dma.done.wait (%p7501_p1), [#allocation29], 2064  }
 0x22c   : > { %6263 = vsyncadd (%p7502_p5), [#allocation29], 4294965232  ;;  %p1024_p4 = scmp.lt.s32.totalorder %s7483_s2, 1  ;;  %v6291_v0 = vmov 0.0   ;;  %s7503_s8 = sld [smem:[#allocation44_spill]]  ;;  %v5343_v5 = vld [vmem:[#allocation4] sm:$0xff]   ;;  %v1044_v43 = vlaneseq }
 0x22d   : > { %4877 = vmatprep.subr.bf16.mxu0 %v6291_v0  ;;  %4897 = vmatprep.subr.bf16.mxu1 %v6291_v0  ;;  %s7504_s27 = sld [smem:[#allocation48_spill]]  ;;  %v5345_v8 = vld [vmem:[#allocation4 + $0x8] sm:$0xff]   ;;  %v5347_v10 = vld [vmem:[#allocation4 + $0x10] sm:$0xff]   ;;  %v5349_v12 = vld [vmem:[#allocation4 + $0x18] sm:$0xff]   ;;  %vm6292_vm0 = vmmov 0   ;;  %s7505_s7 = sld [smem:[#allocation45_spill]] }
 0x22e   : > { %s7511_s2 = smov (!%p1024_p4, %s7483_s2), 1  ;;  %4898 = vmatpush3.bf16.msra.mxu1 %v5343_v5  ;;  %v5351_v14 = vld [vmem:[#allocation4 + $0x20] sm:$0xff]   ;;  %4893 = vmatprep.mubr.msk.bf16.mxu0 %vm6292_vm0, %v6291_v0  ;;  %v5353_v16 = vld [vmem:[#allocation4 + $0x28] sm:$0xff]   ;;  %v5355_v18 = vld [vmem:[#allocation4 + $0x30] sm:$0xff]   ;;  %v7038_v44 = vand.u32 127, %v1044_v43  ;;  %vm1475_vm15 = vcmask 130048  }
 0x22f   : > { %s4727_s0 = sshll.u32 %s7511_s2, 4  ;;  %4899 = vmatprep.subr.bf16.mxu1 %v6291_v0  ;;  %4913 = vmatprep.mubr.msk.bf16.mxu1 %vm6292_vm0, %v6291_v0  ;;  %v5357_v20 = vld [vmem:[#allocation4 + $0x38] sm:$0xff]   ;;  %v5358_v34 = vld [vmem:[#allocation6] sm:$0xff]   ;;  %v5359_v36 = vld [vmem:[#allocation6 + $0x8] sm:$0xff]   ;;  %s7506_s29 = sld [smem:[#allocation46_spill]] }
 0x230   : > { %v4526_v30 = vld [vmem:[#allocation2] ss:$0 sm:$0xff]  ;;  %v5360_v37 = vld [vmem:[#allocation6 + $0x10] sm:$0xff]   ;;  %v5362_v39 = vld [vmem:[#allocation6 + $0x20] sm:$0xff]   ;;  %vm1051_vm1 = vcmp.ge.s32.totalorder %v7038_v44, 32  ;;  %vm1052_vm2 = vcmp.lt.s32.totalorder %v7038_v44, 64 }
 0x231   : > { %v5361_v38 = vld [vmem:[#allocation6 + $0x18] sm:$0xff]   ;;  %v5363_v40 = vld [vmem:[#allocation6 + $0x28] sm:$0xff]   ;;  %v5364_v41 = vld [vmem:[#allocation6 + $0x30] sm:$0xff]   ;;  %vm1056_vm3 = vcmp.ge.s32.totalorder %v7038_v44, 64  ;;  %vm1057_vm4 = vcmp.lt.s32.totalorder %v7038_v44, 96  ;;  %vm1047_vm6 = vcmp.lt.s32.totalorder %v7038_v44, 32 }
 0x232   : > { %s6966_s6 = scalar_lea.vmem %s7503_s8, %s4727_s0  ;;  %4900 = vmatpush3.bf16.msra.mxu1 %v5345_v8  ;;  %v5365_v42 = vld [vmem:[#allocation6 + $0x38] sm:$0xff]   ;;  %vm1053_vm5 = vmand %vm1051_vm1, %vm1052_vm2  ;;  %vm1061_vm8 = vcmp.ge.s32.totalorder %v7038_v44, 96  ;;  %v7047_v45 = vsel %vm1047_vm6, 1.0, %v6291_v0  ;;  %vm4177_vm6 = vcmask 7168   ;;  %s7507_s30 = sld [smem:[#allocation59_spill]] }
 0x233   : > { %v6969_v1 = vld [vmem:[%s6966_s6] sm:$0xff]  ;;  %v6972_v2 = vld [vmem:[%s6966_s6 + $0x8] sm:$0xff]  ;;  %4901 = vmatprep.subr.bf16.mxu1 %v6291_v0  ;;  %v5346_v9 = vld [vmem:[%s7504_s27 + $0x10] sm:$0xff]   ;;  %v7050_v46 = vsel %vm1053_vm5, 1.0, %v6291_v0  ;;  %v7056_v48 = vsel %vm1061_vm8, 1.0, %v6291_v0  ;;  %s1031_s25 = scalar_lea.vmem %s7505_s7, %s7511_s2  ;;  %s7508_s9 = sld [smem:[#allocation58_spill]] }
 0x234   : > { %v1086_v3 = vmul.f32 %v6969_v1, %v6969_v1  ;;  %v5342_v4 = vld [vmem:[%s7504_s27] sm:$0xff]   ;;  %v1087_v6 = vmul.f32 %v6972_v2, %v6972_v2  ;;  %v5344_v7 = vld [vmem:[%s7504_s27 + $0x8] sm:$0xff]   ;;  %v5348_v11 = vld [vmem:[%s7504_s27 + $0x18] sm:$0xff]  }
 0x235   : > { %4878 = vmatpush3.bf16.msra.mxu0 %v5342_v4  ;;  %v5350_v13 = vld [vmem:[%s7504_s27 + $0x20] sm:$0xff]   ;;  %v5352_v15 = vld [vmem:[%s7504_s27 + $0x28] sm:$0xff]   ;;  %v5354_v17 = vld [vmem:[%s7504_s27 + $0x30] sm:$0xff]   ;;  %s1036_s22 = scalar_lea.vmem %s7506_s29, %s4727_s0 }
 0x236   : > { %1088 = vadd.xlane.f32.xlu0 %v1086_v3  ;;  %4879 = vmatprep.subr.bf16.mxu0 %v6291_v0  ;;  %v5356_v19 = vld [vmem:[%s7504_s27 + $0x38] sm:$0xff]   ;;  %vm1058_vm7 = vmand %vm1056_vm3, %vm1057_vm4 }
 0x237   : > { %4902 = vmatpush3.bf16.msra.mxu1 %v5347_v10  ;;  %v7053_v47 = vsel %vm1058_vm7, 1.0, %v6291_v0  ;;  %vm4196_vm7 = vcmask 0  }
 0x238   : > { %4903 = vmatprep.subr.bf16.mxu1 %v6291_v0  ;;  %s1042_s8 = scalar_lea.vmem %s7507_s30, %s7511_s2 }
 0x239   : > { %4880 = vmatpush3.bf16.msra.mxu0 %v5344_v7  ;;  %s1039_s28 = scalar_lea.vmem %s7508_s9, %s7511_s2 }
 0x23a   : > { %1090 = vadd.xlane.f32.xlu0 %v1087_v6  ;;  %4881 = vmatprep.subr.bf16.mxu0 %v6291_v0 }
 0x23b   : > { %4904 = vmatpush3.bf16.msra.mxu1 %v5349_v12  ;;  %v6293_v12 = vmov 0  }
 0x23c   : > { %4905 = vmatprep.subr.bf16.mxu1 %v6291_v0  ;;  %5341 = vset.pattern.permute.xlu1 %v6293_v12 }
 0x23d   : > { %4882 = vmatpush3.bf16.msra.mxu0 %v5346_v9  ;;  %5340 = vset.pattern.permute.xlu0 %v6293_v12 }
 0x23e   : > { %4883 = vmatprep.subr.bf16.mxu0 %v6291_v0 }
 0x23f   : > { %4906 = vmatpush3.bf16.msra.mxu1 %v5351_v14  ;;  %v1067_v14 = vshrl.u32 %v1044_v43, 7 }
 0x240   : > { %4907 = vmatprep.subr.bf16.mxu1 %v6291_v0 }
 0x241   : > { %4884 = vmatpush3.bf16.msra.mxu0 %v5348_v11  ;;  %vm1069_vm10 = vcmp.le.s32.totalorder %v7038_v44, %v1067_v14 }
 0x242   : > { %4885 = vmatprep.subr.bf16.mxu0 %v6291_v0 }
 0x243   : > { %4908 = vmatpush3.bf16.msra.mxu1 %v5353_v16 }
 0x244   : > { %4909 = vmatprep.subr.bf16.mxu1 %v6291_v0 }
 0x245   : > { %4886 = vmatpush3.bf16.msra.mxu0 %v5350_v13  ;;  %v1071_v13 = vld [vmem:[%s1031_s25] sm:$0x1] }
 0x246   : > { %4887 = vmatprep.subr.bf16.mxu0 %v6291_v0  ;;  %vm1072_vm9 = vcmp.gt.s32.totalorder %v1071_v13, 0 }
 0x247   : > { %4910 = vmatpush3.bf16.msra.mxu1 %v5355_v18  ;;  %v1073_v16 = vsel %vm1072_vm9, 1, %v6293_v12  ;;  %v1068_v18 = vadd.s32 8, %v1067_v14 }
 0x248   : > { %4911 = vmatprep.subr.bf16.mxu1 %v6291_v0 }
 0x249   : > { %4888 = vmatpush3.bf16.msra.mxu0 %v5352_v15  ;;  %v1076_v15 = vsub.s32 0, %v1067_v14  ;;  %vm1070_vm12 = vcmp.le.s32.totalorder %v7038_v44, %v1068_v18 }
 0x24a   : > { %4889 = vmatprep.subr.bf16.mxu0 %v6291_v0 }
 0x24b   : > { %4912 = vmatpush3.bf16.msra.mxu1 %v5357_v20  ;;  %v6294_v20 = vmov -1e+30  }
 0x24c   : > { %4937 = vmatprep.subr.bf16.mxu1 %v6291_v0 }
 0x24d   : > { %4890 = vmatpush3.bf16.msra.mxu0 %v5354_v17  ;;  %v1077_v17 = vrot.slane %v1073_v16, %v1076_v15 }
 0x24e   : > { %4891 = vmatprep.subr.bf16.mxu0 %v6291_v0 }
 0x24f   : > { %vm1078_vm11 = vcmp.eq.s32.totalorder %v1077_v17, 1 }
 0x250   : > { %vm1079_vm13 = vmand %vm1069_vm10, %vm1078_vm11 }
 0x251   : > { %4892 = vmatpush3.bf16.msra.mxu0 %v5356_v19  ;;  %vm1080_vm14 = vmand %vm1070_vm12, %vm1078_vm11 }
 0x252   : > { %4917 = vmatprep.subr.bf16.mxu0 %v6291_v0 }
 0x2c3   : > { %v1089_v21 = vpop.xlane.xlu0 %1088 }
 0x2c4   : > { %v1093_v22 = vmul.f32 0.0078125, %v1089_v21  ;;  %v7103_v21 = vsel %vm1079_vm13, 0.0, %v6294_v20 }
 0x2c6   : > { %v1095_v23 = vadd.f32 1e-06, %v1093_v22 }
 0x2c7   : > { %v1091_v24 = vpop.xlane.xlu0 %1090 }
 0x2c8   : > { %5558 = vrsqrt.f32 %v1095_v23  ;;  %v1094_v25 = vmul.f32 0.0078125, %v1091_v24 }
 0x2ca   : > { %v1096_v26 = vadd.f32 1e-06, %v1094_v25  ;;  %v7105_v25 = vsel %vm1080_vm14, 0.0, %v6294_v20 }
 0x2cc   : > { %5560 = vrsqrt.f32 %v1096_v26 }
 0x2d2   : > { %v5559_v27 = vpop.eup %5558 }
 0x2d3   : > { %v1099_v28 = vmul.f32 %v5559_v27, %v6969_v1 }
 0x2d5   : > { %v1107_v32 = vmul.f32 %v4526_v30, %v1099_v28 }
 0x2d6   : > { %v5561_v29 = vpop.eup %5560 }
 0x2d7   : > { %v1100_v31 = vmul.f32 %v5561_v29, %v6972_v2 }
 0x2d9   : > { %v1108_v33 = vmul.f32 %v4526_v30, %v1100_v31 }
 0x2db   : > { %v1109_v35 = vpack.c.bf16 %v1108_v33, %v1107_v32 }
 0x2dd   : > { %4894 = vmatmul.mubr.bf16.vlgmr.msra.gmra.mrb[0].mxu0 %v1109_v35  ;;  %4914 = vmatmul.mubr.bf16.vlgmr.msra.gmra.mrb[0].mxu1 %v1109_v35 }
 0x2de   : > { %4918 = vmatpush3.bf16.msra.mxu0 %v5358_v34  ;;  %4933 = vmatprep.mubr.msk.bf16.mxu0 %vm6292_vm0, %v6291_v0 }
 0x2df   : > { %4919 = vmatprep.subr.bf16.mxu0 %v6291_v0  ;;  %4939 = vmatprep.mubr.msk.bf16.mxu1 %vm6292_vm0, %v6291_v0 }
 0x2e2   : > { %4920 = vmatpush3.bf16.msra.mxu0 %v5359_v36 }
 0x2e3   : > { %4921 = vmatprep.subr.bf16.mxu0 %v6291_v0 }
 0x2e6   : > { %4922 = vmatpush3.bf16.msra.mxu0 %v5360_v37 }
 0x2e7   : > { %4923 = vmatprep.subr.bf16.mxu0 %v6291_v0 }
 0x2ea   : > { %4924 = vmatpush3.bf16.msra.mxu0 %v5361_v38 }
 0x2eb   : > { %4925 = vmatprep.subr.bf16.mxu0 %v6291_v0 }
 0x2ee   : > { %4926 = vmatpush3.bf16.msra.mxu0 %v5362_v39 }
 0x2ef   : > { %4927 = vmatprep.subr.bf16.mxu0 %v6291_v0 }
 0x2f2   : > { %4928 = vmatpush3.bf16.msra.mxu0 %v5363_v40 }
 0x2f3   : > { %4929 = vmatprep.subr.bf16.mxu0 %v6291_v0 }
 0x2f6   : > { %4930 = vmatpush3.bf16.msra.mxu0 %v5364_v41 }
 0x2f7   : > { %4931 = vmatprep.subr.bf16.mxu0 %v6291_v0 }
 0x2fa   : > { %4932 = vmatpush3.bf16.msra.mxu0 %v5365_v42 }
 0x2fb   : > { %4985 = vmatprep.subr.bf16.mxu0 %v6291_v0 }
 0x2fd   : > { %4934 = vmatmul.mubr.bf16.vlgmr.msra.gmra.mrb[4].mxu0 %v1109_v35 }
 0x2fe   : > { %5001 = vmatprep.mubr.msk.bf16.mxu0 %vm6292_vm0, %v6291_v0 }
 0x3b0   : > { %v1208_v49 = vpop.f32.mrb[0].mxu0  ;;  %v1313_v50 = vpop.f32.mrb[0].mxu1 }
 0x3b1   : > { %v4895_v51 = vpop.f32.mrb[1].mxu0  ;;  %v4915_v52 = vpop.f32.mrb[1].mxu1  ;;  %v1427_v53 = vmul.f32 %v7047_v45, %v1208_v49  ;;  %v7060_v54 = vmul.f32 %v7050_v46, %v1208_v49  ;;  %v7063_v55 = vmul.f32 %v7053_v47, %v1208_v49  ;;  %v7066_v56 = vmul.f32 %v7056_v48, %v1208_v49 }
 0x3b2   : > { %v1211_v57 = vpop.f32.mrb[2].mxu0  ;;  %v1316_v58 = vpop.f32.mrb[2].mxu1 }
 0x3b3   : > { %v1428_v59 = vmul.f32 %v7047_v45, %v1211_v57  ;;  %v7070_v60 = vmul.f32 %v7050_v46, %v1211_v57  ;;  %v7073_v61 = vmul.f32 %v7053_v47, %v1211_v57  ;;  %v7076_v62 = vmul.f32 %v7056_v48, %v1211_v57  ;;  %v4896_v63 = vpop.f32.mrb[3].mxu0  ;;  %v4916_v1 = vpop.f32.mrb[3].mxu1 }
 0x3b4   : > { %v7078_v2 = vpack.c.bf16 %v1316_v58, %v1313_v50 }
 0x3b5   : > { %v1429_v3 = vpack.c.bf16 %v1428_v59, %v1427_v53  ;;  %v1549_v4 = vpack.c.bf16 %v7070_v60, %v7060_v54  ;;  %v1668_v5 = vpack.c.bf16 %v7073_v61, %v7063_v55  ;;  %v1787_v6 = vpack.c.bf16 %v7076_v62, %v7066_v56 }
 0x3b6   : > { %4938 = vmatpush3.bf16.xpose.msra.mxu1 %v7078_v2 }
 0x3b7   : > { %4943 = vmatprep.subr.bf16.mxu1 %v6291_v0 }
 0x3bd   : > { %4940 = vmatmul.mubr.bf16.vlgmr.msra.gmra.mrb[4].mxu1 %v1429_v3 }
 0x3be   : > { %4945 = vmatprep.mubr.msk.bf16.mxu1 %vm6292_vm0, %v6291_v0 }
 0x3d0   : > { %v1418_v7 = vpop.f32.mrb[4].mxu0 }
 0x3d1   : > { %v4935_v8 = vpop.f32.mrb[5].mxu0 }
 0x3d2   : > { %v1421_v9 = vpop.f32.mrb[6].mxu0 }
 0x3d3   : > { %v7090_v10 = vpack.c.bf16 %v1421_v9, %v1418_v7  ;;  %v4936_v11 = vpop.f32.mrb[7].mxu0 }
 0x3d5   : > { %4944 = vmatpush3.bf16.msra.mxu1 %v7090_v10 }
 0x3d6   : > { %4949 = vmatprep.subr.bf16.mxu1 %v6291_v0 }
 0x490   : > { %v1464_v19 = vpop.f32.mrb[4].mxu1 }
 0x491   : > { %v1471_v22 = vmul.f32 0.17677669, %v1464_v19  ;;  %v4941_v23 = vpop.f32.mrb[5].mxu1 }
 0x492   : > { %v1467_v24 = vpop.f32.mrb[6].mxu1 }
 0x493   : > { %v1472_v26 = vmul.f32 0.17677669, %v1467_v24  ;;  %v4942_v27 = vpop.f32.mrb[7].mxu1  ;;  %v1473_v28 = vadd.f32 %v1471_v22, %v7103_v21 }
 0x495   : > { %v1476_v29 = vsel %vm1475_vm15, %v1473_v28, -inf  ;;  %v1474_v30 = vadd.f32 %v1472_v26, %v7105_v25 }
 0x496   : > { %1477 = vmax.xlane.f32.xlu1 %v1476_v29 }
 0x497   : > { %v1479_v31 = vsel %vm1475_vm15, %v1474_v30, -inf }
 0x49a   : > { %1480 = vmax.xlane.f32.xlu1 %v1479_v31 }
 0x523   : > { %v1478_v32 = vpop.xlane.xlu1 %1477 }
 0x524   : > { %v1482_v33 = vsub.f32 %v1473_v28, %v1478_v32 }
 0x526   : > { %v1484_v34 = vmul.f32 1.442695, %v1482_v33 }
 0x527   : > { %v1481_v35 = vpop.xlane.xlu1 %1480 }
 0x528   : > { %5562 = vpow2.f32 %v1484_v34  ;;  %v1483_v36 = vsub.f32 %v1474_v30, %v1481_v35 }
 0x52a   : > { %v1486_v37 = vmul.f32 1.442695, %v1483_v36 }
 0x52c   : > { %5564 = vpow2.f32 %v1486_v37 }
 0x532   : > { %v5563_v38 = vpop.eup %5562 }
 0x533   : > { %v1488_v39 = vsel %vm1475_vm15, %v5563_v38, 0.0 }
 0x534   : > { %1489 = vadd.xlane.f32.xlu0 %v1488_v39 }
 0x536   : > { %v5565_v40 = vpop.eup %5564 }
 0x537   : > { %v1491_v41 = vsel %vm1475_vm15, %v5565_v40, 0.0 }
 0x538   : > { %1492 = vadd.xlane.f32.xlu1 %v1491_v41 }
 0x5c1   : > { %v1490_v42 = vpop.xlane.xlu0 %1489 }
 0x5c2   : > { %5566 = vrcp.f32 %v1490_v42 }
 0x5c5   : > { %v1493_v43 = vpop.xlane.xlu1 %1492 }
 0x5c6   : > { %5568 = vrcp.f32 %v1493_v43 }
 0x5cc   : > { %v5567_v49 = vpop.eup %5566 }
 0x5cd   : > { %v1495_v51 = vmul.f32 %v5567_v49, %v5563_v38 }
 0x5d0   : > { %v5569_v50 = vpop.eup %5568 }
 0x5d1   : > { %v1497_v52 = vmul.f32 %v5569_v50, %v5565_v40 }
 0x5d3   : > { %v1498_v53 = vpack.c.bf16 %v1497_v52, %v1495_v51 }
 0x5d5   : > { %4946 = vmatmul.mubr.msk.bf16.vlgmr.msra.gmra.mrb[8].mxu1 %vm1475_vm15, %v1498_v53 }
 0x5d6   : > { %4950 = vmatpush3.bf16.xpose.msra.mxu1 %v7078_v2  ;;  %4951 = vmatprep.mubr.msk.bf16.mxu1 %vm6292_vm0, %v6291_v0 }
 0x5d7   : > { %4955 = vmatprep.subr.bf16.mxu1 %v6291_v0 }
 0x5dd   : > { %4952 = vmatmul.mubr.bf16.vlgmr.msra.gmra.mrb[12].mxu1 %v1549_v4 }
 0x5de   : > { %4956 = vmatpush3.bf16.msra.mxu1 %v7090_v10  ;;  %4957 = vmatprep.mubr.msk.bf16.mxu1 %vm6292_vm0, %v6291_v0 }
 0x5df   : > { %4961 = vmatprep.subr.bf16.mxu1 %v6291_v0 }
 0x6a8   : > { %v1536_v57 = vpop.f32.mrb[8].mxu1 }
 0x6a9   : > { %v4947_v58 = vpop.f32.mrb[9].mxu1  ;;  %v1543_v34 = vmul.f32 %v7047_v45, %v1536_v57 }
 0x6aa   : > { %v1539_v59 = vpop.f32.mrb[10].mxu1 }
 0x6ab   : > { %v4948_v63 = vpop.f32.mrb[11].mxu1  ;;  %v1544_v38 = vmul.f32 %v7047_v45, %v1539_v59 }
 0x6b0   : > { %v1584_v1 = vpop.f32.mrb[12].mxu1 }
 0x6b1   : > { %v1591_v3 = vmul.f32 0.17677669, %v1584_v1  ;;  %v4953_v7 = vpop.f32.mrb[13].mxu1 }
 0x6b2   : > { %v1587_v8 = vpop.f32.mrb[14].mxu1 }
 0x6b3   : > { %v1592_v9 = vmul.f32 0.17677669, %v1587_v8  ;;  %v4954_v11 = vpop.f32.mrb[15].mxu1  ;;  %v1593_v54 = vadd.f32 %v1591_v3, %v7103_v21 }
 0x6b5   : > { %v1595_v60 = vsel %vm1475_vm15, %v1593_v54, -inf  ;;  %v1594_v4 = vadd.f32 %v1592_v9, %v7105_v25 }
 0x6b6   : > { %1596 = vmax.xlane.f32.xlu0 %v1595_v60 }
 0x6b7   : > { %v1598_v13 = vsel %vm1475_vm15, %v1594_v4, -inf }
 0x6b8   : > { %1599 = vmax.xlane.f32.xlu1 %v1598_v13 }
 0x743   : > { %v1597_v14 = vpop.xlane.xlu0 %1596 }
 0x744   : > { %v1601_v15 = vsub.f32 %v1593_v54, %v1597_v14 }
 0x745   : > { %v1600_v16 = vpop.xlane.xlu1 %1599 }
 0x746   : > { %v1603_v17 = vmul.f32 1.442695, %v1601_v15  ;;  %v1602_v18 = vsub.f32 %v1594_v4, %v1600_v16 }
 0x748   : > { %5570 = vpow2.f32 %v1603_v17  ;;  %v1605_v19 = vmul.f32 1.442695, %v1602_v18 }
 0x74a   : > { %5572 = vpow2.f32 %v1605_v19 }
 0x752   : > { %v5571_v20 = vpop.eup %5570 }
 0x753   : > { %v1607_v22 = vsel %vm1475_vm15, %v5571_v20, 0.0 }
 0x754   : > { %v5573_v23 = vpop.eup %5572  ;;  %1608 = vadd.xlane.f32.xlu0 %v1607_v22 }
 0x755   : > { %v1610_v24 = vsel %vm1475_vm15, %v5573_v23, 0.0 }
 0x756   : > { %1611 = vadd.xlane.f32.xlu1 %v1610_v24 }
 0x7e1   : > { %v1609_v26 = vpop.xlane.xlu0 %1608 }
 0x7e2   : > { %5574 = vrcp.f32 %v1609_v26 }
 0x7e3   : > { %v1612_v27 = vpop.xlane.xlu1 %1611 }
 0x7e4   : > { %5576 = vrcp.f32 %v1612_v27 }
 0x7ec   : > { %v5575_v28 = vpop.eup %5574 }
 0x7ed   : > { %v1614_v30 = vmul.f32 %v5575_v28, %v5571_v20 }
 0x7ee   : > { %v5577_v29 = vpop.eup %5576 }
 0x7ef   : > { %v1616_v31 = vmul.f32 %v5577_v29, %v5573_v23 }
 0x7f1   : > { %v1617_v32 = vpack.c.bf16 %v1616_v31, %v1614_v30 }
 0x7f3   : > { %4958 = vmatmul.mubr.msk.bf16.vlgmr.msra.gmra.mrb[16].mxu1 %vm1475_vm15, %v1617_v32 }
 0x7f4   : > { %4962 = vmatpush3.bf16.xpose.msra.mxu1 %v7078_v2  ;;  %4963 = vmatprep.mubr.msk.bf16.mxu1 %vm6292_vm0, %v6291_v0 }
 0x7f5   : > { %4967 = vmatprep.subr.bf16.mxu1 %v6291_v0 }
 0x7fb   : > { %4964 = vmatmul.mubr.bf16.vlgmr.msra.gmra.mrb[20].mxu1 %v1668_v5 }
 0x7fc   : > { %4968 = vmatpush3.bf16.msra.mxu1 %v7090_v10  ;;  %4969 = vmatprep.mubr.msk.bf16.mxu1 %vm6292_vm0, %v6291_v0 }
 0x7fd   : > { %4973 = vmatprep.subr.bf16.mxu1 %v6291_v0 }
 0x8c6   : > { %v1655_v33 = vpop.f32.mrb[16].mxu1 }
 0x8c7   : > { %v1662_v35 = vmul.f32 %v7050_v46, %v1655_v33  ;;  %v4959_v36 = vpop.f32.mrb[17].mxu1 }
 0x8c8   : > { %v1658_v37 = vpop.f32.mrb[18].mxu1 }
 0x8c9   : > { %v1664_v39 = vadd.f32 %v1662_v35, %v1543_v34  ;;  %v1663_v55 = vmul.f32 %v7050_v46, %v1658_v37  ;;  %v4960_v61 = vpop.f32.mrb[19].mxu1 }
 0x8cb   : > { %v1665_v5 = vadd.f32 %v1663_v55, %v1544_v38 }
 0x8ce   : > { %v1703_v40 = vpop.f32.mrb[20].mxu1 }
 0x8cf   : > { %v1710_v41 = vmul.f32 0.17677669, %v1703_v40  ;;  %v4965_v42 = vpop.f32.mrb[21].mxu1  ;;  %v5366_v40 = vld [vmem:[#allocation7] sm:$0xff]  }
 0x8d0   : > { %v1706_v43 = vpop.f32.mrb[22].mxu1  ;;  %4986 = vmatpush3.bf16.msra.mxu0 %v5366_v40  ;;  %v5368_v42 = vld [vmem:[#allocation7 + $0x10] sm:$0xff]  }
 0x8d1   : > { %v1711_v49 = vmul.f32 0.17677669, %v1706_v43  ;;  %v4966_v50 = vpop.f32.mrb[23].mxu1  ;;  %v1712_v51 = vadd.f32 %v1710_v41, %v7103_v21  ;;  %v5367_v41 = vld [vmem:[#allocation7 + $0x8] sm:$0xff]   ;;  %4987 = vmatprep.subr.bf16.mxu0 %v6291_v0  ;;  %v5369_v43 = vld [vmem:[#allocation7 + $0x18] sm:$0xff]  }
 0x8d2   : > { %v5371_v50 = vld [vmem:[#allocation7 + $0x28] sm:$0xff]   ;;  %v5409_v40 = vld [vmem:[#allocation12 + $0x54] ss:$8 sps:$4 sm:$0xff]  }
 0x8d3   : > { %v1714_v52 = vsel %vm1475_vm15, %v1712_v51, -inf  ;;  %v1713_v53 = vadd.f32 %v1711_v49, %v7105_v25  ;;  %v5370_v49 = vld [vmem:[#allocation7 + $0x20] sm:$0xff]  }
 0x8d4   : > { %1715 = vmax.xlane.f32.xlu0 %v1714_v52  ;;  %4988 = vmatpush3.bf16.msra.mxu0 %v5367_v41  ;;  %v5404_v41 = vld [vmem:[#allocation10 + $0x50] ss:$8 sps:$4 sm:$0xff]  }
 0x8d5   : > { %v1717_v57 = vsel %vm1475_vm15, %v1713_v53, -inf  ;;  %4989 = vmatprep.subr.bf16.mxu0 %v6291_v0 }
 0x8d6   : > { %1718 = vmax.xlane.f32.xlu1 %v1717_v57 }
 0x8d8   : > { %4990 = vmatpush3.bf16.msra.mxu0 %v5368_v42  ;;  %v5407_v42 = vld [vmem:[#allocation12 + $0x50] ss:$8 sps:$4 sm:$0xff]  }
 0x8d9   : > { %4991 = vmatprep.subr.bf16.mxu0 %v6291_v0 }
 0x8dc   : > { %4992 = vmatpush3.bf16.msra.mxu0 %v5369_v43  ;;  %v5412_v43 = vld [vmem:[#allocation10 + $0x64] ss:$8 sps:$4 sm:$0xff]  }
 0x8dd   : > { %4993 = vmatprep.subr.bf16.mxu0 %v6291_v0 }
 0x8e0   : > { %4994 = vmatpush3.bf16.msra.mxu0 %v5370_v49  ;;  %v5415_v49 = vld [vmem:[#allocation12 + $0x64] ss:$8 sps:$4 sm:$0xff]  }
 0x8e1   : > { %4995 = vmatprep.subr.bf16.mxu0 %v6291_v0 }
 0x8e4   : > { %4996 = vmatpush3.bf16.msra.mxu0 %v5371_v50  ;;  %v5410_v50 = vld [vmem:[#allocation10 + $0x60] ss:$8 sps:$4 sm:$0xff]  }
 0x8e5   : > { %4997 = vmatprep.subr.bf16.mxu0 %v6291_v0 }
 0x961   : > { %v1716_v58 = vpop.xlane.xlu0 %1715 }
 0x962   : > { %v1720_v59 = vsub.f32 %v1712_v51, %v1716_v58 }
 0x963   : > { %v1719_v63 = vpop.xlane.xlu1 %1718 }
 0x964   : > { %v1722_v1 = vmul.f32 1.442695, %v1720_v59  ;;  %v1721_v3 = vsub.f32 %v1713_v53, %v1719_v63 }
 0x966   : > { %5578 = vpow2.f32 %v1722_v1  ;;  %v1724_v7 = vmul.f32 1.442695, %v1721_v3  ;;  %v5372_v1 = vld [vmem:[#allocation7 + $0x30] sm:$0xff]   ;;  %v5373_v3 = vld [vmem:[#allocation7 + $0x38] sm:$0xff]  }
 0x967   : > { %4998 = vmatpush3.bf16.msra.mxu0 %v5372_v1 }
 0x968   : > { %5580 = vpow2.f32 %v1724_v7  ;;  %4999 = vmatprep.subr.bf16.mxu0 %v6291_v0 }
 0x96b   : > { %5000 = vmatpush3.bf16.msra.mxu0 %v5373_v3 }
 0x970   : > { %v5579_v8 = vpop.eup %5578 }
 0x971   : > { %v1726_v9 = vsel %vm1475_vm15, %v5579_v8, 0.0 }
 0x972   : > { %v5581_v11 = vpop.eup %5580  ;;  %1727 = vadd.xlane.f32.xlu0 %v1726_v9 }
 0x973   : > { %v1729_v54 = vsel %vm1475_vm15, %v5581_v11, 0.0 }
 0x974   : > { %1730 = vadd.xlane.f32.xlu1 %v1729_v54 }
 0x9ff   : > { %v1728_v60 = vpop.xlane.xlu0 %1727 }
 0xa00   : > { %5582 = vrcp.f32 %v1728_v60 }
 0xa01   : > { %v1731_v4 = vpop.xlane.xlu1 %1730 }
 0xa02   : > { %5584 = vrcp.f32 %v1731_v4 }
 0xa0a   : > { %v5583_v13 = vpop.eup %5582 }
 0xa0b   : > { %v1733_v15 = vmul.f32 %v5583_v13, %v5579_v8 }
 0xa0c   : > { %v5585_v14 = vpop.eup %5584 }
 0xa0d   : > { %v1735_v16 = vmul.f32 %v5585_v14, %v5581_v11 }
 0xa0f   : > { %v1736_v17 = vpack.c.bf16 %v1735_v16, %v1733_v15  ;;  %v5374_v15 = vld [vmem:[#allocation10] ss:$8 sps:$4 sm:$0xff]   ;;  %v5376_v16 = vld [vmem:[#allocation10 + $0x4] ss:$8 sps:$4 sm:$0xff]  }
 0xa11   : > { %4970 = vmatmul.mubr.msk.bf16.vlgmr.msra.gmra.mrb[24].mxu1 %vm1475_vm15, %v1736_v17  ;;  %v5377_v17 = vld [vmem:[#allocation12] ss:$8 sps:$4 sm:$0xff]  }
 0xa12   : > { %4974 = vmatpush3.bf16.xpose.msra.mxu1 %v7078_v2  ;;  %4975 = vmatprep.mubr.msk.bf16.mxu1 %vm6292_vm0, %v6291_v0 }
 0xa13   : > { %4979 = vmatprep.subr.bf16.mxu1 %v6291_v0 }
 0xa19   : > { %4976 = vmatmul.mubr.bf16.vlgmr.msra.gmra.mrb[28].mxu1 %v1787_v6 }
 0xa1a   : > { %4980 = vmatpush3.bf16.msra.mxu1 %v7090_v10  ;;  %4981 = vmatprep.mubr.msk.bf16.mxu1 %vm6292_vm0, %v6291_v0 }
 0xa1b   : > { %2132 = vmatprep.subr.bf16.mxu1 %v5376_v16  ;;  %v5422_v16 = vld [vmem:[#allocation13 + $0x40] sm:$0xff]  }
 0xae4   : > { %v1774_v18 = vpop.f32.mrb[24].mxu1 }
 0xae5   : > { %v1781_v19 = vmul.f32 %v7053_v47, %v1774_v18  ;;  %v4971_v20 = vpop.f32.mrb[25].mxu1  ;;  %v5379_v18 = vld [vmem:[#allocation12 + $0x4] ss:$8 sps:$4 sm:$0xff]  }
 0xae6   : > { %v1777_v22 = vpop.f32.mrb[26].mxu1  ;;  %v5385_v20 = vld [vmem:[#allocation12 + $0x14] ss:$8 sps:$4 sm:$0xff]   ;;  %2271 = vmatprep.subr.bf16.mxu0 %v5379_v18  ;;  %v5424_v18 = vld [vmem:[#allocation13 + $0x48] sm:$0xff]  }
 0xae7   : > { %v7165_v2 = vadd.f32 %v1781_v19, %v1664_v39  ;;  %v1782_v23 = vmul.f32 %v7053_v47, %v1777_v22  ;;  %v4972_v24 = vpop.f32.mrb[27].mxu1  ;;  %v5382_v19 = vld [vmem:[#allocation10 + $0x14] ss:$8 sps:$4 sm:$0xff]   ;;  %v5380_v22 = vld [vmem:[#allocation10 + $0x10] ss:$8 sps:$4 sm:$0xff]  }
 0xae8   : > { %v5391_v24 = vld [vmem:[#allocation12 + $0x24] ss:$8 sps:$4 sm:$0xff]  }
 0xae9   : > { %v7168_v26 = vadd.f32 %v1782_v23, %v1665_v5  ;;  %v5388_v23 = vld [vmem:[#allocation10 + $0x24] ss:$8 sps:$4 sm:$0xff]  }
 0xaec   : > { %v1822_v27 = vpop.f32.mrb[28].mxu1 }
 0xaed   : > { %v1829_v56 = vmul.f32 0.17677669, %v1822_v27  ;;  %v4977_v62 = vpop.f32.mrb[29].mxu1  ;;  %v5389_v27 = vld [vmem:[#allocation12 + $0x20] ss:$8 sps:$4 sm:$0xff]  }
 0xaee   : > { %v1825_v6 = vpop.f32.mrb[30].mxu1  ;;  %v5686_v62 = vld [vmem:[%s6966_s6] sm:$0xff] }
 0xaef   : > { %v1830_v10 = vmul.f32 0.17677669, %v1825_v6  ;;  %v4978_v28 = vpop.f32.mrb[31].mxu1  ;;  %v1831_v29 = vadd.f32 %v1829_v56, %v7103_v21 }
 0xaf1   : > { %v1833_v30 = vsel %vm1475_vm15, %v1831_v29, -inf  ;;  %v1832_v31 = vadd.f32 %v1830_v10, %v7105_v25 }
 0xaf2   : > { %1834 = vmax.xlane.f32.xlu0 %v1833_v30 }
 0xaf3   : > { %v1836_v32 = vsel %vm1475_vm15, %v1832_v31, -inf }
 0xaf4   : > { %1837 = vmax.xlane.f32.xlu1 %v1836_v32 }
 0xb7f   : > { %v1835_v33 = vpop.xlane.xlu0 %1834 }
 0xb80   : > { %v1839_v34 = vsub.f32 %v1831_v29, %v1835_v33  ;;  %v5687_v29 = vld [vmem:[%s6966_s6 + $0x8] sm:$0xff] }
 0xb81   : > { %v1838_v35 = vpop.xlane.xlu1 %1837 }
 0xb82   : > { %v1841_v36 = vmul.f32 1.442695, %v1839_v34  ;;  %v1840_v37 = vsub.f32 %v1832_v31, %v1838_v35  ;;  %v5394_v34 = vld [vmem:[#allocation10 + $0x34] ss:$8 sps:$4 sm:$0xff]  }
 0xb83   : > { %v5397_v35 = vld [vmem:[#allocation12 + $0x34] ss:$8 sps:$4 sm:$0xff]  }
 0xb84   : > { %5586 = vpow2.f32 %v1841_v36  ;;  %v1843_v38 = vmul.f32 1.442695, %v1840_v37  ;;  %v5392_v36 = vld [vmem:[#allocation10 + $0x30] ss:$8 sps:$4 sm:$0xff]  }
 0xb85   : > { %v5395_v37 = vld [vmem:[#allocation12 + $0x30] ss:$8 sps:$4 sm:$0xff]  }
 0xb86   : > { %5588 = vpow2.f32 %v1843_v38  ;;  %v5398_v38 = vld [vmem:[#allocation10 + $0x40] ss:$8 sps:$4 sm:$0xff]  }
 0xb8e   : > { %v5587_v39 = vpop.eup %5586 }
 0xb8f   : > { %v1845_v55 = vsel %vm1475_vm15, %v5587_v39, 0.0 }
 0xb90   : > { %v5589_v61 = vpop.eup %5588  ;;  %1846 = vadd.xlane.f32.xlu0 %v1845_v55  ;;  %v5401_v55 = vld [vmem:[#allocation12 + $0x40] ss:$8 sps:$4 sm:$0xff]  }
 0xb91   : > { %v1848_v5 = vsel %vm1475_vm15, %v5589_v61, 0.0 }
 0xb92   : > { %1849 = vadd.xlane.f32.xlu1 %v1848_v5  ;;  %v5406_v5 = vld [vmem:[#allocation10 + $0x54] ss:$8 sps:$4 sm:$0xff]  }
 0xc1d   : > { %v1847_v51 = vpop.xlane.xlu0 %1846 }
 0xc1e   : > { %5590 = vrcp.f32 %v1847_v51  ;;  %v5413_v51 = vld [vmem:[#allocation12 + $0x60] ss:$8 sps:$4 sm:$0xff]  }
 0xc1f   : > { %v1850_v52 = vpop.xlane.xlu1 %1849 }
 0xc20   : > { %5592 = vrcp.f32 %v1850_v52  ;;  %v5418_v52 = vld [vmem:[#allocation10 + $0x74] ss:$8 sps:$4 sm:$0xff]  }
 0xc28   : > { %v5591_v53 = vpop.eup %5590 }
 0xc29   : > { %v1852_v58 = vmul.f32 %v5591_v53, %v5587_v39  ;;  %v5400_v39 = vld [vmem:[#allocation10 + $0x44] ss:$8 sps:$4 sm:$0xff]   ;;  %v5421_v53 = vld [vmem:[#allocation12 + $0x74] ss:$8 sps:$4 sm:$0xff]  }
 0xc2a   : > { %v5593_v57 = vpop.eup %5592 }
 0xc2b   : > { %v1854_v59 = vmul.f32 %v5593_v57, %v5589_v61  ;;  %v5403_v61 = vld [vmem:[#allocation12 + $0x44] ss:$8 sps:$4 sm:$0xff]   ;;  %v5416_v57 = vld [vmem:[#allocation10 + $0x70] ss:$8 sps:$4 sm:$0xff]  }
 0xc2d   : > { %v1855_v63 = vpack.c.bf16 %v1854_v59, %v1852_v58  ;;  %v5419_v58 = vld [vmem:[#allocation12 + $0x70] ss:$8 sps:$4 sm:$0xff]  }
 0xc2f   : > { %4982 = vmatmul.mubr.msk.bf16.vlgmr.msra.gmra.mrb[32].mxu1 %vm1475_vm15, %v1855_v63 }
 0xc30   : > { %2164 = vmatprep.mubr.bf16.mxu1 %v6293_v12  ;;  %2133 = vmatpush1.bf16.msra.mxu1 %v5374_v15 }
 0xc31   : > { %2134 = vmatprep.subr.bf16.mxu1 %v5382_v19  ;;  %v5425_v19 = vld [vmem:[#allocation13 + $0x8] sm:$0xff]  }
 0xc34   : > { %2135 = vmatpush1.bf16.msra.mxu1 %v5380_v22  ;;  %v5427_v22 = vld [vmem:[#allocation13 + $0x10] sm:$0xff]  }
 0xc35   : > { %2136 = vmatprep.subr.bf16.mxu1 %v5388_v23  ;;  %v5429_v23 = vld [vmem:[#allocation13 + $0x18] sm:$0xff]  }
 0xd02   : > { %v1893_v7 = vpop.f32.mrb[32].mxu1 }
 0xd03   : > { %v1900_v8 = vmul.f32 %v7056_v48, %v1893_v7  ;;  %v4983_v9 = vpop.f32.mrb[33].mxu1 }
 0xd04   : > { %v1896_v11 = vpop.f32.mrb[34].mxu1 }
 0xd05   : > { %v1902_v54 = vadd.f32 %v1900_v8, %v7165_v2  ;;  %v1901_v60 = vmul.f32 %v7056_v48, %v1896_v11  ;;  %v4984_v4 = vpop.f32.mrb[35].mxu1  ;;  %v5383_v2 = vld [vmem:[#allocation12 + $0x10] ss:$8 sps:$4 sm:$0xff]  }
 0xd07   : > { %v1903_v13 = vadd.f32 %v1901_v60, %v7168_v26  ;;  %v5386_v26 = vld [vmem:[#allocation10 + $0x20] ss:$8 sps:$4 sm:$0xff]   ;;  %v4563_v60 = vld [vmem:[#allocation9] ss:$0 sm:$0xff] }
 0xd08   : > { %2137 = vmatpush1.bf16.msra.mxu1 %v5386_v26  ;;  %v5431_v26 = vld [vmem:[#allocation13 + $0x20] sm:$0xff]  }
 0xd09   : > { %v1904_v14 = vpack.c.bf16 %v1903_v13, %v1902_v54  ;;  %2138 = vmatprep.subr.bf16.mxu1 %v5394_v34 }
 0xd0b   : > { %5002 = vmatmul.mubr.bf16.vlgmr.msra.gmra.mrb[8].mxu0 %v1904_v14 }
 0xd0c   : > { %2303 = vmatprep.mubr.bf16.mxu0 %v6293_v12  ;;  %2272 = vmatpush1.bf16.msra.mxu0 %v5377_v17  ;;  %v5423_v17 = vld [vmem:[#allocation13] sm:$0xff]  }
 0xd0d   : > { %2273 = vmatprep.subr.bf16.mxu0 %v5385_v20  ;;  %2139 = vmatpush1.bf16.msra.mxu1 %v5392_v36  ;;  %v5426_v20 = vld [vmem:[#allocation13 + $0x50] sm:$0xff]  }
 0xd0e   : > { %2140 = vmatprep.subr.bf16.mxu1 %v5400_v39 }
 0xd10   : > { %2274 = vmatpush1.bf16.msra.mxu0 %v5383_v2  ;;  %v5428_v2 = vld [vmem:[#allocation13 + $0x58] sm:$0xff]  }
 0xd11   : > { %2275 = vmatprep.subr.bf16.mxu0 %v5391_v24  ;;  %2141 = vmatpush1.bf16.msra.mxu1 %v5398_v38  ;;  %v5430_v24 = vld [vmem:[#allocation13 + $0x60] sm:$0xff]  }
 0xd12   : > { %2142 = vmatprep.subr.bf16.mxu1 %v5406_v5 }
 0xd14   : > { %2276 = vmatpush1.bf16.msra.mxu0 %v5389_v27  ;;  %v5432_v27 = vld [vmem:[#allocation13 + $0x68] sm:$0xff]  }
 0xd15   : > { %2277 = vmatprep.subr.bf16.mxu0 %v5397_v35  ;;  %2143 = vmatpush1.bf16.msra.mxu1 %v5404_v41 }
 0xd16   : > { %2144 = vmatprep.subr.bf16.mxu1 %v5412_v43 }
 0xd18   : > { %2278 = vmatpush1.bf16.msra.mxu0 %v5395_v37 }
 0xd19   : > { %2279 = vmatprep.subr.bf16.mxu0 %v5403_v61  ;;  %2145 = vmatpush1.bf16.msra.mxu1 %v5410_v50 }
 0xd1a   : > { %2146 = vmatprep.subr.bf16.mxu1 %v5418_v52 }
 0xd1c   : > { %2280 = vmatpush1.bf16.msra.mxu0 %v5401_v55 }
 0xd1d   : > { %2281 = vmatprep.subr.bf16.mxu0 %v5409_v40  ;;  %2147 = vmatpush1.bf16.msra.mxu1 %v5416_v57 }
 0xd1e   : > { %4781 = vmatprep.subr.bf16.mxu1 %v5422_v16  ;;  %v5441_v16 = vld [vmem:[#allocation18 + $0x8] sm:$0xff]  }
 0xd20   : > { %2282 = vmatpush1.bf16.msra.mxu0 %v5407_v42 }
 0xd21   : > { %2283 = vmatprep.subr.bf16.mxu0 %v5415_v49 }
 0xd24   : > { %2284 = vmatpush1.bf16.msra.mxu0 %v5413_v51 }
 0xd25   : > { %2285 = vmatprep.subr.bf16.mxu0 %v5421_v53 }
 0xd28   : > { %2286 = vmatpush1.bf16.msra.mxu0 %v5419_v58 }
 0xd29   : > { %5005 = vmatprep.subr.bf16.mxu0 %v6291_v0 }
 0xdde   : > { %v2003_v56 = vpop.f32.mrb[8].mxu0 }
 0xddf   : > { %v7191_v6 = vadd.f32 %v5686_v62, %v2003_v56  ;;  %v5003_v10 = vpop.f32.mrb[9].mxu0  ;;  %v5433_v56 = vld [vmem:[#allocation13 + $0x28] sm:$0xff]   ;;  %v5434_v62 = vld [vmem:[#allocation13 + $0x70] sm:$0xff]  }
 0xde0   : > { %v2006_v28 = vpop.f32.mrb[10].mxu0  ;;  %v5435_v10 = vld [vmem:[#allocation13 + $0x30] sm:$0xff]  }
 0xde1   : > { %v7194_v30 = vadd.f32 %v5687_v29, %v2006_v28  ;;  %v5004_v31 = vpop.f32.mrb[11].mxu0  ;;  %v2013_v32 = vmul.f32 %v7191_v6, %v7191_v6  ;;  %v5436_v28 = vld [vmem:[#allocation13 + $0x78] sm:$0xff]  }
 0xde2   : > { %v5437_v29 = vld [vmem:[#allocation13 + $0x38] sm:$0xff]  }
 0xde3   : > { %2015 = vadd.xlane.f32.xlu0 %v2013_v32  ;;  %v2014_v33 = vmul.f32 %v7194_v30, %v7194_v30 }
 0xde5   : > { %2017 = vadd.xlane.f32.xlu1 %v2014_v33 }
 0xe70   : > { %v2016_v59 = vpop.xlane.xlu0 %2015 }
 0xe71   : > { %v2019_v63 = vmul.f32 0.0078125, %v2016_v59 }
 0xe72   : > { %v2018_v1 = vpop.xlane.xlu1 %2017 }
 0xe73   : > { %v2021_v3 = vadd.f32 1e-06, %v2019_v63  ;;  %v2020_v7 = vmul.f32 0.0078125, %v2018_v1 }
 0xe75   : > { %5594 = vrsqrt.f32 %v2021_v3  ;;  %v2022_v8 = vadd.f32 1e-06, %v2020_v7 }
 0xe77   : > { %5596 = vrsqrt.f32 %v2022_v8 }
 0xe7f   : > { %v5595_v9 = vpop.eup %5594 }
 0xe80   : > { %v2025_v11 = vmul.f32 %v5595_v9, %v7191_v6 }
 0xe81   : > { %v5597_v54 = vpop.eup %5596 }
 0xe82   : > { %v2026_v4 = vmul.f32 %v5597_v54, %v7194_v30  ;;  %v2033_v13 = vmul.f32 %v4563_v60, %v2025_v11 }
 0xe84   : > { %v2034_v14 = vmul.f32 %v4563_v60, %v2026_v4 }
 0xe86   : > { %v2035_v15 = vpack.c.bf16 %v2034_v14, %v2033_v13  ;;  %v5438_v13 = vld [vmem:[#allocation16] sm:$0xff]  }
 0xe87   : > { %v5439_v14 = vld [vmem:[#allocation18] sm:$0xff]  }
 0xe88   : > { %2165 = vmatmul.mubr.bf16.vlgmr.msra.gmra.mrb[36].mxu1 %v2035_v15  ;;  %2304 = vmatmul.mubr.bf16.vlgmr.msra.gmra.mrb[12].mxu0 %v2035_v15  ;;  %v5440_v15 = vld [vmem:[#allocation16 + $0x8] sm:$0xff]  }
 0xe89   : > { %5021 = vmatprep.mubr.msk.bf16.mxu0 %vm6292_vm0, %v6291_v0  ;;  %4782 = vmatpush3.bf16.msra.mxu1 %v5423_v17  ;;  %v5442_v17 = vld [vmem:[#allocation16 + $0x10] sm:$0xff]  }
 0xe8a   : > { %4783 = vmatprep.subr.bf16.mxu1 %v5424_v18  ;;  %5006 = vmatpush3.bf16.msra.mxu0 %v5438_v13 }
 0xe8b   : > { %5007 = vmatprep.subr.bf16.mxu0 %v6291_v0 }
 0xe8d   : > { %4784 = vmatpush3.bf16.msra.mxu1 %v5425_v19 }
 0xe8e   : > { %4785 = vmatprep.subr.bf16.mxu1 %v5426_v20  ;;  %5008 = vmatpush3.bf16.msra.mxu0 %v5440_v15 }
 0xe8f   : > { %5009 = vmatprep.subr.bf16.mxu0 %v6291_v0 }
 0xe91   : > { %4786 = vmatpush3.bf16.msra.mxu1 %v5427_v22 }
 0xe92   : > { %4787 = vmatprep.subr.bf16.mxu1 %v5428_v2  ;;  %5010 = vmatpush3.bf16.msra.mxu0 %v5442_v17 }
 0xe93   : > { %5011 = vmatprep.subr.bf16.mxu0 %v6291_v0 }
 0xe95   : > { %4788 = vmatpush3.bf16.msra.mxu1 %v5429_v23 }
 0xe96   : > { %4789 = vmatprep.subr.bf16.mxu1 %v5430_v24 }
 0xe99   : > { %4790 = vmatpush3.bf16.msra.mxu1 %v5431_v26 }
 0xe9a   : > { %4791 = vmatprep.subr.bf16.mxu1 %v5432_v27 }
 0xe9d   : > { %4792 = vmatpush3.bf16.msra.mxu1 %v5433_v56 }
 0xe9e   : > { %4793 = vmatprep.subr.bf16.mxu1 %v5434_v62  ;;  %v5443_v62 = vld [vmem:[#allocation18 + $0x10] sm:$0xff]  }
 0xea1   : > { %4794 = vmatpush3.bf16.msra.mxu1 %v5435_v10  ;;  %v5444_v10 = vld [vmem:[#allocation16 + $0x18] sm:$0xff]  }
 0xea2   : > { %4795 = vmatprep.subr.bf16.mxu1 %v5436_v28  ;;  %v5445_v28 = vld [vmem:[#allocation18 + $0x18] sm:$0xff]   ;;  %5012 = vmatpush3.bf16.msra.mxu0 %v5444_v10 }
 0xea3   : > { %5013 = vmatprep.subr.bf16.mxu0 %v6291_v0 }
 0xea5   : > { %4796 = vmatpush3.bf16.msra.mxu1 %v5437_v29  ;;  %v5448_v29 = vld [vmem:[#allocation16 + $0x28] sm:$0xff]  }
 0xea6   : > { %5025 = vmatprep.subr.bf16.mxu1 %v6291_v0 }
 0xf5b   : > { %v2166_v31 = vpop.f32.mrb[36].mxu1  ;;  %v2305_v32 = vpop.f32.mrb[12].mxu0 }
 0xf5c   : > { %v4596_v33 = vmul.f32 -1.442695, %v2166_v31  ;;  %v2168_v34 = vpop.f32.mrb[37].mxu1  ;;  %v2307_v35 = vpop.f32.mrb[13].mxu0 }
 0xf5d   : > { %v4597_v36 = vmul.f32 -1.442695, %v2168_v34  ;;  %v2170_v37 = vpop.f32.mrb[38].mxu1  ;;  %v2309_v38 = vpop.f32.mrb[14].mxu0 }
 0xf5e   : > { %5598 = vpow2.f32 %v4596_v33  ;;  %v4598_v39 = vmul.f32 -1.442695, %v2170_v37  ;;  %v2172_v55 = vpop.f32.mrb[39].mxu1  ;;  %v2311_v61 = vpop.f32.mrb[15].mxu0  ;;  %v5451_v33 = vld [vmem:[#allocation18 + $0x30] sm:$0xff]  }
 0xf5f   : > { %5600 = vpow2.f32 %v4597_v36  ;;  %v4599_v5 = vmul.f32 -1.442695, %v2172_v55 }
 0xf60   : > { %5602 = vpow2.f32 %v4598_v39 }
 0xf61   : > { %5604 = vpow2.f32 %v4599_v5 }
 0xf68   : > { %v5599_v40 = vpop.eup %5598 }
 0xf69   : > { %v5601_v41 = vpop.eup %5600  ;;  %v2326_v42 = vadd.f32 1.0, %v5599_v40 }
 0xf6a   : > { %v5603_v43 = vpop.eup %5602  ;;  %v2327_v49 = vadd.f32 1.0, %v5601_v41 }
 0xf6b   : > { %v5605_v50 = vpop.eup %5604  ;;  %5606 = vrcp.f32 %v2326_v42  ;;  %v2328_v51 = vadd.f32 1.0, %v5603_v43  ;;  %v4616_v42 = vld [vmem:[#allocation15] ss:$0 sm:$0xff] }
 0xf6c   : > { %5608 = vrcp.f32 %v2327_v49  ;;  %v2329_v52 = vadd.f32 1.0, %v5605_v50 }
 0xf6d   : > { %5610 = vrcp.f32 %v2328_v51  ;;  %v5454_v51 = vld [vmem:[#allocation19] sm:$0xff]  }
 0xf6e   : > { %5612 = vrcp.f32 %v2329_v52 }
 0xf75   : > { %v5607_v53 = vpop.eup %5606 }
 0xf76   : > { %v5609_v57 = vpop.eup %5608  ;;  %v2338_v58 = vmul.f32 %v5607_v53, %v2166_v31  ;;  %v5449_v31 = vld [vmem:[#allocation18 + $0x28] sm:$0xff]  }
 0xf77   : > { %v5611_v59 = vpop.eup %5610  ;;  %v2339_v63 = vmul.f32 %v5609_v57, %v2168_v34  ;;  %v5452_v34 = vld [vmem:[#allocation16 + $0x38] sm:$0xff]   ;;  %v5455_v53 = vld [vmem:[#allocation19 + $0x8] sm:$0xff]   ;;  %v5456_v57 = vld [vmem:[#allocation19 + $0x10] sm:$0xff]  }
 0xf78   : > { %v5613_v1 = vpop.eup %5612  ;;  %v2342_v3 = vmul.f32 %v2338_v58, %v2305_v32  ;;  %v2340_v7 = vmul.f32 %v5611_v59, %v2170_v37  ;;  %v5450_v32 = vld [vmem:[#allocation16 + $0x30] sm:$0xff]   ;;  %v5457_v58 = vld [vmem:[#allocation19 + $0x18] sm:$0xff]   ;;  %v5458_v59 = vld [vmem:[#allocation19 + $0x20] sm:$0xff]  }
 0xf79   : > { %v2343_v8 = vmul.f32 %v2339_v63, %v2307_v35  ;;  %v2341_v9 = vmul.f32 %v5613_v1, %v2172_v55  ;;  %v5453_v35 = vld [vmem:[#allocation18 + $0x38] sm:$0xff]   ;;  %v5459_v63 = vld [vmem:[#allocation19 + $0x28] sm:$0xff]   ;;  %v5460_v1 = vld [vmem:[#allocation19 + $0x30] sm:$0xff]  }
 0xf7a   : > { %v2344_v11 = vmul.f32 %v2340_v7, %v2309_v38 }
 0xf7b   : > { %v2345_v54 = vmul.f32 %v2341_v9, %v2311_v61 }
 0xf7c   : > { %v2346_v60 = vpack.c.bf16 %v2344_v11, %v2342_v3  ;;  %v5461_v3 = vld [vmem:[#allocation19 + $0x38] sm:$0xff]  }
 0xf7d   : > { %v2347_v4 = vpack.c.bf16 %v2345_v54, %v2343_v8 }
 0xf7f   : > { %2508 = vmatprep.mubr.bf16.mxu1 %v2347_v4 }
 0xf80   : > { %2509 = vmatmul.mubr.bf16.vlgmr.msra.gmra.mrb[40].mxu1 %v2346_v60 }
 0xf81   : > { %5041 = vmatprep.mubr.msk.bf16.mxu1 %vm6292_vm0, %v6291_v0  ;;  %5026 = vmatpush3.bf16.msra.mxu1 %v5439_v14 }
 0xf82   : > { %5027 = vmatprep.subr.bf16.mxu1 %v6291_v0 }
 0xf85   : > { %5028 = vmatpush3.bf16.msra.mxu1 %v5441_v16 }
 0xf86   : > { %5029 = vmatprep.subr.bf16.mxu1 %v6291_v0 }
 0xf89   : > { %5030 = vmatpush3.bf16.msra.mxu1 %v5443_v62 }
 0xf8a   : > { %5031 = vmatprep.subr.bf16.mxu1 %v6291_v0 }
 0xf8d   : > { %5032 = vmatpush3.bf16.msra.mxu1 %v5445_v28 }
 0xf8e   : > { %5033 = vmatprep.subr.bf16.mxu1 %v6291_v0 }
0x1053   : > { %v4797_v18 = vpop.f32.mrb[40].mxu1 }
0x1054   : > { %v4798_v19 = vpop.f32.mrb[41].mxu1 }
0x1055   : > { %v4799_v20 = vadd.f32 %v4798_v19, %v4797_v18  ;;  %v4800_v22 = vpop.f32.mrb[42].mxu1 }
0x1056   : > { %v4801_v2 = vpop.f32.mrb[43].mxu1 }
0x1057   : > { %v7214_v23 = vadd.f32 %v4799_v20, %v7191_v6  ;;  %v4802_v24 = vadd.f32 %v4801_v2, %v4800_v22  ;;  %v5446_v6 = vld [vmem:[#allocation16 + $0x20] sm:$0xff]  }
0x1058   : > { %5014 = vmatpush3.bf16.msra.mxu0 %v5446_v6 }
0x1059   : > { %v7217_v26 = vadd.f32 %v4802_v24, %v7194_v30  ;;  %v2520_v27 = vmul.f32 %v7214_v23, %v7214_v23  ;;  %v5447_v30 = vld [vmem:[#allocation18 + $0x20] sm:$0xff]   ;;  %5015 = vmatprep.subr.bf16.mxu0 %v6291_v0 }
0x105a   : > { %5034 = vmatpush3.bf16.msra.mxu1 %v5447_v30 }
0x105b   : > { %2522 = vadd.xlane.f32.xlu0 %v2520_v27  ;;  %v2521_v56 = vmul.f32 %v7217_v26, %v7217_v26  ;;  %5035 = vmatprep.subr.bf16.mxu1 %v6291_v0 }
0x105c   : > { %5016 = vmatpush3.bf16.msra.mxu0 %v5448_v29 }
0x105d   : > { %2524 = vadd.xlane.f32.xlu1 %v2521_v56  ;;  %5017 = vmatprep.subr.bf16.mxu0 %v6291_v0 }
0x105e   : > { %5036 = vmatpush3.bf16.msra.mxu1 %v5449_v31 }
0x105f   : > { %5037 = vmatprep.subr.bf16.mxu1 %v6291_v0 }
0x1060   : > { %5018 = vmatpush3.bf16.msra.mxu0 %v5450_v32 }
0x1061   : > { %5019 = vmatprep.subr.bf16.mxu0 %v6291_v0 }
0x1062   : > { %5038 = vmatpush3.bf16.msra.mxu1 %v5451_v33 }
0x1063   : > { %5039 = vmatprep.subr.bf16.mxu1 %v6291_v0 }
0x1064   : > { %5020 = vmatpush3.bf16.msra.mxu0 %v5452_v34 }
0x1065   : > { %5045 = vmatprep.subr.bf16.mxu0 %v6291_v0 }
0x1066   : > { %5040 = vmatpush3.bf16.msra.mxu1 %v5453_v35 }
0x1067   : > { %5065 = vmatprep.subr.bf16.mxu1 %v6291_v0 }
0x10e8   : > { %v2523_v36 = vpop.xlane.xlu0 %2522 }
0x10e9   : > { %v2526_v37 = vmul.f32 0.0078125, %v2523_v36 }
0x10ea   : > { %v2525_v38 = vpop.xlane.xlu1 %2524 }
0x10eb   : > { %v2528_v39 = vadd.f32 1e-06, %v2526_v37  ;;  %v2527_v55 = vmul.f32 0.0078125, %v2525_v38 }
0x10ed   : > { %5614 = vrsqrt.f32 %v2528_v39  ;;  %v2529_v61 = vadd.f32 1e-06, %v2527_v55 }
0x10ef   : > { %5616 = vrsqrt.f32 %v2529_v61 }
0x10f7   : > { %v5615_v5 = vpop.eup %5614 }
0x10f8   : > { %v2532_v40 = vmul.f32 %v5615_v5, %v7214_v23 }
0x10f9   : > { %v5617_v41 = vpop.eup %5616 }
0x10fa   : > { %v2533_v43 = vmul.f32 %v5617_v41, %v7217_v26  ;;  %v2540_v49 = vmul.f32 %v4616_v42, %v2532_v40 }
0x10fc   : > { %v2541_v50 = vmul.f32 %v4616_v42, %v2533_v43 }
0x10fe   : > { %v2542_v52 = vpack.c.bf16 %v2541_v50, %v2540_v49 }
0x1100   : > { %5022 = vmatmul.mubr.bf16.vlgmr.msra.gmra.mrb[16].mxu0 %v2542_v52  ;;  %5042 = vmatmul.mubr.bf16.vlgmr.msra.gmra.mrb[44].mxu1 %v2542_v52 }
0x1101   : > { %5046 = vmatpush3.bf16.msra.mxu0 %v5454_v51  ;;  %5061 = vmatprep.mubr.msk.bf16.mxu0 %vm6292_vm0, %v6291_v0 }
0x1102   : > { %5047 = vmatprep.subr.bf16.mxu0 %v6291_v0  ;;  %5067 = vmatprep.mubr.msk.bf16.mxu1 %vm6292_vm0, %v6291_v0 }
0x1105   : > { %5048 = vmatpush3.bf16.msra.mxu0 %v5455_v53 }
0x1106   : > { %5049 = vmatprep.subr.bf16.mxu0 %v6291_v0 }
0x1109   : > { %5050 = vmatpush3.bf16.msra.mxu0 %v5456_v57 }
0x110a   : > { %5051 = vmatprep.subr.bf16.mxu0 %v6291_v0 }
0x110d   : > { %5052 = vmatpush3.bf16.msra.mxu0 %v5457_v58 }
0x110e   : > { %5053 = vmatprep.subr.bf16.mxu0 %v6291_v0 }
0x1111   : > { %5054 = vmatpush3.bf16.msra.mxu0 %v5458_v59 }
0x1112   : > { %5055 = vmatprep.subr.bf16.mxu0 %v6291_v0 }
0x1115   : > { %5056 = vmatpush3.bf16.msra.mxu0 %v5459_v63 }
0x1116   : > { %5057 = vmatprep.subr.bf16.mxu0 %v6291_v0 }
0x1119   : > { %5058 = vmatpush3.bf16.msra.mxu0 %v5460_v1 }
0x111a   : > { %5059 = vmatprep.subr.bf16.mxu0 %v6291_v0 }
0x111d   : > { %5060 = vmatpush3.bf16.msra.mxu0 %v5461_v3 }
0x111e   : > { %5089 = vmatprep.subr.bf16.mxu0 %v6291_v0 }
0x1120   : > { %5062 = vmatmul.mubr.bf16.vlgmr.msra.gmra.mrb[20].mxu0 %v2542_v52 }
0x1121   : > { %5091 = vmatprep.mubr.msk.bf16.mxu0 %vm6292_vm0, %v6291_v0 }
0x11d3   : > { %v2641_v7 = vpop.f32.mrb[16].mxu0  ;;  %v2746_v8 = vpop.f32.mrb[44].mxu1 }
0x11d4   : > { %v5023_v9 = vpop.f32.mrb[17].mxu0  ;;  %v5043_v11 = vpop.f32.mrb[45].mxu1  ;;  %v2860_v54 = vmul.f32 %v7047_v45, %v2641_v7  ;;  %v7252_v60 = vmul.f32 %v7050_v46, %v2641_v7  ;;  %v3098_v4 = vmul.f32 %v7053_v47, %v2641_v7  ;;  %v3217_v13 = vmul.f32 %v7056_v48, %v2641_v7 }
0x11d5   : > { %v2644_v14 = vpop.f32.mrb[18].mxu0  ;;  %v2749_v15 = vpop.f32.mrb[46].mxu1 }
0x11d6   : > { %v2861_v16 = vmul.f32 %v7047_v45, %v2644_v14  ;;  %v7258_v17 = vmul.f32 %v7050_v46, %v2644_v14  ;;  %v3099_v18 = vmul.f32 %v7053_v47, %v2644_v14  ;;  %v3218_v19 = vmul.f32 %v7056_v48, %v2644_v14  ;;  %v5024_v20 = vpop.f32.mrb[19].mxu0  ;;  %v5044_v22 = vpop.f32.mrb[47].mxu1 }
0x11d7   : > { %v7262_v2 = vpack.c.bf16 %v2749_v15, %v2746_v8 }
0x11d8   : > { %v2862_v24 = vpack.c.bf16 %v2861_v16, %v2860_v54  ;;  %v3100_v27 = vpack.c.bf16 %v3099_v18, %v3098_v4  ;;  %v3219_v56 = vpack.c.bf16 %v3218_v19, %v3217_v13  ;;  %v2981_v62 = vpack.c.bf16 %v7258_v17, %v7252_v60 }
0x11d9   : > { %5066 = vmatpush3.bf16.xpose.msra.mxu1 %v7262_v2  ;;  %5090 = vmatpush3.bf16.xpose.msra.mxu0 %v7262_v2 }
0x11da   : > { %5101 = vmatprep.subr.bf16.mxu0 %v6291_v0  ;;  %5071 = vmatprep.subr.bf16.mxu1 %v6291_v0 }
0x11e0   : > { %5068 = vmatmul.mubr.bf16.vlgmr.msra.gmra.mrb[48].mxu1 %v2862_v24  ;;  %5092 = vmatmul.mubr.bf16.vlgmr.msra.gmra.mrb[24].mxu0 %v3100_v27 }
0x11e1   : > { %5102 = vmatpush3.bf16.xpose.msra.mxu0 %v7262_v2  ;;  %5103 = vmatprep.mubr.msk.bf16.mxu0 %vm6292_vm0, %v6291_v0 }
0x11e2   : > { %5073 = vmatprep.mubr.msk.bf16.mxu1 %vm6292_vm0, %v6291_v0  ;;  %5113 = vmatprep.subr.bf16.mxu0 %v6291_v0 }
0x11e8   : > { %5104 = vmatmul.mubr.bf16.vlgmr.msra.gmra.mrb[28].mxu0 %v3219_v56 }
0x11e9   : > { %5129 = vmatprep.mubr.msk.bf16.mxu0 %vm6292_vm0, %v6291_v0 }
0x11f3   : > { %v2851_v10 = vpop.f32.mrb[20].mxu0 }
0x11f4   : > { %v5063_v28 = vpop.f32.mrb[21].mxu0 }
0x11f5   : > { %v2854_v6 = vpop.f32.mrb[22].mxu0 }
0x11f6   : > { %v7278_v30 = vpack.c.bf16 %v2854_v6, %v2851_v10  ;;  %v5064_v29 = vpop.f32.mrb[23].mxu0 }
0x11f8   : > { %5072 = vmatpush3.bf16.msra.mxu1 %v7278_v30 }
0x11f9   : > { %5077 = vmatprep.subr.bf16.mxu1 %v6291_v0 }
0x12b3   : > { %v2897_v31 = vpop.f32.mrb[48].mxu1  ;;  %v3135_v32 = vpop.f32.mrb[24].mxu0 }
0x12b4   : > { %v2904_v33 = vmul.f32 0.17677669, %v2897_v31  ;;  %v5069_v34 = vpop.f32.mrb[49].mxu1  ;;  %v5093_v35 = vpop.f32.mrb[25].mxu0  ;;  %v3142_v22 = vmul.f32 0.17677669, %v3135_v32 }
0x12b5   : > { %v2900_v36 = vpop.f32.mrb[50].mxu1  ;;  %v3138_v37 = vpop.f32.mrb[26].mxu0 }
0x12b6   : > { %v2905_v38 = vmul.f32 0.17677669, %v2900_v36  ;;  %v5070_v39 = vpop.f32.mrb[51].mxu1  ;;  %v5094_v55 = vpop.f32.mrb[27].mxu0  ;;  %v2906_v61 = vadd.f32 %v2904_v33, %v7103_v21  ;;  %v3143_v60 = vmul.f32 0.17677669, %v3138_v37  ;;  %v3144_v29 = vadd.f32 %v3142_v22, %v7103_v21 }
0x12b7   : > { %v5463_v22 = vld [vmem:[#allocation21 + $0x8] sm:$0xff]  }
0x12b8   : > { %v2908_v5 = vsel %vm1475_vm15, %v2906_v61, -inf  ;;  %v2907_v40 = vadd.f32 %v2905_v38, %v7105_v25  ;;  %v3145_v32 = vadd.f32 %v3143_v60, %v7105_v25  ;;  %v3146_v34 = vsel %vm1475_vm15, %v3144_v29, -inf }
0x12b9   : > { %2909 = vmax.xlane.f32.xlu0 %v2908_v5 }
0x12ba   : > { %v2911_v41 = vsel %vm1475_vm15, %v2907_v40, -inf  ;;  %v3149_v36 = vsel %vm1475_vm15, %v3145_v32, -inf }
0x12bb   : > { %2912 = vmax.xlane.f32.xlu1 %v2911_v41  ;;  %v3254_v42 = vpop.f32.mrb[28].mxu0 }
0x12bc   : > { %v5105_v43 = vpop.f32.mrb[29].mxu0  ;;  %v3261_v10 = vmul.f32 0.17677669, %v3254_v42 }
0x12bd   : > { %v3257_v49 = vpop.f32.mrb[30].mxu0 }
0x12be   : > { %v5106_v50 = vpop.f32.mrb[31].mxu0  ;;  %v3262_v31 = vmul.f32 0.17677669, %v3257_v49  ;;  %v3263_v35 = vadd.f32 %v3261_v10, %v7103_v21 }
0x12c0   : > { %v3264_v37 = vadd.f32 %v3262_v31, %v7105_v25  ;;  %v3265_v38 = vsel %vm1475_vm15, %v3263_v35, -inf }
0x12c2   : > { %v3268_v39 = vsel %vm1475_vm15, %v3264_v37, -inf }
0x1346   : > { %v2910_v51 = vpop.xlane.xlu0 %2909 }
0x1347   : > { %v2914_v52 = vsub.f32 %v2906_v61, %v2910_v51 }
0x1348   : > { %v2913_v53 = vpop.xlane.xlu1 %2912 }
0x1349   : > { %v2916_v57 = vmul.f32 1.442695, %v2914_v52  ;;  %v2915_v58 = vsub.f32 %v2907_v40, %v2913_v53 }
0x134b   : > { %5618 = vpow2.f32 %v2916_v57  ;;  %v2918_v59 = vmul.f32 1.442695, %v2915_v58 }
0x134d   : > { %5620 = vpow2.f32 %v2918_v59 }
0x1355   : > { %v5619_v63 = vpop.eup %5618 }
0x1356   : > { %v2920_v1 = vsel %vm1475_vm15, %v5619_v63, 0.0 }
0x1357   : > { %v5621_v3 = vpop.eup %5620  ;;  %2921 = vadd.xlane.f32.xlu0 %v2920_v1 }
0x1358   : > { %v2923_v7 = vsel %vm1475_vm15, %v5621_v3, 0.0 }
0x1359   : > { %2924 = vadd.xlane.f32.xlu1 %v2923_v7 }
0x13e4   : > { %v2922_v8 = vpop.xlane.xlu0 %2921 }
0x13e5   : > { %5622 = vrcp.f32 %v2922_v8 }
0x13e6   : > { %v2925_v9 = vpop.xlane.xlu1 %2924 }
0x13e7   : > { %5624 = vrcp.f32 %v2925_v9 }
0x13ef   : > { %v5623_v11 = vpop.eup %5622 }
0x13f0   : > { %v2927_v4 = vmul.f32 %v5623_v11, %v5619_v63 }
0x13f1   : > { %v5625_v54 = vpop.eup %5624 }
0x13f2   : > { %v2929_v13 = vmul.f32 %v5625_v54, %v5621_v3 }
0x13f4   : > { %v2930_v14 = vpack.c.bf16 %v2929_v13, %v2927_v4 }
0x13f6   : > { %5074 = vmatmul.mubr.msk.bf16.vlgmr.msra.gmra.mrb[52].mxu1 %vm1475_vm15, %v2930_v14 }
0x13f7   : > { %5078 = vmatpush3.bf16.xpose.msra.mxu1 %v7262_v2  ;;  %5079 = vmatprep.mubr.msk.bf16.mxu1 %vm6292_vm0, %v6291_v0 }
0x13f8   : > { %5083 = vmatprep.subr.bf16.mxu1 %v6291_v0 }
0x13fe   : > { %5080 = vmatmul.mubr.bf16.vlgmr.msra.gmra.mrb[56].mxu1 %v2981_v62 }
0x13ff   : > { %5084 = vmatpush3.bf16.msra.mxu1 %v7278_v30  ;;  %5085 = vmatprep.mubr.msk.bf16.mxu1 %vm6292_vm0, %v6291_v0 }
0x1400   : > { %5095 = vmatprep.subr.bf16.mxu1 %v6291_v0 }
0x14c9   : > { %v7300_v15 = vpop.f32.mrb[52].mxu1 }
0x14ca   : > { %v5075_v16 = vpop.f32.mrb[53].mxu1 }
0x14cb   : > { %v7302_v18 = vpop.f32.mrb[54].mxu1 }
0x14cc   : > { %v5076_v19 = vpop.f32.mrb[55].mxu1 }
0x14d1   : > { %v3016_v20 = vpop.f32.mrb[56].mxu1 }
0x14d2   : > { %v3023_v2 = vmul.f32 0.17677669, %v3016_v20  ;;  %v5081_v24 = vpop.f32.mrb[57].mxu1  ;;  %v5462_v20 = vld [vmem:[#allocation21] sm:$0xff]  }
0x14d3   : > { %v3019_v27 = vpop.f32.mrb[58].mxu1  ;;  %5114 = vmatpush3.bf16.msra.mxu0 %v5462_v20  ;;  %v5472_v20 = vld [vmem:[#allocation24 + $0x4] ss:$8 sps:$4 sm:$0xff]  }
0x14d4   : > { %v3024_v17 = vmul.f32 0.17677669, %v3019_v27  ;;  %v5082_v56 = vpop.f32.mrb[59].mxu1  ;;  %v3025_v62 = vadd.f32 %v3023_v2, %v7103_v21  ;;  %5115 = vmatprep.subr.bf16.mxu0 %v6291_v0 }
0x14d6   : > { %v3027_v28 = vsel %vm1475_vm15, %v3025_v62, -inf  ;;  %v3026_v6 = vadd.f32 %v3024_v17, %v7105_v25 }
0x14d7   : > { %3028 = vmax.xlane.f32.xlu0 %v3027_v28  ;;  %5116 = vmatpush3.bf16.msra.mxu0 %v5463_v22  ;;  %v5473_v22 = vld [vmem:[#allocation25] ss:$8 sps:$4 sm:$0xff]  }
0x14d8   : > { %v3030_v33 = vsel %vm1475_vm15, %v3026_v6, -inf  ;;  %5117 = vmatprep.subr.bf16.mxu0 %v6291_v0 }
0x14d9   : > { %3031 = vmax.xlane.f32.xlu1 %v3030_v33 }
0x14db   : > { %3147 = vmax.xlane.f32.xlu0 %v3146_v34 }
0x14dd   : > { %3150 = vmax.xlane.f32.xlu1 %v3149_v36 }
0x14df   : > { %3266 = vmax.xlane.f32.xlu0 %v3265_v38 }
0x14e1   : > { %3269 = vmax.xlane.f32.xlu1 %v3268_v39 }
0x1564   : > { %v3029_v55 = vpop.xlane.xlu0 %3028 }
0x1565   : > { %v3033_v61 = vsub.f32 %v3025_v62, %v3029_v55 }
0x1566   : > { %v3032_v5 = vpop.xlane.xlu1 %3031 }
0x1567   : > { %v3035_v40 = vmul.f32 1.442695, %v3033_v61  ;;  %v3034_v41 = vsub.f32 %v3026_v6, %v3032_v5  ;;  %v5464_v61 = vld [vmem:[#allocation21 + $0x10] sm:$0xff]   ;;  %v5465_v5 = vld [vmem:[#allocation21 + $0x18] sm:$0xff]  }
0x1568   : > { %v3148_v42 = vpop.xlane.xlu0 %3147  ;;  %5118 = vmatpush3.bf16.msra.mxu0 %v5464_v61  ;;  %v5502_v61 = vld [vmem:[#allocation24 + $0x54] ss:$8 sps:$4 sm:$0xff]  }
0x1569   : > { %5626 = vpow2.f32 %v3035_v40  ;;  %v3037_v21 = vmul.f32 1.442695, %v3034_v41  ;;  %v3152_v43 = vsub.f32 %v3144_v29, %v3148_v42  ;;  %5119 = vmatprep.subr.bf16.mxu0 %v6291_v0  ;;  %v5466_v40 = vld [vmem:[#allocation21 + $0x20] sm:$0xff]   ;;  %v5468_v41 = vld [vmem:[#allocation21 + $0x30] sm:$0xff]   ;;  %v5469_v42 = vld [vmem:[#allocation21 + $0x38] sm:$0xff]  }
0x156a   : > { %v3151_v49 = vpop.xlane.xlu1 %3150 }
0x156b   : > { %5628 = vpow2.f32 %v3037_v21  ;;  %v3154_v50 = vmul.f32 1.442695, %v3152_v43  ;;  %v3153_v25 = vsub.f32 %v3145_v32, %v3151_v49  ;;  %v2975_v43 = vmul.f32 %v7047_v45, %v7300_v15 }
0x156c   : > { %v3267_v51 = vpop.xlane.xlu0 %3266  ;;  %5120 = vmatpush3.bf16.msra.mxu0 %v5465_v5  ;;  %v5505_v5 = vld [vmem:[#allocation25 + $0x54] ss:$8 sps:$4 sm:$0xff]  }
0x156d   : > { %5630 = vpow2.f32 %v3154_v50  ;;  %v3156_v52 = vmul.f32 1.442695, %v3153_v25  ;;  %v3271_v53 = vsub.f32 %v3263_v35, %v3267_v51  ;;  %5121 = vmatprep.subr.bf16.mxu0 %v6291_v0  ;;  %v2976_v51 = vmul.f32 %v7047_v45, %v7302_v18 }
0x156e   : > { %v3270_v57 = vpop.xlane.xlu1 %3269 }
0x156f   : > { %5632 = vpow2.f32 %v3156_v52  ;;  %v3273_v58 = vmul.f32 1.442695, %v3271_v53  ;;  %v3272_v59 = vsub.f32 %v3264_v37, %v3270_v57 }
0x1570   : > { %5122 = vmatpush3.bf16.msra.mxu0 %v5466_v40  ;;  %v5500_v40 = vld [vmem:[#allocation24 + $0x50] ss:$8 sps:$4 sm:$0xff]  }
0x1571   : > { %5634 = vpow2.f32 %v3273_v58  ;;  %v3275_v63 = vmul.f32 1.442695, %v3272_v59  ;;  %5123 = vmatprep.subr.bf16.mxu0 %v6291_v0 }
0x1573   : > { %v5627_v1 = vpop.eup %5626  ;;  %5636 = vpow2.f32 %v3275_v63 }
0x1574   : > { %v3039_v3 = vsel %vm1475_vm15, %v5627_v1, 0.0 }
0x1575   : > { %v5629_v7 = vpop.eup %5628  ;;  %3040 = vadd.xlane.f32.xlu0 %v3039_v3 }
0x1576   : > { %v3042_v8 = vsel %vm1475_vm15, %v5629_v7, 0.0 }
0x1577   : > { %v5631_v9 = vpop.eup %5630  ;;  %3043 = vadd.xlane.f32.xlu1 %v3042_v8 }
0x1578   : > { %v3158_v11 = vsel %vm1475_vm15, %v5631_v9, 0.0 }
0x1579   : > { %v5633_v54 = vpop.eup %5632  ;;  %3159 = vadd.xlane.f32.xlu0 %v3158_v11 }
0x157a   : > { %v3161_v4 = vsel %vm1475_vm15, %v5633_v54, 0.0 }
0x157b   : > { %v5635_v13 = vpop.eup %5634  ;;  %3162 = vadd.xlane.f32.xlu1 %v3161_v4 }
0x157c   : > { %v3277_v14 = vsel %vm1475_vm15, %v5635_v13, 0.0 }
0x157d   : > { %v5637_v16 = vpop.eup %5636  ;;  %3278 = vadd.xlane.f32.xlu0 %v3277_v14 }
0x157e   : > { %v3280_v19 = vsel %vm1475_vm15, %v5637_v16, 0.0 }
0x157f   : > { %3281 = vadd.xlane.f32.xlu1 %v3280_v19  ;;  %v5470_v19 = vld [vmem:[#allocation24] ss:$8 sps:$4 sm:$0xff]  }
0x1602   : > { %v3041_v2 = vpop.xlane.xlu0 %3040 }
0x1603   : > { %5638 = vrcp.f32 %v3041_v2  ;;  %v5478_v2 = vld [vmem:[#allocation24 + $0x14] ss:$8 sps:$4 sm:$0xff]  }
0x1604   : > { %v3044_v24 = vpop.xlane.xlu1 %3043 }
0x1605   : > { %5640 = vrcp.f32 %v3044_v24  ;;  %v5481_v24 = vld [vmem:[#allocation25 + $0x14] ss:$8 sps:$4 sm:$0xff]  }
0x1606   : > { %v3160_v27 = vpop.xlane.xlu0 %3159 }
0x1608   : > { %v3163_v60 = vpop.xlane.xlu1 %3162 }
0x1609   : > { %5642 = vrcp.f32 %v3163_v60  ;;  %v5479_v60 = vld [vmem:[#allocation25 + $0x10] ss:$8 sps:$4 sm:$0xff]  }
0x160a   : > { %5644 = vrcp.f32 %v3160_v27  ;;  %v3279_v6 = vpop.xlane.xlu0 %3278  ;;  %v5476_v27 = vld [vmem:[#allocation24 + $0x10] ss:$8 sps:$4 sm:$0xff]  }
0x160c   : > { %v3282_v56 = vpop.xlane.xlu1 %3281 }
0x160d   : > { %v5639_v17 = vpop.eup %5638  ;;  %5646 = vrcp.f32 %v3282_v56  ;;  %v5482_v56 = vld [vmem:[#allocation24 + $0x20] ss:$8 sps:$4 sm:$0xff]  }
0x160e   : > { %v3046_v10 = vmul.f32 %v5639_v17, %v5627_v1  ;;  %5648 = vrcp.f32 %v3279_v6  ;;  %v5487_v17 = vld [vmem:[#allocation25 + $0x24] ss:$8 sps:$4 sm:$0xff]  }
0x160f   : > { %v5641_v62 = vpop.eup %5640 }
0x1610   : > { %v3048_v28 = vmul.f32 %v5641_v62, %v5629_v7  ;;  %v5485_v62 = vld [vmem:[#allocation25 + $0x20] ss:$8 sps:$4 sm:$0xff]  }
0x1612   : > { %v3049_v29 = vpack.c.bf16 %v3048_v28, %v3046_v10 }
0x1613   : > { %v5643_v31 = vpop.eup %5642 }
0x1614   : > { %5086 = vmatmul.mubr.msk.bf16.vlgmr.msra.gmra.mrb[60].mxu1 %vm1475_vm15, %v3049_v29  ;;  %v5645_v33 = vpop.eup %5644  ;;  %v3167_v32 = vmul.f32 %v5643_v31, %v5633_v54 }
0x1615   : > { %5096 = vmatpush3.bf16.msra.mxu1 %v7278_v30  ;;  %5097 = vmatprep.mubr.msk.bf16.mxu1 %vm6292_vm0, %v6291_v0  ;;  %v3165_v34 = vmul.f32 %v5645_v33, %v5631_v9 }
0x1616   : > { %5107 = vmatprep.subr.bf16.mxu1 %v6291_v0 }
0x1617   : > { %v3168_v35 = vpack.c.bf16 %v3167_v32, %v3165_v34  ;;  %v5647_v36 = vpop.eup %5646 }
0x1618   : > { %v5649_v37 = vpop.eup %5648  ;;  %v3286_v38 = vmul.f32 %v5647_v36, %v5637_v16  ;;  %v5493_v36 = vld [vmem:[#allocation25 + $0x34] ss:$8 sps:$4 sm:$0xff]  }
0x1619   : > { %v3284_v39 = vmul.f32 %v5649_v37, %v5635_v13  ;;  %v5488_v37 = vld [vmem:[#allocation24 + $0x30] ss:$8 sps:$4 sm:$0xff]  }
0x161b   : > { %v3287_v55 = vpack.c.bf16 %v3286_v38, %v3284_v39  ;;  %v5491_v38 = vld [vmem:[#allocation25 + $0x30] ss:$8 sps:$4 sm:$0xff]   ;;  %v5497_v39 = vld [vmem:[#allocation25 + $0x40] ss:$8 sps:$4 sm:$0xff]  }
0x161c   : > { %5098 = vmatmul.mubr.msk.bf16.vlgmr.msra.gmra.mrb[64].mxu1 %vm1475_vm15, %v3168_v35  ;;  %v5490_v35 = vld [vmem:[#allocation24 + $0x34] ss:$8 sps:$4 sm:$0xff]  }
0x161d   : > { %5108 = vmatpush3.bf16.msra.mxu1 %v7278_v30  ;;  %5109 = vmatprep.mubr.msk.bf16.mxu1 %vm6292_vm0, %v6291_v0  ;;  %v5467_v30 = vld [vmem:[#allocation21 + $0x28] sm:$0xff]  }
0x161e   : > { %5124 = vmatpush3.bf16.msra.mxu0 %v5467_v30  ;;  %3564 = vmatprep.subr.bf16.mxu1 %v5472_v20  ;;  %v5503_v30 = vld [vmem:[#allocation25 + $0x50] ss:$8 sps:$4 sm:$0xff]   ;;  %v5526_v20 = vld [vmem:[#allocation27 + $0x60] sm:$0xff]  }
0x161f   : > { %5125 = vmatprep.subr.bf16.mxu0 %v6291_v0 }
0x1622   : > { %5126 = vmatpush3.bf16.msra.mxu0 %v5468_v41  ;;  %v5508_v41 = vld [vmem:[#allocation24 + $0x64] ss:$8 sps:$4 sm:$0xff]  }
0x1623   : > { %5127 = vmatprep.subr.bf16.mxu0 %v6291_v0 }
0x1624   : > { %5110 = vmatmul.mubr.msk.bf16.vlgmr.msra.gmra.mrb[68].mxu1 %vm1475_vm15, %v3287_v55  ;;  %v5499_v55 = vld [vmem:[#allocation25 + $0x44] ss:$8 sps:$4 sm:$0xff]  }
0x1625   : > { %3596 = vmatprep.mubr.bf16.mxu1 %v6293_v12  ;;  %3565 = vmatpush1.bf16.msra.mxu1 %v5470_v19  ;;  %v5525_v19 = vld [vmem:[#allocation27 + $0x18] sm:$0xff]  }
0x1626   : > { %5128 = vmatpush3.bf16.msra.mxu0 %v5469_v42  ;;  %3566 = vmatprep.subr.bf16.mxu1 %v5478_v2  ;;  %v5511_v42 = vld [vmem:[#allocation25 + $0x64] ss:$8 sps:$4 sm:$0xff]   ;;  %v5530_v2 = vld [vmem:[#allocation27 + $0x70] sm:$0xff]  }
0x1629   : > { %3567 = vmatpush1.bf16.msra.mxu1 %v5476_v27  ;;  %v5532_v27 = vld [vmem:[#allocation27 + $0x78] sm:$0xff]  }
0x16e7   : > { %v3087_v21 = vpop.f32.mrb[60].mxu1 }
0x16e8   : > { %v3094_v49 = vmul.f32 %v7050_v46, %v3087_v21  ;;  %v5087_v50 = vpop.f32.mrb[61].mxu1  ;;  %v5506_v21 = vld [vmem:[#allocation24 + $0x60] ss:$8 sps:$4 sm:$0xff]  }
0x16e9   : > { %v3090_v25 = vpop.f32.mrb[62].mxu1  ;;  %v5517_v50 = vld [vmem:[#allocation25 + $0x74] ss:$8 sps:$4 sm:$0xff]  }
0x16ea   : > { %v3096_v52 = vadd.f32 %v3094_v49, %v2975_v43  ;;  %v3095_v53 = vmul.f32 %v7050_v46, %v3090_v25  ;;  %v5088_v57 = vpop.f32.mrb[63].mxu1  ;;  %v5509_v43 = vld [vmem:[#allocation25 + $0x60] ss:$8 sps:$4 sm:$0xff]   ;;  %v5514_v49 = vld [vmem:[#allocation24 + $0x74] ss:$8 sps:$4 sm:$0xff]  }
0x16eb   : > { %v5512_v25 = vld [vmem:[#allocation24 + $0x70] ss:$8 sps:$4 sm:$0xff]  }
0x16ec   : > { %v3097_v58 = vadd.f32 %v3095_v53, %v2976_v51  ;;  %v5515_v51 = vld [vmem:[#allocation25 + $0x70] ss:$8 sps:$4 sm:$0xff]  }
0x16ef   : > { %v3206_v59 = vpop.f32.mrb[64].mxu1 }
0x16f0   : > { %v3213_v63 = vmul.f32 %v7053_v47, %v3206_v59  ;;  %v5099_v1 = vpop.f32.mrb[65].mxu1 }
0x16f1   : > { %v3209_v3 = vpop.f32.mrb[66].mxu1 }
0x16f2   : > { %v3215_v7 = vadd.f32 %v3213_v63, %v3096_v52  ;;  %v3214_v15 = vmul.f32 %v7053_v47, %v3209_v3  ;;  %v5100_v8 = vpop.f32.mrb[67].mxu1  ;;  %v5475_v47 = vld [vmem:[#allocation25 + $0x4] ss:$8 sps:$4 sm:$0xff]  }
0x16f3   : > { %3703 = vmatprep.subr.bf16.mxu0 %v5475_v47  ;;  %v5529_v47 = vld [vmem:[#allocation27 + $0x28] sm:$0xff]  }
0x16f4   : > { %v3216_v9 = vadd.f32 %v3214_v15, %v3097_v58  ;;  %v4653_v15 = vld [vmem:[#allocation22] ss:$0 sm:$0xff] }
0x16f7   : > { %v3325_v11 = vpop.f32.mrb[68].mxu1 }
0x16f8   : > { %v3332_v54 = vmul.f32 %v7056_v48, %v3325_v11  ;;  %v5111_v4 = vpop.f32.mrb[69].mxu1 }
0x16f9   : > { %v3328_v45 = vpop.f32.mrb[70].mxu1  ;;  %v5518_v4 = vld [vmem:[#allocation27 + $0x40] sm:$0xff]  }
0x16fa   : > { %v3334_v18 = vadd.f32 %v3332_v54, %v3215_v7  ;;  %v3333_v46 = vmul.f32 %v7056_v48, %v3328_v45  ;;  %v5112_v13 = vpop.f32.mrb[71].mxu1  ;;  %v5484_v48 = vld [vmem:[#allocation24 + $0x24] ss:$8 sps:$4 sm:$0xff]  }
0x16fb   : > { %3568 = vmatprep.subr.bf16.mxu1 %v5484_v48  ;;  %v5519_v45 = vld [vmem:[#allocation27] sm:$0xff]   ;;  %v5522_v13 = vld [vmem:[#allocation27 + $0x50] sm:$0xff]  }
0x16fc   : > { %v3335_v14 = vadd.f32 %v3333_v46, %v3216_v9  ;;  %3569 = vmatpush1.bf16.msra.mxu1 %v5482_v56  ;;  %v5521_v46 = vld [vmem:[#allocation27 + $0x8] sm:$0xff]  }
0x16fd   : > { %3570 = vmatprep.subr.bf16.mxu1 %v5490_v35 }
0x16fe   : > { %v3336_v16 = vpack.c.bf16 %v3335_v14, %v3334_v18  ;;  %v5520_v18 = vld [vmem:[#allocation27 + $0x48] sm:$0xff]   ;;  %v5523_v14 = vld [vmem:[#allocation27 + $0x10] sm:$0xff]  }
0x1700   : > { %5130 = vmatmul.mubr.bf16.vlgmr.msra.gmra.mrb[32].mxu0 %v3336_v16  ;;  %3571 = vmatpush1.bf16.msra.mxu1 %v5488_v37  ;;  %v5524_v16 = vld [vmem:[#allocation27 + $0x58] sm:$0xff]  }
0x1701   : > { %3735 = vmatprep.mubr.bf16.mxu0 %v6293_v12  ;;  %3704 = vmatpush1.bf16.msra.mxu0 %v5473_v22  ;;  %v5527_v22 = vld [vmem:[#allocation27 + $0x20] sm:$0xff]  }
0x1702   : > { %3705 = vmatprep.subr.bf16.mxu0 %v5481_v24  ;;  %v5531_v24 = vld [vmem:[#allocation27 + $0x30] sm:$0xff]  }
0x1705   : > { %3706 = vmatpush1.bf16.msra.mxu0 %v5479_v60  ;;  %v5533_v60 = vld [vmem:[#allocation27 + $0x38] sm:$0xff]  }
0x1706   : > { %3707 = vmatprep.subr.bf16.mxu0 %v5487_v17 }
0x1709   : > { %3708 = vmatpush1.bf16.msra.mxu0 %v5485_v62 }
0x170a   : > { %3709 = vmatprep.subr.bf16.mxu0 %v5493_v36 }
0x170d   : > { %3710 = vmatpush1.bf16.msra.mxu0 %v5491_v38 }
0x170e   : > { %3711 = vmatprep.subr.bf16.mxu0 %v5499_v55 }
0x1711   : > { %3712 = vmatpush1.bf16.msra.mxu0 %v5497_v39 }
0x1712   : > { %3713 = vmatprep.subr.bf16.mxu0 %v5505_v5 }
0x1715   : > { %3714 = vmatpush1.bf16.msra.mxu0 %v5503_v30 }
0x1716   : > { %3715 = vmatprep.subr.bf16.mxu0 %v5511_v42 }
0x1719   : > { %3716 = vmatpush1.bf16.msra.mxu0 %v5509_v43 }
0x171a   : > { %3717 = vmatprep.subr.bf16.mxu0 %v5517_v50 }
0x171d   : > { %3718 = vmatpush1.bf16.msra.mxu0 %v5515_v51 }
0x17d3   : > { %v3435_v10 = vpop.f32.mrb[32].mxu0 }
0x17d4   : > { %v7352_v28 = vadd.f32 %v3435_v10, %v7214_v23  ;;  %v5131_v6 = vpop.f32.mrb[33].mxu0  ;;  %v5494_v23 = vld [vmem:[#allocation24 + $0x40] ss:$8 sps:$4 sm:$0xff]  }
0x17d5   : > { %v3438_v29 = vpop.f32.mrb[34].mxu0 }
0x17d6   : > { %v7355_v31 = vadd.f32 %v3438_v29, %v7217_v26  ;;  %v5132_v33 = vpop.f32.mrb[35].mxu0  ;;  %v3445_v32 = vmul.f32 %v7352_v28, %v7352_v28  ;;  %v5496_v26 = vld [vmem:[#allocation24 + $0x44] ss:$8 sps:$4 sm:$0xff]  }
0x17d7   : > { %3572 = vmatprep.subr.bf16.mxu1 %v5496_v26 }
0x17d8   : > { %3447 = vadd.xlane.f32.xlu0 %v3445_v32  ;;  %v3446_v34 = vmul.f32 %v7355_v31, %v7355_v31  ;;  %3573 = vmatpush1.bf16.msra.mxu1 %v5494_v23 }
0x17d9   : > { %3574 = vmatprep.subr.bf16.mxu1 %v5502_v61 }
0x17da   : > { %3449 = vadd.xlane.f32.xlu1 %v3446_v34 }
0x17dc   : > { %3575 = vmatpush1.bf16.msra.mxu1 %v5500_v40 }
0x17dd   : > { %3576 = vmatprep.subr.bf16.mxu1 %v5508_v41 }
0x17e0   : > { %3577 = vmatpush1.bf16.msra.mxu1 %v5506_v21 }
0x17e1   : > { %3578 = vmatprep.subr.bf16.mxu1 %v5514_v49 }
0x17e4   : > { %3579 = vmatpush1.bf16.msra.mxu1 %v5512_v25 }
0x17e5   : > { %4855 = vmatprep.subr.bf16.mxu1 %v5518_v4 }
0x1865   : > { %v3448_v52 = vpop.xlane.xlu0 %3447 }
0x1866   : > { %v3451_v53 = vmul.f32 0.0078125, %v3448_v52 }
0x1867   : > { %v3450_v57 = vpop.xlane.xlu1 %3449 }
0x1868   : > { %v3453_v58 = vadd.f32 1e-06, %v3451_v53  ;;  %v3452_v59 = vmul.f32 0.0078125, %v3450_v57 }
0x186a   : > { %5650 = vrsqrt.f32 %v3453_v58  ;;  %v3454_v63 = vadd.f32 1e-06, %v3452_v59  ;;  %v5534_v59 = vld [vmem:[#allocation30] ss:$8 sps:$4 sm:$0xff]  }
0x186c   : > { %5652 = vrsqrt.f32 %v3454_v63  ;;  %v5536_v63 = vld [vmem:[#allocation30 + $0x4] ss:$8 sps:$4 sm:$0xff]  }
0x186d   : > { %4071 = vmatprep.subr.bf16.mxu0 %v5536_v63 }
0x1874   : > { %v5651_v1 = vpop.eup %5650 }
0x1875   : > { %v3457_v3 = vmul.f32 %v5651_v1, %v7352_v28  ;;  %v5539_v1 = vld [vmem:[#allocation30 + $0x14] ss:$8 sps:$4 sm:$0xff]  }
0x1876   : > { %v5653_v7 = vpop.eup %5652 }
0x1877   : > { %v3458_v8 = vmul.f32 %v5653_v7, %v7355_v31  ;;  %v3465_v9 = vmul.f32 %v4653_v15, %v3457_v3  ;;  %v5537_v3 = vld [vmem:[#allocation30 + $0x10] ss:$8 sps:$4 sm:$0xff]   ;;  %v5542_v7 = vld [vmem:[#allocation30 + $0x24] ss:$8 sps:$4 sm:$0xff]  }
0x1879   : > { %v3466_v11 = vmul.f32 %v4653_v15, %v3458_v8  ;;  %v5540_v15 = vld [vmem:[#allocation30 + $0x20] ss:$8 sps:$4 sm:$0xff]  }
0x187b   : > { %v3467_v54 = vpack.c.bf16 %v3466_v11, %v3465_v9 }
0x187d   : > { %3597 = vmatmul.mubr.bf16.vlgmr.msra.gmra.mrb[72].mxu1 %v3467_v54  ;;  %3736 = vmatmul.mubr.bf16.vlgmr.msra.gmra.mrb[36].mxu0 %v3467_v54 }
0x187e   : > { %4103 = vmatprep.mubr.bf16.mxu0 %v6293_v12  ;;  %4856 = vmatpush3.bf16.msra.mxu1 %v5519_v45  ;;  %v5528_v12 = vld [vmem:[#allocation27 + $0x68] sm:$0xff]  }
0x187f   : > { %4857 = vmatprep.subr.bf16.mxu1 %v5520_v18  ;;  %4072 = vmatpush1.bf16.msra.mxu0 %v5534_v59 }
0x1880   : > { %4073 = vmatprep.subr.bf16.mxu0 %v5539_v1 }
0x1882   : > { %4858 = vmatpush3.bf16.msra.mxu1 %v5521_v46 }
0x1883   : > { %4859 = vmatprep.subr.bf16.mxu1 %v5522_v13  ;;  %4074 = vmatpush1.bf16.msra.mxu0 %v5537_v3 }
0x1884   : > { %4075 = vmatprep.subr.bf16.mxu0 %v5542_v7 }
0x1886   : > { %4860 = vmatpush3.bf16.msra.mxu1 %v5523_v14 }
0x1887   : > { %4861 = vmatprep.subr.bf16.mxu1 %v5524_v16  ;;  %4076 = vmatpush1.bf16.msra.mxu0 %v5540_v15  ;;  %v5545_v16 = vld [vmem:[#allocation30 + $0x34] ss:$8 sps:$4 sm:$0xff]  }
0x1888   : > { %4077 = vmatprep.subr.bf16.mxu0 %v5545_v16 }
0x188a   : > { %4862 = vmatpush3.bf16.msra.mxu1 %v5525_v19  ;;  %v5543_v19 = vld [vmem:[#allocation30 + $0x30] ss:$8 sps:$4 sm:$0xff]  }
0x188b   : > { %4863 = vmatprep.subr.bf16.mxu1 %v5526_v20  ;;  %4078 = vmatpush1.bf16.msra.mxu0 %v5543_v19  ;;  %v5546_v20 = vld [vmem:[#allocation30 + $0x40] ss:$8 sps:$4 sm:$0xff]  }
0x188e   : > { %4864 = vmatpush3.bf16.msra.mxu1 %v5527_v22  ;;  %v5548_v22 = vld [vmem:[#allocation30 + $0x44] ss:$8 sps:$4 sm:$0xff]  }
0x188f   : > { %4865 = vmatprep.subr.bf16.mxu1 %v5528_v12  ;;  %v5551_v12 = vld [vmem:[#allocation30 + $0x54] ss:$8 sps:$4 sm:$0xff]   ;;  %4079 = vmatprep.subr.bf16.mxu0 %v5548_v22 }
0x1890   : > { %4080 = vmatpush1.bf16.msra.mxu0 %v5546_v20 }
0x1891   : > { %4081 = vmatprep.subr.bf16.mxu0 %v5551_v12 }
0x1892   : > { %4866 = vmatpush3.bf16.msra.mxu1 %v5529_v47  ;;  %v5549_v47 = vld [vmem:[#allocation30 + $0x50] ss:$8 sps:$4 sm:$0xff]  }
0x1893   : > { %4867 = vmatprep.subr.bf16.mxu1 %v5530_v2  ;;  %v5554_v2 = vld [vmem:[#allocation30 + $0x64] ss:$8 sps:$4 sm:$0xff]  }
0x1894   : > { %4082 = vmatpush1.bf16.msra.mxu0 %v5549_v47 }
0x1895   : > { %4083 = vmatprep.subr.bf16.mxu0 %v5554_v2 }
0x1896   : > { %4868 = vmatpush3.bf16.msra.mxu1 %v5531_v24  ;;  %v5555_v24 = vld [vmem:[#allocation30 + $0x70] ss:$8 sps:$4 sm:$0xff]  }
0x1897   : > { %4869 = vmatprep.subr.bf16.mxu1 %v5532_v27 }
0x189a   : > { %4870 = vmatpush3.bf16.msra.mxu1 %v5533_v60 }
0x1950   : > { %v3598_v48 = vpop.f32.mrb[72].mxu1  ;;  %v3737_v17 = vpop.f32.mrb[36].mxu0 }
0x1951   : > { %v4686_v56 = vmul.f32 -1.442695, %v3598_v48  ;;  %v3600_v62 = vpop.f32.mrb[73].mxu1  ;;  %v3739_v10 = vpop.f32.mrb[37].mxu0 }
0x1952   : > { %v4687_v6 = vmul.f32 -1.442695, %v3600_v62  ;;  %v3602_v29 = vpop.f32.mrb[74].mxu1  ;;  %v3741_v33 = vpop.f32.mrb[38].mxu0 }
0x1953   : > { %5654 = vpow2.f32 %v4686_v56  ;;  %v4688_v32 = vmul.f32 -1.442695, %v3602_v29  ;;  %v3604_v34 = vpop.f32.mrb[75].mxu1  ;;  %v3743_v35 = vpop.f32.mrb[39].mxu0 }
0x1954   : > { %5656 = vpow2.f32 %v4687_v6  ;;  %v4689_v36 = vmul.f32 -1.442695, %v3604_v34 }
0x1955   : > { %5658 = vpow2.f32 %v4688_v32 }
0x1956   : > { %5660 = vpow2.f32 %v4689_v36 }
0x195d   : > { %v5655_v37 = vpop.eup %5654 }
0x195e   : > { %v5657_v38 = vpop.eup %5656  ;;  %v3758_v23 = vadd.f32 1.0, %v5655_v37 }
0x195f   : > { %v5659_v26 = vpop.eup %5658  ;;  %v3759_v39 = vadd.f32 1.0, %v5657_v38 }
0x1960   : > { %v5661_v55 = vpop.eup %5660  ;;  %5662 = vrcp.f32 %v3758_v23  ;;  %v3760_v61 = vadd.f32 1.0, %v5659_v26 }
0x1961   : > { %5664 = vrcp.f32 %v3759_v39  ;;  %v3761_v5 = vadd.f32 1.0, %v5661_v55 }
0x1962   : > { %5666 = vrcp.f32 %v3760_v61  ;;  %v4115_v61 = vld [vmem:[%s1036_s22 + $0x8] sm:$0xff] }
0x1963   : > { %5668 = vrcp.f32 %v3761_v5  ;;  %v4114_v5 = vld [vmem:[%s1036_s22] sm:$0xff]  ;;  %vm4168_vm5 = vcmp.ne.s32.totalorder %v4115_v61, 4294967196 }
0x1964   : > { %vm4167_vm4 = vcmp.ne.s32.totalorder %v4114_v5, 4294967196 }
0x196a   : > { %v5663_v40 = vpop.eup %5662 }
0x196b   : > { %v5665_v30 = vpop.eup %5664  ;;  %v3770_v41 = vmul.f32 %v5663_v40, %v3598_v48 }
0x196c   : > { %v5667_v42 = vpop.eup %5666  ;;  %v3771_v21 = vmul.f32 %v5665_v30, %v3600_v62 }
0x196d   : > { %v5669_v43 = vpop.eup %5668  ;;  %v3774_v49 = vmul.f32 %v3770_v41, %v3737_v17  ;;  %v3772_v50 = vmul.f32 %v5667_v42, %v3602_v29 }
0x196e   : > { %v3775_v25 = vmul.f32 %v3771_v21, %v3739_v10  ;;  %v3773_v51 = vmul.f32 %v5669_v43, %v3604_v34  ;;  %v4146_v21 = vadd.s32 128, %v7038_v44 }
0x196f   : > { %v3776_v52 = vmul.f32 %v3772_v50, %v3741_v33  ;;  %v4706_v33 = vld [vmem:[#allocation28] ss:$0 sm:$0xff] }
0x1970   : > { %v3777_v53 = vmul.f32 %v3773_v51, %v3743_v35 }
0x1971   : > { %v3778_v57 = vpack.c.bf16 %v3776_v52, %v3774_v49 }
0x1972   : > { %v3779_v58 = vpack.c.bf16 %v3777_v53, %v3775_v25 }
0x1974   : > { %3940 = vmatprep.mubr.bf16.mxu1 %v3779_v58 }
0x1975   : > { %3941 = vmatmul.mubr.bf16.vlgmr.msra.gmra.mrb[76].mxu1 %v3778_v57 }
0x1a48   : > { %v4871_v8 = vpop.f32.mrb[76].mxu1 }
0x1a49   : > { %v4872_v9 = vpop.f32.mrb[77].mxu1 }
0x1a4a   : > { %v4873_v11 = vadd.f32 %v4872_v9, %v4871_v8  ;;  %v4874_v54 = vpop.f32.mrb[78].mxu1 }
0x1a4b   : > { %v4875_v4 = vpop.f32.mrb[79].mxu1 }
0x1a4c   : > { %v3949_v45 = vadd.f32 %v4873_v11, %v7352_v28  ;;  %v4876_v18 = vadd.f32 %v4875_v4, %v4874_v54  ;;  %v5552_v28 = vld [vmem:[#allocation30 + $0x60] ss:$8 sps:$4 sm:$0xff]  }
0x1a4d   : > { %4084 = vmatpush1.bf16.msra.mxu0 %v5552_v28 }
0x1a4e   : > { %v3950_v46 = vadd.f32 %v4876_v18, %v7355_v31  ;;  %v3952_v13 = vmul.f32 %v3949_v45, %v3949_v45  ;;  %v5557_v31 = vld [vmem:[#allocation30 + $0x74] ss:$8 sps:$4 sm:$0xff]   ;;  %v4724_v18 = vsel %vm4168_vm5, 1.0, %v6291_v0 }
0x1a4f   : > { %4085 = vmatprep.subr.bf16.mxu0 %v5557_v31 }
0x1a50   : > { %3954 = vadd.xlane.f32.xlu0 %v3952_v13  ;;  %v3953_v14 = vmul.f32 %v3950_v46, %v3950_v46 }
0x1a51   : > { %4086 = vmatpush1.bf16.msra.mxu0 %v5555_v24 }
0x1a52   : > { %3956 = vadd.xlane.f32.xlu1 %v3953_v14 }
0x1add   : > { %v3955_v27 = vpop.xlane.xlu0 %3954 }
0x1ade   : > { %v3958_v60 = vmul.f32 0.0078125, %v3955_v27 }
0x1adf   : > { %v3957_v48 = vpop.xlane.xlu1 %3956 }
0x1ae0   : > { %v3960_v17 = vadd.f32 1e-06, %v3958_v60  ;;  %v3959_v56 = vmul.f32 0.0078125, %v3957_v48 }
0x1ae2   : > { %5670 = vrsqrt.f32 %v3960_v17  ;;  %v3961_v62 = vadd.f32 1e-06, %v3959_v56 }
0x1ae4   : > { %5672 = vrsqrt.f32 %v3961_v62 }
0x1aec   : > { %v5671_v10 = vpop.eup %5670 }
0x1aed   : > { %v3964_v6 = vmul.f32 %v5671_v10, %v3949_v45 }
0x1aee   : > { %v5673_v29 = vpop.eup %5672 }
0x1aef   : > { %v3965_v32 = vmul.f32 %v5673_v29, %v3950_v46  ;;  %v3972_v34 = vmul.f32 %v4706_v33, %v3964_v6  ;;  %v4188_v46 = vsel %vm4177_vm6, %v4724_v18, 0.0 }
0x1af1   : > { %v3973_v35 = vmul.f32 %v4706_v33, %v3965_v32 }
0x1af3   : > { %v3974_v36 = vpack.c.bf16 %v3973_v35, %v3972_v34 }
0x1af5   : > { %4104 = vmatmul.mubr.bf16.vlgmr.msra.gmra.mrb[40].mxu0 %v3974_v36 }
0x1bc8   : > { %v4105_v37 = vpop.f32.mrb[40].mxu0 }
0x1bc9   : > { %v4107_v38 = vpop.f32.mrb[41].mxu0 }
0x1bca   : > { %v4109_v23 = vpop.f32.mrb[42].mxu0  ;;  %v4116_v26 = vmax.f32 %v4105_v37, %v4107_v38 }
0x1bcb   : > { %v4111_v39 = vpop.f32.mrb[43].mxu0 }
0x1bcc   : > { %4117 = vmax.xlane.f32.xlu0 %v4116_v26  ;;  %v4119_v55 = vmax.f32 %v4109_v23, %v4111_v39 }
0x1bce   : > { %4120 = vmax.xlane.f32.xlu1 %v4119_v55 }
0x1bdf   : > { %4151 = vperm.xlu1 %5341, %v4115_v61  }
0x1be2   : > { %4148 = vperm.xlu0 %5340, %v4114_v5  }
0x1c59   : > { %v7371_v40 = vpop.xlane.xlu0 %4117 }
0x1c5a   : > { %v4122_v30 = vsub.f32 %v4105_v37, %v7371_v40  ;;  %v4123_v41 = vsub.f32 %v4107_v38, %v7371_v40 }
0x1c5b   : > { %v4121_v42 = vpop.xlane.xlu1 %4120 }
0x1c5c   : > { %v4126_v43 = vmul.f32 1.442695, %v4122_v30  ;;  %v4128_v49 = vmul.f32 1.442695, %v4123_v41  ;;  %v4124_v50 = vsub.f32 %v4109_v23, %v4121_v42  ;;  %v4125_v25 = vsub.f32 %v4111_v39, %v4121_v42 }
0x1c5e   : > { %5674 = vpow2.f32 %v4126_v43  ;;  %v4130_v51 = vmul.f32 1.442695, %v4124_v50  ;;  %v4132_v52 = vmul.f32 1.442695, %v4125_v25 }
0x1c5f   : > { %5676 = vpow2.f32 %v4128_v49  ;;  %v4152_v53 = vpop.permute.xlu1 %4151 }
0x1c60   : > { %5678 = vpow2.f32 %v4130_v51  ;;  %vm4155_vm0 = vcmp.eq.s32.totalorder %v7038_v44, %v4152_v53  ;;  %vm4156_vm1 = vcmp.eq.s32.totalorder %v4146_v21, %v4152_v53 }
0x1c61   : > { %5680 = vpow2.f32 %v4132_v52  ;;  %v4149_v57 = vpop.permute.xlu0 %4148  ;;  %v4159_v58 = vsel %vm4155_vm0, %v4109_v23, 0.0  ;;  %v4160_v59 = vsel %vm4156_vm1, %v4111_v39, 0.0 }
0x1c62   : > { %vm4153_vm2 = vcmp.eq.s32.totalorder %v7038_v44, %v4149_v57  ;;  %vm4154_vm3 = vcmp.eq.s32.totalorder %v4146_v21, %v4149_v57  ;;  %v4164_v63 = vadd.f32 %v4160_v59, %v4159_v58  ;;  %v4723_v44 = vsel %vm4167_vm4, 1.0, %v6291_v0 }
0x1c63   : > { %v4157_v1 = vsel %vm4153_vm2, %v4105_v37, 0.0  ;;  %v4158_v3 = vsel %vm4154_vm3, %v4107_v38, 0.0  ;;  %v4187_v45 = vsel %vm4177_vm6, %v4723_v44, 0.0 }
0x1c64   : > { %v4161_v7 = vadd.f32 %v4158_v3, %v4157_v1  ;;  %v4189_v13 = vadd.f32 %v4188_v46, %v4187_v45 }
0x1c66   : > { %v4190_v14 = vrot.slane %v4189_v13, 4 }
0x1c68   : > { %v5675_v15 = vpop.eup %5674  ;;  %v4191_v16 = vadd.f32 %v4190_v14, %v4189_v13 }
0x1c69   : > { %v5677_v8 = vpop.eup %5676 }
0x1c6a   : > { %v5679_v9 = vpop.eup %5678  ;;  %v4134_v11 = vadd.f32 %v5677_v8, %v5675_v15  ;;  %v4192_v19 = vrot.slane %v4191_v16, 2 }
0x1c6b   : > { %v5681_v54 = vpop.eup %5680 }
0x1c6c   : > { %4135 = vadd.xlane.f32.xlu1 %v4134_v11  ;;  %v4137_v4 = vadd.f32 %v5681_v54, %v5679_v9  ;;  %v4193_v20 = vadd.f32 %v4192_v19, %v4191_v16 }
0x1c6e   : > { %4138 = vadd.xlane.f32.xlu0 %v4137_v4  ;;  %v4194_v22 = vrot.slane %v4193_v20, 1 }
0x1c70   : > { %4162 = vadd.xlane.f32.xlu1 %v4161_v7  ;;  %v4195_v12 = vadd.f32 %v4194_v22, %v4193_v20 }
0x1c72   : > { %4198 = vst.msk [vmem:[%s1042_s8] sm:$0x1] %vm4196_vm7, %v4195_v12 }
0x1c74   : > { %4165 = vadd.xlane.f32.xlu1 %v4164_v63 }
0x1cf9   : > { %v4136_v47 = vpop.xlane.xlu1 %4135 }
0x1cfa   : > { %5682 = vlog2.f32 %v4136_v47 }
0x1cfb   : > { %v4139_v2 = vpop.xlane.xlu0 %4138 }
0x1cfc   : > { %5684 = vlog2.f32 %v4139_v2 }
0x1cfd   : > { %v4163_v28 = vpop.xlane.xlu1 %4162 }
0x1d01   : > { %v4166_v56 = vpop.xlane.xlu1 %4165 }
0x1d04   : > { %v5683_v0 = vpop.eup %5682 }
0x1d05   : > { %v4141_v31 = vmul.f32 0.6931472, %v5683_v0 }
0x1d06   : > { %v5685_v24 = vpop.eup %5684 }
0x1d07   : > { %v4143_v27 = vmul.f32 0.6931472, %v5685_v24  ;;  %v4144_v60 = vadd.f32 %v4141_v31, %v7371_v40 }
0x1d09   : > { %v4173_v48 = vsub.f32 %v4144_v60, %v4163_v28  ;;  %v4145_v17 = vadd.f32 %v4143_v27, %v4121_v42 }
0x1d0b   : > { %v4175_v62 = vmul.f32 %v4723_v44, %v4173_v48  ;;  %v4174_v10 = vsub.f32 %v4145_v17, %v4166_v56 }
0x1d0d   : > { %v4176_v6 = vmul.f32 %v4724_v18, %v4174_v10  ;;  %v4178_v29 = vsel %vm4177_vm6, %v4175_v62, 0.0 }
0x1d0f   : > { %v4179_v33 = vsel %vm4177_vm6, %v4176_v6, 0.0 }
0x1d10   : > { %v4180_v32 = vadd.f32 %v4179_v33, %v4178_v29 }
0x1d12   : > { %v4181_v34 = vrot.slane %v4180_v32, 4 }
0x1d14   : > { %v4182_v35 = vadd.f32 %v4181_v34, %v4180_v32 }
0x1d16   : > { %v4183_v36 = vrot.slane %v4182_v35, 2 }
0x1d18   : > { %v4184_v37 = vadd.f32 %v4183_v36, %v4182_v35 }
0x1d1a   : > { %v4185_v38 = vrot.slane %v4184_v37, 1 }
0x1d1c   : > { %v4186_v23 = vadd.f32 %v4185_v38, %v4184_v37 }
0x1d1e   : > { %4197 = vst.msk [vmem:[%s1039_s28] sm:$0x1] %vm4196_vm7, %v4186_v23 }
0x1d1f PF: > { %s7509_s11 = sld [smem:[#allocation41_spill]] }
0x1d25   : > { %s45_s5 = sadd.s32 1, %s7509_s11  }
0x1d26   : > { %p42_p6 = scmp.ge.s32.totalorder %s45_s5, 4  }
0x1d28   :  { %44 = sbr.rel (!%p42_p6) target bundleno = 27 (0x1b), region = 237 }
0x1d2f   :  { %4228 = vsyncpa [#allocation3], 1 }
0x1d30   :  { %4230 = vsyncpa [#allocation3 + $0x1], 1 }
0x1d31   :  { %4231 = vsyncpa [#allocation5], 1 }
0x1d32   :  { %4232 = vsyncpa [#allocation8], 1 }
0x1d33   :  { %4233 = vsyncpa [#allocation11], 1 }
0x1d34   :  { %4234 = vsyncpa [#allocation14], 1 }
0x1d35   :  { %4235 = vsyncpa [#allocation17], 1 }
0x1d36   :  { %4236 = vsyncpa [#allocation20], 1 }
0x1d37   :  { %4237 = vsyncpa [#allocation23], 1 }
0x1d38   :  { %4238 = vsyncpa [#allocation26], 1 }
0x1d39   :  { %4239 = vsyncpa [#allocation29], 1 }

</bundles_post_ra>
